<compile_context>
chip_gen: v7x
topology: tpu7x:2x2x1
jax: 0.10.0
libtpu: 0.0.40
codegen_flags: <defaults>
</compile_context>

<pallas_src>
import jax
import jax.numpy as jnp
from jax.experimental import pallas as pl
from jax.experimental.pallas import tpu as pltpu

DIM = 4          # T-Net transform dimension
NPTS = 256       # number of points (module default 10000; small here)
BS = 2           # batch size
EPS = 1e-5       # BatchNorm eps (PyTorch default)


# -----------------------------------------------------------------------------
# Fused kernel: conv1/2/3 (k=1) + ReLU + per-batch max-pool + FC head.
# BN layers and the final identity are pre-folded host-side; grid = (1,).
# -----------------------------------------------------------------------------
def tnet_fused_kernel(x_ref,
                      w1t_ref, b1_ref,
                      w2_ref, b2_ref,
                      w3_ref, b3_ref,
                      w4_ref, b4_ref,
                      w5_ref, b5_ref,
                      w6_ref, b6_ref,
                      out_ref):
    # ---- conv1 (k=1) + ReLU, reading the NCW input directly ---------------
    # Channels-major per batch element: (64, DIM) @ (DIM, NPTS) -> (64, NPTS).
    # Only the aligned (64, NPTS) result is transposed; the raw x never is.
    h1_parts = []
    for b in range(BS):                                   # static, BS == 2
        xb = x_ref[b]                                               # (DIM, NPTS) f32
        h = jnp.dot(w1t_ref[...], xb,
                    preferred_element_type=jnp.float32)             # (64, NPTS)
        h = jnp.maximum(h + b1_ref[...], 0.0)                       # bias (64, 1)
        h1_parts.append(h.T)                                        # (NPTS, 64)
    h1 = jnp.concatenate(h1_parts, axis=0)                          # (BS*NPTS, 64)

    # ---- conv2 + ReLU            (bn1 folded into w2/b2) -------------------
    h2 = jnp.dot(h1.astype(jnp.bfloat16), w2_ref[...],
                 preferred_element_type=jnp.float32) + b2_ref[...]
    h2 = jnp.maximum(h2, 0.0)                                       # (BS*NPTS, 128)

    # ---- conv3 + ReLU            (bn2 folded into w3/b3) -------------------
    # TODO(synk): at NPTS=10000, chunk the 1024 output channels with a running
    # max instead of materializing the full (BS*NPTS, 1024) slab.
    h3 = jnp.dot(h2.astype(jnp.bfloat16), w3_ref[...],
                 preferred_element_type=jnp.float32) + b3_ref[...]
    h3 = jnp.maximum(h3, 0.0)                                       # (BS*NPTS, 1024)

    # ---- global max-pool over points, per batch element --------------------
    f = jnp.concatenate(
        [jnp.max(h3[b * NPTS:(b + 1) * NPTS], axis=0, keepdims=True)
         for b in range(BS)], axis=0)                               # (BS, 1024)

    # ---- FC head (M = BS)        (bn3->w4/b4, bn4->w5/b5, bn5->w6/b6) ------
    g = jnp.dot(f.astype(jnp.bfloat16), w4_ref[...],
                preferred_element_type=jnp.float32) + b4_ref[...]
    g = jnp.maximum(g, 0.0)                                         # (BS, 512)
    g = jnp.dot(g.astype(jnp.bfloat16), w5_ref[...],
                preferred_element_type=jnp.float32) + b5_ref[...]
    g = jnp.maximum(g, 0.0)                                         # (BS, 256)
    out = jnp.dot(g.astype(jnp.bfloat16), w6_ref[...],
                  preferred_element_type=jnp.float32) + b6_ref[...]  # (BS, 16)
    out_ref[...] = out          # identity matrix already folded into b6


# -----------------------------------------------------------------------------
# Parameters: raw (PyTorch-like) params, then host-side BN/identity folding.
# -----------------------------------------------------------------------------
def make_raw_params(key):
    def dense(k, fan_in, fan_out, scale=0.1):
        kw, kb = jax.random.split(k)
        w = scale * jax.random.normal(kw, (fan_in, fan_out), jnp.float32)
        b = scale * jax.random.normal(kb, (fan_out,), jnp.float32)
        return w, b

    def bn(k, ch):
        k1, k2, k3, k4 = jax.random.split(k, 4)
        gamma = 1.0 + 0.1 * jnp.abs(jax.random.normal(k1, (ch,), jnp.float32))  # > 0
        beta = 0.1 * jax.random.normal(k2, (ch,), jnp.float32)
        mean = 0.1 * jax.random.normal(k3, (ch,), jnp.float32)
        var = 0.5 + jnp.abs(jax.random.normal(k4, (ch,), jnp.float32))
        return gamma, beta, mean, var

    keys = jax.random.split(key, 11)
    rp = {}
    rp["w1"], rp["b1"] = dense(keys[0], DIM, 64)
    rp["w2"], rp["b2"] = dense(keys[1], 64, 128)
    rp["w3"], rp["b3"] = dense(keys[2], 128, 1024)
    rp["w4"], rp["b4"] = dense(keys[3], 1024, 512)
    rp["w5"], rp["b5"] = dense(keys[4], 512, 256)
    rp["w6"], rp["b6"] = dense(keys[5], 256, DIM * DIM)
    for i, ch in enumerate((64, 128, 1024, 512, 256), start=1):
        rp[f"g{i}"], rp[f"be{i}"], rp[f"m{i}"], rp[f"v{i}"] = bn(keys[5 + i], ch)
    return rp


def fold_params(rp, weight_dtype=jnp.bfloat16):
    """Fold inference-mode BN (a*relu(z)+c) into the following layer's weights.

    a*relu(z)+c followed by @W  ==  relu(z) @ (diag(a) W) + (c @ W + b).
    bn3 sits before the max-pool; since a3 > 0 (asserted), max(a3*r+c3) =
    a3*max(r)+c3, so it folds into linear1 as well.  The module tail's
    `+ identity` is folded into b6 (exact math).
    """
    def scale_shift(i):
        a = rp[f"g{i}"] / jnp.sqrt(rp[f"v{i}"] + EPS)
        return a, rp[f"be{i}"] - rp[f"m{i}"] * a

    a1, c1 = scale_shift(1)
    a2, c2 = scale_shift(2)
    a3, c3 = scale_shift(3)
    a4, c4 = scale_shift(4)
    a5, c5 = scale_shift(5)

    # Required for commuting bn3 with the max-pool (review correctness concern).
    assert float(jnp.min(a3)) > 0.0, \
        "bn3 scale must be strictly positive to fold it through the max-pool"

    def fold(w, b, a_prev, c_prev):
        w_f = (a_prev[:, None] * w).astype(weight_dtype)
        b_f = (c_prev @ w + b).reshape(1, -1).astype(jnp.float32)
        return w_f, b_f

    fp = {}
    # conv1: f32 (tiny), stored transposed (out, in) for the channels-major
    # in-kernel matmul; bias stored as a (64, 1) column.
    fp["w1t"] = jnp.transpose(rp["w1"]).astype(jnp.float32)          # (64, DIM)
    fp["b1"] = rp["b1"].reshape(-1, 1).astype(jnp.float32)           # (64, 1)
    fp["w2"], fp["b2"] = fold(rp["w2"], rp["b2"], a1, c1)
    fp["w3"], fp["b3"] = fold(rp["w3"], rp["b3"], a2, c2)
    fp["w4"], fp["b4"] = fold(rp["w4"], rp["b4"], a3, c3)   # valid: a3 > 0
    fp["w5"], fp["b5"] = fold(rp["w5"], rp["b5"], a4, c4)
    fp["w6"], fp["b6"] = fold(rp["w6"], rp["b6"], a5, c5)
    # Fold the `+ identity` into the last bias: removes the post-kernel fusion.
    fp["b6"] = fp["b6"] + jnp.eye(DIM, dtype=jnp.float32).reshape(1, DIM * DIM)
    return fp


# -----------------------------------------------------------------------------
# Wrapper: a single pallas_call, no pre/post math around it.
# -----------------------------------------------------------------------------
@jax.jit
def tnet_forward(x_ncw, fp):
    # x_ncw: (BS, DIM, NPTS) PyTorch NCW layout, consumed directly by the kernel.
    c2d = lambda i: (0, 0)
    flat = pl.pallas_call(
        tnet_fused_kernel,
        out_shape=jax.ShapeDtypeStruct((BS, DIM * DIM), jnp.float32),
        grid=(1,),
        in_specs=[
            pl.BlockSpec((BS, DIM, NPTS), lambda i: (0, 0, 0)),
            pl.BlockSpec((64, DIM), c2d), pl.BlockSpec((64, 1), c2d),
            pl.BlockSpec((64, 128), c2d), pl.BlockSpec((1, 128), c2d),
            pl.BlockSpec((128, 1024), c2d), pl.BlockSpec((1, 1024), c2d),
            pl.BlockSpec((1024, 512), c2d), pl.BlockSpec((1, 512), c2d),
            pl.BlockSpec((512, 256), c2d), pl.BlockSpec((1, 256), c2d),
            pl.BlockSpec((256, DIM * DIM), c2d), pl.BlockSpec((1, DIM * DIM), c2d),
        ],
        out_specs=pl.BlockSpec((BS, DIM * DIM), c2d),
        compiler_params=pltpu.CompilerParams(
            dimension_semantics=("arbitrary",)),   # grid=(1,): single step
    )(x_ncw.astype(jnp.float32),
      fp["w1t"], fp["b1"], fp["w2"], fp["b2"], fp["w3"], fp["b3"],
      fp["w4"], fp["b4"], fp["w5"], fp["b5"], fp["w6"], fp["b6"])
    # Only a (free) reshape remains outside the kernel; identity is in b6.
    return flat.reshape(BS, DIM, DIM)


# -----------------------------------------------------------------------------
# Pure-JAX references for correctness checking
# -----------------------------------------------------------------------------
def tnet_reference_unfolded(x_ncw, rp):
    """Original module semantics: bn(relu(.)) in f32, identity added at the end."""
    x = jnp.transpose(x_ncw, (0, 2, 1)).astype(jnp.float32)

    def bn(h, i):
        return ((h - rp[f"m{i}"]) / jnp.sqrt(rp[f"v{i}"] + EPS)) * rp[f"g{i}"] + rp[f"be{i}"]

    h = bn(jnp.maximum(x @ rp["w1"] + rp["b1"], 0.0), 1)
    h = bn(jnp.maximum(h @ rp["w2"] + rp["b2"], 0.0), 2)
    h = bn(jnp.maximum(h @ rp["w3"] + rp["b3"], 0.0), 3)
    f = jnp.max(h, axis=1)
    g = bn(jnp.maximum(f @ rp["w4"] + rp["b4"], 0.0), 4)
    g = bn(jnp.maximum(g @ rp["w5"] + rp["b5"], 0.0), 5)
    out = g @ rp["w6"] + rp["b6"]
    return out.reshape(BS, DIM, DIM) + jnp.eye(DIM, dtype=jnp.float32)[None]


def tnet_reference_folded(x_ncw, fp):
    """Same math/dtypes as the kernel (folded params, casts at the MXU boundary)."""
    x = jnp.transpose(x_ncw, (0, 2, 1)).astype(jnp.float32)      # (BS, NPTS, DIM)

    def lin(h, w, b):
        return jnp.matmul(h.astype(w.dtype), w,
                          preferred_element_type=jnp.float32) + b

    h = jnp.maximum(jnp.matmul(x, fp["w1t"].T,
                               preferred_element_type=jnp.float32)
                    + fp["b1"].reshape(1, 1, -1), 0.0)
    h = jnp.maximum(lin(h, fp["w2"], fp["b2"]), 0.0)
    h = jnp.maximum(lin(h, fp["w3"], fp["b3"]), 0.0)
    f = jnp.max(h, axis=1)
    g = jnp.maximum(lin(f, fp["w4"], fp["b4"]), 0.0)
    g = jnp.maximum(lin(g, fp["w5"], fp["b5"]), 0.0)
    out = lin(g, fp["w6"], fp["b6"])       # identity already folded into b6
    return out.reshape(BS, DIM, DIM)


if __name__ == "__main__":
    key = jax.random.PRNGKey(0)
    kx, kp = jax.random.split(key)
    x = jax.random.normal(kx, (BS, DIM, NPTS), jnp.float32)   # PyTorch NCW input
    raw = make_raw_params(kp)

    # 1) Folding (BN + identity) is exact in f32 vs the original module math.
    fp_f32 = fold_params(raw, weight_dtype=jnp.float32)
    ref_module = tnet_reference_unfolded(x, raw)
    ref_folded_f32 = tnet_reference_folded(x, fp_f32)
    err_fold = jnp.max(jnp.abs(ref_folded_f32 - ref_module))
    assert jnp.allclose(ref_folded_f32, ref_module, rtol=5e-4, atol=5e-4), (
        f"BN/identity folding mismatch, max abs err {err_fold}")

    # 2) Kernel matches the same (folded, bf16-weight) math tightly.
    fp = fold_params(raw, weight_dtype=jnp.bfloat16)
    out = jax.block_until_ready(tnet_forward(x, fp))
    ref_exact = tnet_reference_folded(x, fp)
    err_kernel = jnp.max(jnp.abs(out - ref_exact))
    assert out.shape == (BS, DIM, DIM)
    assert jnp.allclose(out, ref_exact, rtol=1e-3, atol=1e-3), (
        f"kernel mismatch, max abs err {err_kernel}")

    # 3) End-to-end vs the original f32 module (loose: bf16 weight quantization,
    #    an explicit inference-accuracy decision per the review).
    err_e2e = jnp.max(jnp.abs(out - ref_module))
    assert jnp.allclose(out, ref_module, rtol=1e-1, atol=1e-1), (
        f"end-to-end mismatch, max abs err {err_e2e}")

    print("KERNEL_OK")
</pallas_src>

<mosaic_0001>
module attributes {stable_mosaic.version = 11 : i64} {
  func.func @tnet_fused_kernel(%arg0: i32, %arg1: memref<2x4x256xf32, #tpu.memory_space<vmem>>, %arg2: memref<64x4xf32, #tpu.memory_space<vmem>>, %arg3: memref<64x1xf32, #tpu.memory_space<vmem>>, %arg4: memref<64x128xbf16, #tpu.memory_space<vmem>>, %arg5: memref<1x128xf32, #tpu.memory_space<vmem>>, %arg6: memref<128x1024xbf16, #tpu.memory_space<vmem>>, %arg7: memref<1x1024xf32, #tpu.memory_space<vmem>>, %arg8: memref<1024x512xbf16, #tpu.memory_space<vmem>>, %arg9: memref<1x512xf32, #tpu.memory_space<vmem>>, %arg10: memref<512x256xbf16, #tpu.memory_space<vmem>>, %arg11: memref<1x256xf32, #tpu.memory_space<vmem>>, %arg12: memref<256x16xbf16, #tpu.memory_space<vmem>>, %arg13: memref<1x16xf32, #tpu.memory_space<vmem>>, %arg14: memref<2x16xf32, #tpu.memory_space<vmem>>) attributes {dimension_semantics = [#tpu.dimension_semantics<arbitrary>], iteration_bounds = array<i64: 1>, scalar_prefetch = 0 : i64, scratch_operands = 0 : i64, tpu.core_type = #tpu.core_type<tc>, window_params = [{pipeline_mode = #tpu.pipeline_mode<synchronous>, transform_indices = @transform_0, window_bounds = array<i64: 2, 4, 256>}, {pipeline_mode = #tpu.pipeline_mode<synchronous>, transform_indices = @transform_1, window_bounds = array<i64: 64, 4>}, {pipeline_mode = #tpu.pipeline_mode<synchronous>, transform_indices = @transform_2, window_bounds = array<i64: 64, 1>}, {pipeline_mode = #tpu.pipeline_mode<synchronous>, transform_indices = @transform_3, window_bounds = array<i64: 64, 128>}, {pipeline_mode = #tpu.pipeline_mode<synchronous>, transform_indices = @transform_4, window_bounds = array<i64: 1, 128>}, {pipeline_mode = #tpu.pipeline_mode<synchronous>, transform_indices = @transform_5, window_bounds = array<i64: 128, 1024>}, {pipeline_mode = #tpu.pipeline_mode<synchronous>, transform_indices = @transform_6, window_bounds = array<i64: 1, 1024>}, {pipeline_mode = #tpu.pipeline_mode<synchronous>, transform_indices = @transform_7, window_bounds = array<i64: 1024, 512>}, {pipeline_mode = #tpu.pipeline_mode<synchronous>, transform_indices = @transform_8, window_bounds = array<i64: 1, 512>}, {pipeline_mode = #tpu.pipeline_mode<synchronous>, transform_indices = @transform_9, window_bounds = array<i64: 512, 256>}, {pipeline_mode = #tpu.pipeline_mode<synchronous>, transform_indices = @transform_10, window_bounds = array<i64: 1, 256>}, {pipeline_mode = #tpu.pipeline_mode<synchronous>, transform_indices = @transform_11, window_bounds = array<i64: 256, 16>}, {pipeline_mode = #tpu.pipeline_mode<synchronous>, transform_indices = @transform_12, window_bounds = array<i64: 1, 16>}, {pipeline_mode = #tpu.pipeline_mode<synchronous>, transform_indices = @transform_13, window_bounds = array<i64: 2, 16>}]} {
    %c0 = arith.constant 0 : index
    %c0_0 = arith.constant 0 : index
    %c0_1 = arith.constant 0 : index
    %0 = vector.load %arg1[%c0, %c0_0, %c0_1] : memref<2x4x256xf32, #tpu.memory_space<vmem>>, vector<1x4x256xf32>
    %1 = vector.shape_cast %0 : vector<1x4x256xf32> to vector<4x256xf32>
    %c0_2 = arith.constant 0 : index
    %c0_3 = arith.constant 0 : index
    %2 = vector.load %arg2[%c0_2, %c0_3] : memref<64x4xf32, #tpu.memory_space<vmem>>, vector<64x4xf32>
    %cst = arith.constant dense<0.000000e+00> : vector<64x256xf32>
    %3 = tpu.matmul %2, %1, %cst {dimension_numbers = #tpu.dot_dimension_numbers<[1], [0], [0], [1], [0, 0, 1, 1], [], []>} : vector<64x4xf32>, vector<4x256xf32>, vector<64x256xf32> -> vector<64x256xf32>
    %c0_4 = arith.constant 0 : index
    %c0_5 = arith.constant 0 : index
    %4 = vector.load %arg3[%c0_4, %c0_5] : memref<64x1xf32, #tpu.memory_space<vmem>>, vector<64x1xf32>
    %5 = vector.broadcast %4 : vector<64x1xf32> to vector<64x256xf32>
    %6 = arith.addf %3, %5 : vector<64x256xf32>
    %cst_6 = arith.constant 0.000000e+00 : f32
    %7 = vector.broadcast %cst_6 : f32 to vector<64x256xf32>
    %8 = arith.maximumf %6, %7 : vector<64x256xf32>
    %9 = tpu.transpose %8, [1, 0] : vector<64x256xf32> -> vector<256x64xf32>
    %c1 = arith.constant 1 : index
    %c0_7 = arith.constant 0 : index
    %c0_8 = arith.constant 0 : index
    %10 = vector.load %arg1[%c1, %c0_7, %c0_8] : memref<2x4x256xf32, #tpu.memory_space<vmem>>, vector<1x4x256xf32>
    %11 = vector.shape_cast %10 : vector<1x4x256xf32> to vector<4x256xf32>
    %c0_9 = arith.constant 0 : index
    %c0_10 = arith.constant 0 : index
    %12 = vector.load %arg2[%c0_9, %c0_10] : memref<64x4xf32, #tpu.memory_space<vmem>>, vector<64x4xf32>
    %cst_11 = arith.constant dense<0.000000e+00> : vector<64x256xf32>
    %13 = tpu.matmul %12, %11, %cst_11 {dimension_numbers = #tpu.dot_dimension_numbers<[1], [0], [0], [1], [0, 0, 1, 1], [], []>} : vector<64x4xf32>, vector<4x256xf32>, vector<64x256xf32> -> vector<64x256xf32>
    %c0_12 = arith.constant 0 : index
    %c0_13 = arith.constant 0 : index
    %14 = vector.load %arg3[%c0_12, %c0_13] : memref<64x1xf32, #tpu.memory_space<vmem>>, vector<64x1xf32>
    %15 = vector.broadcast %14 : vector<64x1xf32> to vector<64x256xf32>
    %16 = arith.addf %13, %15 : vector<64x256xf32>
    %cst_14 = arith.constant 0.000000e+00 : f32
    %17 = vector.broadcast %cst_14 : f32 to vector<64x256xf32>
    %18 = arith.maximumf %16, %17 : vector<64x256xf32>
    %19 = tpu.transpose %18, [1, 0] : vector<64x256xf32> -> vector<256x64xf32>
    %20 = tpu.concatenate %9, %19 in 0 : vector<256x64xf32>, vector<256x64xf32> -> vector<512x64xf32>
    %21 = arith.truncf %20 : vector<512x64xf32> to vector<512x64xbf16>
    %c0_15 = arith.constant 0 : index
    %c0_16 = arith.constant 0 : index
    %22 = vector.load %arg4[%c0_15, %c0_16] : memref<64x128xbf16, #tpu.memory_space<vmem>>, vector<64x128xbf16>
    %cst_17 = arith.constant dense<0.000000e+00> : vector<512x128xf32>
    %23 = tpu.matmul %21, %22, %cst_17 {dimension_numbers = #tpu.dot_dimension_numbers<[1], [0], [0], [1], [0, 0, 1, 1], [], []>} : vector<512x64xbf16>, vector<64x128xbf16>, vector<512x128xf32> -> vector<512x128xf32>
    %c0_18 = arith.constant 0 : index
    %c0_19 = arith.constant 0 : index
    %24 = vector.load %arg5[%c0_18, %c0_19] : memref<1x128xf32, #tpu.memory_space<vmem>>, vector<1x128xf32>
    %25 = vector.broadcast %24 : vector<1x128xf32> to vector<512x128xf32>
    %26 = arith.addf %23, %25 : vector<512x128xf32>
    %cst_20 = arith.constant 0.000000e+00 : f32
    %27 = vector.broadcast %cst_20 : f32 to vector<512x128xf32>
    %28 = arith.maximumf %26, %27 : vector<512x128xf32>
    %29 = arith.truncf %28 : vector<512x128xf32> to vector<512x128xbf16>
    %c0_21 = arith.constant 0 : index
    %c0_22 = arith.constant 0 : index
    %30 = vector.load %arg6[%c0_21, %c0_22] : memref<128x1024xbf16, #tpu.memory_space<vmem>>, vector<128x1024xbf16>
    %cst_23 = arith.constant dense<0.000000e+00> : vector<512x1024xf32>
    %31 = tpu.matmul %29, %30, %cst_23 {dimension_numbers = #tpu.dot_dimension_numbers<[1], [0], [0], [1], [0, 0, 1, 1], [], []>} : vector<512x128xbf16>, vector<128x1024xbf16>, vector<512x1024xf32> -> vector<512x1024xf32>
    %c0_24 = arith.constant 0 : index
    %c0_25 = arith.constant 0 : index
    %32 = vector.load %arg7[%c0_24, %c0_25] : memref<1x1024xf32, #tpu.memory_space<vmem>>, vector<1x1024xf32>
    %33 = vector.broadcast %32 : vector<1x1024xf32> to vector<512x1024xf32>
    %34 = arith.addf %31, %33 : vector<512x1024xf32>
    %cst_26 = arith.constant 0.000000e+00 : f32
    %35 = vector.broadcast %cst_26 : f32 to vector<512x1024xf32>
    %36 = arith.maximumf %34, %35 : vector<512x1024xf32>
    %37 = vector.extract_strided_slice %36 {offsets = [0, 0], sizes = [256, 1024], strides = [1, 1]} : vector<512x1024xf32> to vector<256x1024xf32>
    %cst_27 = arith.constant dense<0xFF800000> : vector<1024xf32>
    %38 = vector.multi_reduction <maximumf>, %37, %cst_27 [0] : vector<256x1024xf32> to vector<1024xf32>
    %39 = vector.shape_cast %38 : vector<1024xf32> to vector<1x1024xf32>
    %40 = vector.extract_strided_slice %36 {offsets = [256, 0], sizes = [256, 1024], strides = [1, 1]} : vector<512x1024xf32> to vector<256x1024xf32>
    %cst_28 = arith.constant dense<0xFF800000> : vector<1024xf32>
    %41 = vector.multi_reduction <maximumf>, %40, %cst_28 [0] : vector<256x1024xf32> to vector<1024xf32>
    %42 = vector.shape_cast %41 : vector<1024xf32> to vector<1x1024xf32>
    %43 = tpu.concatenate %39, %42 in 0 : vector<1x1024xf32>, vector<1x1024xf32> -> vector<2x1024xf32>
    %44 = arith.truncf %43 : vector<2x1024xf32> to vector<2x1024xbf16>
    %c0_29 = arith.constant 0 : index
    %c0_30 = arith.constant 0 : index
    %45 = vector.load %arg8[%c0_29, %c0_30] : memref<1024x512xbf16, #tpu.memory_space<vmem>>, vector<1024x512xbf16>
    %cst_31 = arith.constant dense<0.000000e+00> : vector<2x512xf32>
    %46 = tpu.matmul %44, %45, %cst_31 {dimension_numbers = #tpu.dot_dimension_numbers<[1], [0], [0], [1], [0, 0, 1, 1], [], []>} : vector<2x1024xbf16>, vector<1024x512xbf16>, vector<2x512xf32> -> vector<2x512xf32>
    %c0_32 = arith.constant 0 : index
    %c0_33 = arith.constant 0 : index
    %47 = vector.load %arg9[%c0_32, %c0_33] : memref<1x512xf32, #tpu.memory_space<vmem>>, vector<1x512xf32>
    %48 = vector.broadcast %47 : vector<1x512xf32> to vector<2x512xf32>
    %49 = arith.addf %46, %48 : vector<2x512xf32>
    %cst_34 = arith.constant 0.000000e+00 : f32
    %50 = vector.broadcast %cst_34 : f32 to vector<2x512xf32>
    %51 = arith.maximumf %49, %50 : vector<2x512xf32>
    %52 = arith.truncf %51 : vector<2x512xf32> to vector<2x512xbf16>
    %c0_35 = arith.constant 0 : index
    %c0_36 = arith.constant 0 : index
    %53 = vector.load %arg10[%c0_35, %c0_36] : memref<512x256xbf16, #tpu.memory_space<vmem>>, vector<512x256xbf16>
    %cst_37 = arith.constant dense<0.000000e+00> : vector<2x256xf32>
    %54 = tpu.matmul %52, %53, %cst_37 {dimension_numbers = #tpu.dot_dimension_numbers<[1], [0], [0], [1], [0, 0, 1, 1], [], []>} : vector<2x512xbf16>, vector<512x256xbf16>, vector<2x256xf32> -> vector<2x256xf32>
    %c0_38 = arith.constant 0 : index
    %c0_39 = arith.constant 0 : index
    %55 = vector.load %arg11[%c0_38, %c0_39] : memref<1x256xf32, #tpu.memory_space<vmem>>, vector<1x256xf32>
    %56 = vector.broadcast %55 : vector<1x256xf32> to vector<2x256xf32>
    %57 = arith.addf %54, %56 : vector<2x256xf32>
    %cst_40 = arith.constant 0.000000e+00 : f32
    %58 = vector.broadcast %cst_40 : f32 to vector<2x256xf32>
    %59 = arith.maximumf %57, %58 : vector<2x256xf32>
    %60 = arith.truncf %59 : vector<2x256xf32> to vector<2x256xbf16>
    %c0_41 = arith.constant 0 : index
    %c0_42 = arith.constant 0 : index
    %61 = vector.load %arg12[%c0_41, %c0_42] : memref<256x16xbf16, #tpu.memory_space<vmem>>, vector<256x16xbf16>
    %cst_43 = arith.constant dense<0.000000e+00> : vector<2x16xf32>
    %62 = tpu.matmul %60, %61, %cst_43 {dimension_numbers = #tpu.dot_dimension_numbers<[1], [0], [0], [1], [0, 0, 1, 1], [], []>} : vector<2x256xbf16>, vector<256x16xbf16>, vector<2x16xf32> -> vector<2x16xf32>
    %c0_44 = arith.constant 0 : index
    %c0_45 = arith.constant 0 : index
    %63 = vector.load %arg13[%c0_44, %c0_45] : memref<1x16xf32, #tpu.memory_space<vmem>>, vector<1x16xf32>
    %64 = vector.broadcast %63 : vector<1x16xf32> to vector<2x16xf32>
    %65 = arith.addf %62, %64 : vector<2x16xf32>
    %c0_46 = arith.constant 0 : index
    %c0_47 = arith.constant 0 : index
    %66 = vector.load %arg14[%c0_46, %c0_47] : memref<2x16xf32, #tpu.memory_space<vmem>>, vector<2x16xf32>
    tpu.vector_store %arg14[%c0_46, %c0_47], %65 {strides = array<i32>} : memref<2x16xf32, #tpu.memory_space<vmem>>, vector<2x16xf32>,
    return
  }
  func.func @transform_0(%arg0: i32) -> (i32, i32, i32) {
    %c0_i32 = arith.constant 0 : i32
    %c0_i32_0 = arith.constant 0 : i32
    %c0_i32_1 = arith.constant 0 : i32
    %c0_i32_2 = arith.constant 0 : i32
    return %c0_i32, %c0_i32_0, %c0_i32_1 : i32, i32, i32
  }
  func.func @transform_1(%arg0: i32) -> (i32, i32) {
    %c0_i32 = arith.constant 0 : i32
    %c0_i32_0 = arith.constant 0 : i32
    %c0_i32_1 = arith.constant 0 : i32
    return %c0_i32, %c0_i32_0 : i32, i32
  }
  func.func @transform_2(%arg0: i32) -> (i32, i32) {
    %c0_i32 = arith.constant 0 : i32
    %c0_i32_0 = arith.constant 0 : i32
    %c0_i32_1 = arith.constant 0 : i32
    return %c0_i32, %c0_i32_0 : i32, i32
  }
  func.func @transform_3(%arg0: i32) -> (i32, i32) {
    %c0_i32 = arith.constant 0 : i32
    %c0_i32_0 = arith.constant 0 : i32
    %c0_i32_1 = arith.constant 0 : i32
    return %c0_i32, %c0_i32_0 : i32, i32
  }
  func.func @transform_4(%arg0: i32) -> (i32, i32) {
    %c0_i32 = arith.constant 0 : i32
    %c0_i32_0 = arith.constant 0 : i32
    %c0_i32_1 = arith.constant 0 : i32
    return %c0_i32, %c0_i32_0 : i32, i32
  }
  func.func @transform_5(%arg0: i32) -> (i32, i32) {
    %c0_i32 = arith.constant 0 : i32
    %c0_i32_0 = arith.constant 0 : i32
    %c0_i32_1 = arith.constant 0 : i32
    return %c0_i32, %c0_i32_0 : i32, i32
  }
  func.func @transform_6(%arg0: i32) -> (i32, i32) {
    %c0_i32 = arith.constant 0 : i32
    %c0_i32_0 = arith.constant 0 : i32
    %c0_i32_1 = arith.constant 0 : i32
    return %c0_i32, %c0_i32_0 : i32, i32
  }
  func.func @transform_7(%arg0: i32) -> (i32, i32) {
    %c0_i32 = arith.constant 0 : i32
    %c0_i32_0 = arith.constant 0 : i32
    %c0_i32_1 = arith.constant 0 : i32
    return %c0_i32, %c0_i32_0 : i32, i32
  }
  func.func @transform_8(%arg0: i32) -> (i32, i32) {
    %c0_i32 = arith.constant 0 : i32
    %c0_i32_0 = arith.constant 0 : i32
    %c0_i32_1 = arith.constant 0 : i32
    return %c0_i32, %c0_i32_0 : i32, i32
  }
  func.func @transform_9(%arg0: i32) -> (i32, i32) {
    %c0_i32 = arith.constant 0 : i32
    %c0_i32_0 = arith.constant 0 : i32
    %c0_i32_1 = arith.constant 0 : i32
    return %c0_i32, %c0_i32_0 : i32, i32
  }
  func.func @transform_10(%arg0: i32) -> (i32, i32) {
    %c0_i32 = arith.constant 0 : i32
    %c0_i32_0 = arith.constant 0 : i32
    %c0_i32_1 = arith.constant 0 : i32
    return %c0_i32, %c0_i32_0 : i32, i32
  }
  func.func @transform_11(%arg0: i32) -> (i32, i32) {
    %c0_i32 = arith.constant 0 : i32
    %c0_i32_0 = arith.constant 0 : i32
    %c0_i32_1 = arith.constant 0 : i32
    return %c0_i32, %c0_i32_0 : i32, i32
  }
  func.func @transform_12(%arg0: i32) -> (i32, i32) {
    %c0_i32 = arith.constant 0 : i32
    %c0_i32_0 = arith.constant 0 : i32
    %c0_i32_1 = arith.constant 0 : i32
    return %c0_i32, %c0_i32_0 : i32, i32
  }
  func.func @transform_13(%arg0: i32) -> (i32, i32) {
    %c0_i32 = arith.constant 0 : i32
    %c0_i32_0 = arith.constant 0 : i32
    %c0_i32_1 = arith.constant 0 : i32
    return %c0_i32, %c0_i32_0 : i32, i32
  }
}

</mosaic_0001>

<bundles_post_ra>
// kernel: tnet_forward.1
= control target key start
LH: loop header
LB: loop body
LE: loop exit
PB: predicated region body
PF: predicated region fallthrough
CT: control target
= control target key end

     0   :  { %18 = vsyncpa [#allocation3], 0  ;;  %s9335_s0 = inlined_call_operand.vmem [shape: f32[2,4,256], index: 0, kind: input, shape index: {}]   ;;  %s9336_s1 = inlined_call_operand.vmem [shape: f32[64,4], index: 1, kind: input, shape index: {}]   ;;  %s9337_s2 = inlined_call_operand.vmem [shape: f32[64,1], index: 2, kind: input, shape index: {}]   ;;  %s9338_s3 = inlined_call_operand.vmem [shape: bf16[64,128], index: 3, kind: input, shape index: {}]   ;;  %s9339_s4 = inlined_call_operand.vmem [shape: f32[1,128], index: 4, kind: input, shape index: {}]   ;;  %s9340_s5 = inlined_call_operand.hbm [shape: bf16[128,1024], index: 5, kind: input, shape index: {}]   ;;  %s9341_s6 = inlined_call_operand.vmem [shape: f32[1,1024], index: 6, kind: input, shape index: {}]   ;;  %s9342_s7 = inlined_call_operand.hbm [shape: bf16[1024,512], index: 7, kind: input, shape index: {}]   ;;  %s9343_s8 = inlined_call_operand.vmem [shape: f32[1,512], index: 8, kind: input, shape index: {}]   ;;  %s9344_s9 = inlined_call_operand.hbm [shape: bf16[512,256], index: 9, kind: input, shape index: {}]   ;;  %s9345_s10 = inlined_call_operand.vmem [shape: f32[1,256], index: 10, kind: input, shape index: {}]   ;;  %s9346_s11 = inlined_call_operand.vmem [shape: bf16[256,16], index: 11, kind: input, shape index: {}]   ;;  %s9347_s12 = inlined_call_operand.vmem [shape: f32[1,16], index: 12, kind: input, shape index: {}]   ;;  %s9348_s13 = inlined_call_operand.vmem [shape: f32[2,16], index: 13, kind: output, shape index: {}]  }
   0x1   :  { %19 = vsyncpa [#allocation5], 0  ;;  %s7851_s25 = smov [#allocation4]   ;;  %s7781_s29 = scalar_lea.hbm %s9342_s7, 32768 }
   0x2   :  { %s49_s26 = sshll.u32 %s7851_s25, 4  ;;  %p7782_p0 = scmp.ne.s32.totalorder %s9342_s7, %s7781_s29  ;;  %s50_s26 = int_to_ptr.vmem [resolvable:$true] %s49_s26 }
   0x3   :  { %p7785_p1 = scmp.lt.u32.totalorder %s7781_s29, %s9342_s7 }
   0x5   :  { %p7787_p2 = pnand %p7785_p1, %p7782_p0 }
   0x7   :  { %7790 = shalt.err (!%p7787_p2)
}
   0x8   :  { %s7791_s17 = scalar_lea.vmem %s50_s26, 32768  ;;  %p7796_p4 = scmp.lt.s32.totalorder %s50_s26, %s50_s26 }
   0x9   :  { %p7792_p3 = scmp.ne.s32.totalorder %s50_s26, %s7791_s17  ;;  %p7797_p5 = scmp.lt.s32.totalorder %s7791_s17, %s7791_s17 }
   0xb   :  { %p7798_p6 = por %p7797_p5, %p7796_p4 }
   0xd   :  { %p7799_p7 = pnand %p7798_p6, %p7792_p3 }
   0xf   :  { %7802 = shalt.err (!%p7799_p7)
}
  0x10   :  { %s7852_s18 = smov 256   ;;  %s7853_s19 = smov 16  }
  0x11   :  { %55 = dma.hbm_to_vmem [thread:$0]  %s9342_s7, 32768, %s50_s26, [#allocation5], %s7852_s18, %s7852_s18, %s7853_s19  }
  0x12   :  { %s7854_s22 = smov [#allocation2]   ;;  %s7803_s27 = scalar_lea.hbm %s9340_s5, 8192 }
  0x13   :  { %s35_s23 = sshll.u32 %s7854_s22, 4  ;;  %p7804_p8 = scmp.ne.s32.totalorder %s9340_s5, %s7803_s27  ;;  %s36_s23 = int_to_ptr.vmem [resolvable:$true] %s35_s23 }
  0x14   :  { %p7807_p9 = scmp.lt.u32.totalorder %s7803_s27, %s9340_s5 }
  0x16   :  { %p7809_p10 = pnand %p7807_p9, %p7804_p8 }
  0x18   :  { %7812 = shalt.err (!%p7809_p10)
}
  0x19   :  { %s7813_s15 = scalar_lea.vmem %s36_s23, 8192  ;;  %p7818_p12 = scmp.lt.s32.totalorder %s36_s23, %s36_s23 }
  0x1a   :  { %p7814_p11 = scmp.ne.s32.totalorder %s36_s23, %s7813_s15  ;;  %p7819_p13 = scmp.lt.s32.totalorder %s7813_s15, %s7813_s15 }
  0x1c   :  { %p7820_p0 = por %p7819_p13, %p7818_p12 }
  0x1e   :  { %p7821_p1 = pnand %p7820_p0, %p7814_p11 }
  0x20   :  { %7824 = shalt.err (!%p7821_p1)
}
  0x21   :  { %s7855_s7 = smov 512   ;;  %s7856_s26 = smov 32  }
  0x22   :  { %41 = dma.hbm_to_vmem [thread:$0]  %s9340_s5, 8192, %s36_s23, [#allocation3], %s7855_s7, %s7855_s7, %s7856_s26  }
  0x23   :  { %s7857_s18 = smov [#allocation6]   ;;  %s7825_s22 = scalar_lea.hbm %s9344_s9, 8192 }
  0x24   :  { %s63_s19 = sshll.u32 %s7857_s18, 4  ;;  %p7826_p2 = scmp.ne.s32.totalorder %s9344_s9, %s7825_s22  ;;  %s64_s19 = int_to_ptr.vmem [resolvable:$true] %s63_s19 }
  0x25   :  { %p7829_p3 = scmp.lt.u32.totalorder %s7825_s22, %s9344_s9 }
  0x27   :  { %p7831_p4 = pnand %p7829_p3, %p7826_p2 }
  0x29   :  { %7834 = shalt.err (!%p7831_p4)
}
  0x2a   :  { %s7835_s29 = scalar_lea.vmem %s64_s19, 8192  ;;  %p7840_p6 = scmp.lt.s32.totalorder %s64_s19, %s64_s19 }
  0x2b   :  { %p7836_p5 = scmp.ne.s32.totalorder %s64_s19, %s7835_s29  ;;  %p7841_p7 = scmp.lt.s32.totalorder %s7835_s29, %s7835_s29 }
  0x2d   :  { %p7842_p8 = por %p7841_p7, %p7840_p6 }
  0x2f   :  { %p7843_p9 = pnand %p7842_p8, %p7836_p5 }
  0x31   :  { %7846 = shalt.err (!%p7843_p9)
}
  0x32   :  { %s7858_s5 = smov 128   ;;  %s7859_s23 = smov 8  }
  0x33   :  { %69 = dma.hbm_to_vmem [thread:$0]  %s9344_s9, 8192, %s64_s19, [#allocation5], %s7858_s5, %s7858_s5, %s7859_s23  }
  0x34   :  { %7847 = dma.done.wait [#allocation3], 8192  }
  0x35   :  { %7848 = vsyncadd [#allocation3], 4294959104 }
  0x36   :  { %7849 = dma.done.wait [#allocation5], 40960  }
  0x37   :  { %7850 = vsyncadd [#allocation5], 4294926336  ;;  %v7860_v0 = vmov 0.0   ;;  %v9353_v1 = vmov 0   ;;  %v86_v2 = vld [vmem:[%s9335_s0] sm:$0xff]  ;;  %vm170_vm0 = vcmask 1043456  }
  0x38   :  { %239 = vmatprep.mubr.f32.mxu0 %v7860_v0  ;;  %263 = vmatprep.mubr.f32.mxu1 %v7860_v0  ;;  %v144_v3 = vcombine.high %v86_v2, %v86_v2  ;;  %v87_v4 = vld [vmem:[%s9336_s1] sm:$0xff]  ;;  %vm145_vm1 = vcmask 31744   ;;  %v6650_v6 = vld [vmem:[%s9335_s0 + $0x8] sm:$0xff]  ;;  %v97_v11 = vld [vmem:[%s9337_s2 + $0x10] sm:$0xff]  ;;  %vm640_vm2 = vcmask 523264   ;;  %vm4064_vm3 = vcmask 1040384  }
  0x39   :  { %7276 = vset.pattern.permute.xlu0 %v9353_v1  ;;  %7277 = vset.pattern.permute.xlu1 %v9353_v1  ;;  %v91_v5 = vld [vmem:[%s9336_s1 + $0x20] sm:$0xff]  ;;  %v371_v7 = vcombine.high %v6650_v6, %v6650_v6  ;;  %v88_v9 = vld [vmem:[%s9336_s1 + $0x8] sm:$0xff]  ;;  %v98_v13 = vld [vmem:[%s9337_s2 + $0x18] sm:$0xff]  ;;  %vm6632_vm4 = vcmask 123904  }
  0x3a   :  { %6640 = vmatprep.subr.msk.mxu0 %vm170_vm0, %v144_v3  ;;  %7229 = vmatprep.subr.msk.mxu1 %vm170_vm0, %v144_v3  ;;  %v95_v8 = vld [vmem:[%s9337_s2] sm:$0xff]  ;;  %v92_v10 = vld [vmem:[%s9336_s1 + $0x28] sm:$0xff]  ;;  %v89_v14 = vld [vmem:[%s9336_s1 + $0x10] sm:$0xff] }
  0x3b   :  { %6641 = vmatpush1.msk.msra.mxu0 %vm170_vm0, %v86_v2  ;;  %7230 = vmatpush1.msk.msra.mxu1 %vm170_vm0, %v86_v2  ;;  %v96_v12 = vld [vmem:[%s9337_s2 + $0x8] sm:$0xff]  ;;  %v93_v15 = vld [vmem:[%s9336_s1 + $0x30] sm:$0xff]  ;;  %v99_v16 = vld [vmem:[%s9337_s2 + $0x20] sm:$0xff] }
  0x3c   :  { %6642 = vmatmul.mubr.msk.f32.vlgmr.msra.gmra.mrb[0].mxu0 %vm145_vm1, %v87_v4  ;;  %6646 = vmatmul.mubr.msk.f32.vlgmr.msra.gmra.mrb[0].mxu1 %vm145_vm1, %v91_v5  ;;  %v100_v17 = vld [vmem:[%s9337_s2 + $0x28] sm:$0xff]  ;;  %v90_v18 = vld [vmem:[%s9336_s1 + $0x18] sm:$0xff]  ;;  %v101_v20 = vld [vmem:[%s9337_s2 + $0x30] sm:$0xff] }
  0x3d   :  { %245 = vmatprep.mubr.f32.mxu0 %v7860_v0  ;;  %269 = vmatprep.mubr.f32.mxu1 %v7860_v0  ;;  %v94_v19 = vld [vmem:[%s9336_s1 + $0x38] sm:$0xff]  ;;  %v7280_v22 = vld [vmem:[%s9338_s3] sm:$0xff]   ;;  %v7281_v39 = vld [vmem:[%s9338_s3 + $0x8] sm:$0xff]  }
  0x3e   :  { %6651 = vmatprep.subr.msk.mxu1 %vm170_vm0, %v371_v7  ;;  %105 = vperm.xlu0 %7276, %v95_v8   ;;  %v102_v21 = vld [vmem:[%s9337_s2 + $0x38] sm:$0xff]  ;;  %v7282_v49 = vld [vmem:[%s9338_s3 + $0x10] sm:$0xff]  }
  0x3f   :  { %6652 = vmatpush1.msk.msra.mxu1 %vm170_vm0, %v6650_v6  ;;  %115 = vperm.xlu1 %7277, %v97_v11   ;;  %v7283_v58 = vld [vmem:[%s9338_s3 + $0x18] sm:$0xff]  }
  0x40   :  { %6643 = vmatmul.mubr.msk.f32.gmra.mrb[2].mxu0 %vm145_vm1, %v88_v9  ;;  %6647 = vmatmul.mubr.msk.f32.gmra.mrb[2].mxu1 %vm145_vm1, %v92_v10 }
  0x41   :  { %251 = vmatprep.mubr.f32.mxu0 %v7860_v0  ;;  %275 = vmatprep.mubr.f32.mxu1 %v7860_v0 }
  0x42   :  { %110 = vperm.xlu0 %7276, %v96_v12   ;;  %7157 = vmatprep.subr.bf16.mxu0 %v7280_v22 }
  0x43   :  { %120 = vperm.xlu1 %7277, %v98_v13   ;;  %7158 = vmatpush3.bf16.msra.mxu0 %v7280_v22 }
  0x44   :  { %6644 = vmatmul.mubr.msk.f32.gmra.mrb[4].mxu0 %vm145_vm1, %v89_v14  ;;  %6648 = vmatmul.mubr.msk.f32.gmra.mrb[4].mxu1 %vm145_vm1, %v93_v15 }
  0x45   :  { %257 = vmatprep.mubr.f32.mxu0 %v7860_v0  ;;  %281 = vmatprep.mubr.f32.mxu1 %v7860_v0 }
  0x46   :  { %125 = vperm.xlu0 %7276, %v99_v16   ;;  %7159 = vmatprep.subr.bf16.mxu0 %v7281_v39 }
  0x47   :  { %130 = vperm.xlu1 %7277, %v100_v17   ;;  %7160 = vmatpush3.bf16.msra.mxu0 %v7281_v39 }
  0x48   :  { %6645 = vmatmul.mubr.msk.f32.gmra.mrb[6].mxu0 %vm145_vm1, %v90_v18  ;;  %6649 = vmatmul.mubr.msk.f32.gmra.mrb[6].mxu1 %vm145_vm1, %v94_v19 }
  0x49   :  { %440 = vmatprep.mubr.f32.mxu1 %v7860_v0  ;;  %7161 = vmatprep.subr.bf16.mxu0 %v7282_v49 }
  0x4a   :  { %135 = vperm.xlu0 %7276, %v101_v20  }
  0x4b   :  { %140 = vperm.xlu1 %7277, %v102_v21   ;;  %7162 = vmatpush3.bf16.msra.mxu0 %v7282_v49 }
  0x4c   :  { %6653 = vmatmul.mubr.msk.f32.vlgmr.msra.gmra.mrb[8].mxu1 %vm145_vm1, %v87_v4  ;;  %7163 = vmatprep.subr.bf16.mxu0 %v7283_v58 }
  0x4d   :  { %446 = vmatprep.mubr.f32.mxu1 %v7860_v0 }
  0x4f   :  { %7164 = vmatpush3.bf16.msra.mxu0 %v7283_v58 }
  0x50   :  { %6654 = vmatmul.mubr.msk.f32.gmra.mrb[10].mxu1 %vm145_vm1, %v88_v9 }
  0x51   :  { %452 = vmatprep.mubr.f32.mxu1 %v7860_v0 }
  0x54   :  { %6655 = vmatmul.mubr.msk.f32.gmra.mrb[12].mxu1 %vm145_vm1, %v89_v14 }
  0x55   :  { %458 = vmatprep.mubr.f32.mxu1 %v7860_v0 }
  0x58   :  { %6656 = vmatmul.mubr.msk.f32.gmra.mrb[14].mxu1 %vm145_vm1, %v90_v18 }
  0x59   :  { %464 = vmatprep.mubr.f32.mxu1 %v7860_v0 }
  0x5c   :  { %6657 = vmatmul.mubr.msk.f32.gmra.mrb[16].mxu1 %vm145_vm1, %v91_v5 }
  0x5d   :  { %470 = vmatprep.mubr.f32.mxu1 %v7860_v0 }
  0x60   :  { %6658 = vmatmul.mubr.msk.f32.gmra.mrb[18].mxu1 %vm145_vm1, %v92_v10 }
  0x61   :  { %476 = vmatprep.mubr.f32.mxu1 %v7860_v0 }
  0x64   :  { %6659 = vmatmul.mubr.msk.f32.gmra.mrb[20].mxu1 %vm145_vm1, %v93_v15 }
  0x65   :  { %482 = vmatprep.mubr.f32.mxu1 %v7860_v0 }
  0x68   :  { %6660 = vmatmul.mubr.msk.f32.gmra.mrb[22].mxu1 %vm145_vm1, %v94_v19 }
  0x69   :  { %1580 = vmatprep.mubr.bf16.mxu1 %v9353_v1 }
  0xbd   :  { %v8066_v23 = vpop.permute.xlu0 %105 }
  0xbe   :  { %v8072_v31 = vpop.permute.xlu1 %115 }
  0xc1   :  { %v8070_v30 = vpop.permute.xlu0 %110 }
  0xc2   :  { %v8084_v50 = vpop.permute.xlu1 %120 }
  0xc5   :  { %v8090_v59 = vpop.permute.xlu0 %125 }
  0xc6   :  { %v8095_v4 = vpop.permute.xlu1 %130 }
  0xc9   :  { %v8099_v11 = vpop.permute.xlu0 %135 }
  0xca   :  { %v8103_v18 = vpop.permute.xlu1 %140 }
 0x10f   :  { %v241_v24 = vpop.f32.mrb[0].mxu0  ;;  %v265_v25 = vpop.f32.mrb[0].mxu1 }
 0x110   :  { %v242_v26 = vadd.f32 %v241_v24, %v8066_v23  ;;  %v243_v27 = vpop.f32.mrb[1].mxu0  ;;  %v267_v28 = vpop.f32.mrb[1].mxu1  ;;  %v266_v61 = vadd.f32 %v265_v25, %v8090_v59 }
 0x111   :  { %v244_v29 = vadd.f32 %v243_v27, %v8066_v23  ;;  %v268_v63 = vadd.f32 %v267_v28, %v8090_v59 }
 0x112   :  { %v288_v32 = vmax.f32 %v242_v26, 0.0  ;;  %v296_v5 = vmax.f32 %v266_v61, 0.0 }
 0x113   :  { %v247_v33 = vpop.f32.mrb[2].mxu0  ;;  %v271_v34 = vpop.f32.mrb[2].mxu1  ;;  %v289_v35 = vmax.f32 %v244_v29, 0.0  ;;  %v297_v7 = vmax.f32 %v268_v63, 0.0 }
 0x114   :  { %v248_v36 = vadd.f32 %v247_v33, %v8070_v30  ;;  %v249_v37 = vpop.f32.mrb[3].mxu0  ;;  %304 = vxpose.xlu0.b32.start [1/8] (short) %v288_v32, 128  ;;  %v273_v38 = vpop.f32.mrb[3].mxu1  ;;  %v272_v6 = vadd.f32 %v271_v34, %v8095_v4 }
 0x115   :  { %v250_v40 = vadd.f32 %v249_v37, %v8070_v30  ;;  %336 = vxpose.xlu1.b32.start [1/8] (short) %v289_v35, 128  ;;  %v274_v8 = vadd.f32 %v273_v38, %v8095_v4 }
 0x116   :  { %v290_v41 = vmax.f32 %v248_v36, 0.0  ;;  %v298_v12 = vmax.f32 %v272_v6, 0.0 }
 0x117   :  { %v291_v42 = vmax.f32 %v250_v40, 0.0  ;;  %v253_v43 = vpop.f32.mrb[4].mxu0  ;;  %v277_v44 = vpop.f32.mrb[4].mxu1  ;;  %v299_v14 = vmax.f32 %v274_v8, 0.0 }
 0x118   :  { %v254_v45 = vadd.f32 %v253_v43, %v8072_v31  ;;  %v255_v46 = vpop.f32.mrb[5].mxu0  ;;  %v279_v47 = vpop.f32.mrb[5].mxu1  ;;  %305 = vxpose.xlu0.b32.cont [2/8] (short) %v290_v41, 128  ;;  %v278_v13 = vadd.f32 %v277_v44, %v8099_v11 }
 0x119   :  { %v256_v48 = vadd.f32 %v255_v46, %v8072_v31  ;;  %337 = vxpose.xlu1.b32.cont [2/8] (short) %v291_v42, 128  ;;  %v280_v15 = vadd.f32 %v279_v47, %v8099_v11 }
 0x11a   :  { %v292_v51 = vmax.f32 %v254_v45, 0.0  ;;  %v300_v19 = vmax.f32 %v278_v13, 0.0 }
 0x11b   :  { %v293_v52 = vmax.f32 %v256_v48, 0.0  ;;  %v259_v53 = vpop.f32.mrb[6].mxu0  ;;  %v283_v54 = vpop.f32.mrb[6].mxu1  ;;  %v301_v21 = vmax.f32 %v280_v15, 0.0  ;;  %v1130_v15 = vld [vmem:[#allocation2 + $0x40] sm:$0xff] }
 0x11c   :  { %v260_v55 = vadd.f32 %v259_v53, %v8084_v50  ;;  %v261_v56 = vpop.f32.mrb[7].mxu0  ;;  %v285_v57 = vpop.f32.mrb[7].mxu1  ;;  %306 = vxpose.xlu0.b32.cont [3/8] (short) %v292_v51, 128  ;;  %v284_v20 = vadd.f32 %v283_v54, %v8103_v18 }
 0x11d   :  { %v262_v60 = vadd.f32 %v261_v56, %v8084_v50  ;;  %338 = vxpose.xlu1.b32.cont [3/8] (short) %v293_v52, 128  ;;  %v286_v22 = vadd.f32 %v285_v57, %v8103_v18 }
 0x11e   :  { %v294_v62 = vmax.f32 %v260_v55, 0.0  ;;  %v302_v26 = vmax.f32 %v284_v20, 0.0 }
 0x11f   :  { %v295_v0 = vmax.f32 %v262_v60, 0.0  ;;  %v442_v2 = vpop.f32.mrb[8].mxu1  ;;  %v303_v27 = vmax.f32 %v286_v22, 0.0  ;;  %v1135_v22 = vld [vmem:[#allocation2 + $0x68] sm:$0xff] }
 0x120   :  { %v444_v3 = vpop.f32.mrb[9].mxu1  ;;  %307 = vxpose.xlu0.b32.cont [4/8] (short) %v294_v62, 128  ;;  %v443_v38 = vadd.f32 %v442_v2, %v8066_v23 }
 0x121   :  { %339 = vxpose.xlu1.b32.cont [4/8] (short) %v295_v0, 128  ;;  %v445_v39 = vadd.f32 %v444_v3, %v8066_v23 }
 0x122   :  { %v489_v41 = vmax.f32 %v443_v38, 0.0  ;;  %v1150_v38 = vld [vmem:[#allocation2 + $0xe0] sm:$0xff] }
 0x123   :  { %v448_v9 = vpop.f32.mrb[10].mxu1  ;;  %v490_v43 = vmax.f32 %v445_v39, 0.0 }
 0x124   :  { %v450_v10 = vpop.f32.mrb[11].mxu1  ;;  %308 = vxpose.xlu0.b32.cont [5/8] (short) %v296_v5, 128  ;;  %v449_v40 = vadd.f32 %v448_v9, %v8070_v30  ;;  %v1127_v5 = vld [vmem:[#allocation2 + $0x28] sm:$0xff] }
 0x125   :  { %340 = vxpose.xlu1.b32.cont [5/8] (short) %v297_v7, 128  ;;  %v451_v42 = vadd.f32 %v450_v10, %v8070_v30 }
 0x126   :  { %v491_v44 = vmax.f32 %v449_v40, 0.0 }
 0x127   :  { %v454_v16 = vpop.f32.mrb[12].mxu1  ;;  %v492_v46 = vmax.f32 %v451_v42, 0.0 }
 0x128   :  { %v456_v17 = vpop.f32.mrb[13].mxu1  ;;  %309 = vxpose.xlu0.b32.cont [6/8] (short) %v298_v12, 128  ;;  %v455_v45 = vadd.f32 %v454_v16, %v8072_v31  ;;  %v1122_v12 = vld [vmem:[#allocation2] sm:$0xff] }
 0x129   :  { %341 = vxpose.xlu1.b32.cont [6/8] (short) %v299_v14, 128  ;;  %v457_v47 = vadd.f32 %v456_v17, %v8072_v31  ;;  %v1126_v14 = vld [vmem:[#allocation2 + $0x20] sm:$0xff] }
 0x12a   :  { %v493_v48 = vmax.f32 %v455_v45, 0.0  ;;  %v1134_v16 = vld [vmem:[#allocation2 + $0x60] sm:$0xff]  ;;  %v6699_v20 = vcombine.high %v1122_v12, %v1126_v14  ;;  %v1147_v45 = vld [vmem:[#allocation2 + $0xc8] sm:$0xff] }
 0x12b   :  { %v460_v24 = vpop.f32.mrb[14].mxu1  ;;  %v494_v23 = vmax.f32 %v457_v47, 0.0  ;;  %v1154_v47 = vld [vmem:[#allocation2 + $0x100] sm:$0xff] }
 0x12c   :  { %v462_v25 = vpop.f32.mrb[15].mxu1  ;;  %310 = vxpose.xlu0.b32.cont [7/8] (short) %v300_v19, 128  ;;  %v461_v49 = vadd.f32 %v460_v24, %v8084_v50  ;;  %v6698_v19 = vcombine.low %v1122_v12, %v1126_v14  ;;  %v1138_v24 = vld [vmem:[#allocation2 + $0x80] sm:$0xff]  ;;  %1548 = vmatprep.subr.bf16.mxu1 %v6699_v20 }
 0x12d   :  { %342 = vxpose.xlu1.b32.cont [7/8] (short) %v301_v21, 128  ;;  %v463_v51 = vadd.f32 %v462_v25, %v8084_v50  ;;  %v6707_v21 = vcombine.high %v1130_v15, %v1134_v16  ;;  %v1142_v25 = vld [vmem:[#allocation2 + $0xa0] sm:$0xff] }
 0x12e   :  { %v495_v30 = vmax.f32 %v461_v49, 0.0  ;;  %1549 = vmatpush1.bf16.msra.mxu1 %v6698_v19 }
 0x12f   :  { %v466_v28 = vpop.f32.mrb[16].mxu1  ;;  %v496_v53 = vmax.f32 %v463_v51, 0.0  ;;  %1550 = vmatprep.subr.bf16.mxu1 %v6707_v21 }
 0x130   :  { %v468_v29 = vpop.f32.mrb[17].mxu1  ;;  %311 = vxpose.xlu0.b32.end [8/8] (short) %v302_v26, 128  ;;  %v467_v52 = vadd.f32 %v466_v28, %v8090_v59  ;;  %v6706_v28 = vcombine.low %v1130_v15, %v1134_v16 }
 0x131   :  { %343 = vxpose.xlu1.b32.end [8/8] (short) %v303_v27, 128  ;;  %v469_v54 = vadd.f32 %v468_v29, %v8090_v59 }
 0x132   :  { %v497_v55 = vmax.f32 %v467_v52, 0.0  ;;  %1551 = vmatpush1.bf16.msra.mxu1 %v6706_v28 }
 0x133   :  { %v472_v32 = vpop.f32.mrb[18].mxu1  ;;  %v498_v56 = vmax.f32 %v469_v54, 0.0 }
 0x134   :  { %v474_v33 = vpop.f32.mrb[19].mxu1  ;;  %v473_v31 = vadd.f32 %v472_v32, %v8095_v4 }
 0x135   :  { %v475_v57 = vadd.f32 %v474_v33, %v8095_v4  ;;  %v1123_v4 = vld [vmem:[#allocation2 + $0x8] sm:$0xff] }
 0x136   :  { %v499_v58 = vmax.f32 %v473_v31, 0.0  ;;  %v6701_v6 = vcombine.high %v1123_v4, %v1127_v5  ;;  %v6700_v27 = vcombine.low %v1123_v4, %v1127_v5  ;;  %v1159_v31 = vld [vmem:[#allocation2 + $0x128] sm:$0xff] }
 0x137   :  { %v478_v34 = vpop.f32.mrb[20].mxu1  ;;  %v500_v60 = vmax.f32 %v475_v57, 0.0 }
 0x138   :  { %v480_v35 = vpop.f32.mrb[21].mxu1  ;;  %v479_v50 = vadd.f32 %v478_v34, %v8099_v11  ;;  %1901 = vmatprep.subr.bf16.mxu0 %v6701_v6  ;;  %v6715_v34 = vcombine.high %v1138_v24, %v1142_v25 }
 0x139   :  { %v481_v61 = vadd.f32 %v480_v35, %v8099_v11  ;;  %v1139_v35 = vld [vmem:[#allocation2 + $0x88] sm:$0xff] }
 0x13a   :  { %v501_v62 = vmax.f32 %v479_v50, 0.0  ;;  %1552 = vmatprep.subr.bf16.mxu1 %v6715_v34 }
 0x13b   :  { %v484_v36 = vpop.f32.mrb[22].mxu1  ;;  %v502_v63 = vmax.f32 %v481_v61, 0.0 }
 0x13c   :  { %v486_v37 = vpop.f32.mrb[23].mxu1  ;;  %v485_v59 = vadd.f32 %v484_v36, %v8103_v18  ;;  %v1143_v36 = vld [vmem:[#allocation2 + $0xa8] sm:$0xff] }
 0x13d   :  { %v487_v0 = vadd.f32 %v486_v37, %v8103_v18  ;;  %v1131_v18 = vld [vmem:[#allocation2 + $0x48] sm:$0xff]  ;;  %v1146_v37 = vld [vmem:[#allocation2 + $0xc0] sm:$0xff] }
 0x13e   :  { %v503_v2 = vmax.f32 %v485_v59, 0.0  ;;  %v6709_v33 = vcombine.high %v1131_v18, %v1135_v22  ;;  %v6708_v40 = vcombine.low %v1131_v18, %v1135_v22  ;;  %v6722_v51 = vcombine.low %v1146_v37, %v1150_v38 }
 0x13f   :  { %v504_v3 = vmax.f32 %v487_v0, 0.0  ;;  %v1167_v0 = vld [vmem:[#allocation2 + $0x168] sm:$0xff] }
 0x151   :  { %505 = vxpose.xlu0.b32.start [1/8] (short) %v489_v41, 128  ;;  %v6714_v41 = vcombine.low %v1138_v24, %v1142_v25 }
 0x152   :  { %537 = vxpose.xlu1.b32.start [1/8] (short) %v490_v43, 128  ;;  %v6717_v43 = vcombine.high %v1139_v35, %v1143_v36 }
 0x153   :  { %1553 = vmatpush1.bf16.msra.mxu1 %v6714_v41 }
 0x155   :  { %506 = vxpose.xlu0.b32.cont [2/8] (short) %v491_v44, 128  ;;  %v6723_v44 = vcombine.high %v1146_v37, %v1150_v38 }
 0x156   :  { %538 = vxpose.xlu1.b32.cont [2/8] (short) %v492_v46, 128  ;;  %v1151_v46 = vld [vmem:[#allocation2 + $0xe8] sm:$0xff] }
 0x157   :  { %1554 = vmatprep.subr.bf16.mxu1 %v6723_v44 }
 0x158   :  { %1555 = vmatpush1.bf16.msra.mxu1 %v6722_v51 }
 0x159   :  { %507 = vxpose.xlu0.b32.cont [3/8] (short) %v493_v48, 128  ;;  %v1158_v48 = vld [vmem:[#allocation2 + $0x120] sm:$0xff] }
 0x15a   :  { %539 = vxpose.xlu1.b32.cont [3/8] (short) %v494_v23, 128  ;;  %v6716_v23 = vcombine.low %v1139_v35, %v1143_v36  ;;  %v6731_v54 = vcombine.high %v1154_v47, %v1158_v48  ;;  %v6730_v50 = vcombine.low %v1154_v47, %v1158_v48 }
 0x15c   :  { %1556 = vmatprep.subr.bf16.mxu1 %v6731_v54 }
 0x15d   :  { %508 = vxpose.xlu0.b32.cont [4/8] (short) %v495_v30, 128  ;;  %1557 = vmatpush1.bf16.msra.mxu1 %v6730_v50  ;;  %v1175_v50 = vld [vmem:[#allocation2 + $0x1a8] sm:$0xff] }
 0x15e   :  { %540 = vxpose.xlu1.b32.cont [4/8] (short) %v496_v53, 128  ;;  %v6725_v53 = vcombine.high %v1147_v45, %v1151_v46 }
 0x161   :  { %509 = vxpose.xlu0.b32.cont [5/8] (short) %v497_v55, 128  ;;  %v1155_v55 = vld [vmem:[#allocation2 + $0x108] sm:$0xff] }
 0x162   :  { %541 = vxpose.xlu1.b32.cont [5/8] (short) %v498_v56, 128  ;;  %v1162_v56 = vld [vmem:[#allocation2 + $0x140] sm:$0xff] }
 0x165   :  { %510 = vxpose.xlu0.b32.cont [6/8] (short) %v499_v58, 128  ;;  %v6724_v58 = vcombine.low %v1147_v45, %v1151_v46 }
 0x166   :  { %542 = vxpose.xlu1.b32.cont [6/8] (short) %v500_v60, 128  ;;  %v1166_v60 = vld [vmem:[#allocation2 + $0x160] sm:$0xff] }
 0x167   :  { %v6739_v59 = vcombine.high %v1162_v56, %v1166_v60  ;;  %v6738_v4 = vcombine.low %v1162_v56, %v1166_v60  ;;  %v1171_v56 = vld [vmem:[#allocation2 + $0x188] sm:$0xff] }
 0x169   :  { %511 = vxpose.xlu0.b32.cont [7/8] (short) %v501_v62, 128  ;;  %v6733_v62 = vcombine.high %v1155_v55, %v1159_v31  ;;  %1558 = vmatprep.subr.bf16.mxu1 %v6739_v59  ;;  %v6749_v59 = vcombine.high %v1171_v56, %v1175_v50 }
 0x16a   :  { %543 = vxpose.xlu1.b32.cont [7/8] (short) %v502_v63, 128  ;;  %v1163_v63 = vld [vmem:[#allocation2 + $0x148] sm:$0xff]  ;;  %1559 = vmatpush1.bf16.msra.mxu1 %v6738_v4 }
 0x16b   :  { %v1179_v4 = vld [vmem:[#allocation2 + $0x1c8] sm:$0xff] }
 0x16d   :  { %512 = vxpose.xlu0.b32.end [8/8] (short) %v503_v2, 128 }
 0x16e   :  { %544 = vxpose.xlu1.b32.end [8/8] (short) %v504_v3, 128  ;;  %v6732_v3 = vcombine.low %v1155_v55, %v1159_v31  ;;  %v1170_v55 = vld [vmem:[#allocation2 + $0x180] sm:$0xff] }
 0x16f   :  { %v1174_v31 = vld [vmem:[#allocation2 + $0x1a0] sm:$0xff] }
 0x194   :  { %v320_v7 = vpop.trf.xlu0 }
 0x195   :  { %v8123_v8 = vpop.trf.xlu1 }
 0x198   :  { %v321_v9 = vpop.trf.xlu0 }
 0x199   :  { %v569_v10 = vpack.c.bf16 %v321_v9, %v320_v7  ;;  %v8125_v11 = vpop.trf.xlu1  ;;  %v6741_v7 = vcombine.high %v1163_v63, %v1167_v0 }
 0x19a   :  { %v577_v34 = vpack.c.bf16 %v8125_v11, %v8123_v8 }
 0x19b   :  { %7165 = vmatprep.mubr.msk.bf16.mxu0 %vm640_vm2, %v569_v10  ;;  %v6740_v10 = vcombine.low %v1163_v63, %v1167_v0 }
 0x19c   :  { %v322_v13 = vpop.trf.xlu0 }
 0x19d   :  { %v8128_v17 = vpop.trf.xlu1 }
 0x1a0   :  { %v323_v26 = vpop.trf.xlu0 }
 0x1a1   :  { %v570_v29 = vpack.c.bf16 %v323_v26, %v322_v13  ;;  %v8130_v32 = vpop.trf.xlu1 }
 0x1a3   :  { %7166 = vmatmul.mubr.msk.bf16.vlgmr.msra.gmra.mrb[8].mxu0 %vm640_vm2, %v570_v29 }
 0x1a4   :  { %v324_v39 = vpop.trf.xlu0  ;;  %1902 = vmatpush1.bf16.msra.mxu0 %v6700_v27 }
 0x1a5   :  { %v8133_v42 = vpop.trf.xlu1  ;;  %1903 = vmatprep.subr.bf16.mxu0 %v6709_v33 }
 0x1a8   :  { %v325_v49 = vpop.trf.xlu0  ;;  %1904 = vmatpush1.bf16.msra.mxu0 %v6708_v40 }
 0x1a9   :  { %v571_v30 = vpack.c.bf16 %v325_v49, %v324_v39  ;;  %v8135_v52 = vpop.trf.xlu1  ;;  %1905 = vmatprep.subr.bf16.mxu0 %v6717_v43  ;;  %v578_v39 = vpack.c.bf16 %v8130_v32, %v8128_v17 }
 0x1aa   :  { %v579_v40 = vpack.c.bf16 %v8135_v52, %v8133_v42 }
 0x1ab   :  { %7169 = vmatprep.mubr.msk.bf16.mxu0 %vm640_vm2, %v571_v30 }
 0x1ac   :  { %v326_v57 = vpop.trf.xlu0  ;;  %1906 = vmatpush1.bf16.msra.mxu0 %v6716_v23 }
 0x1ad   :  { %v8138_v61 = vpop.trf.xlu1  ;;  %1907 = vmatprep.subr.bf16.mxu0 %v6725_v53 }
 0x1b0   :  { %v327_v2 = vpop.trf.xlu0  ;;  %1908 = vmatpush1.bf16.msra.mxu0 %v6724_v58  ;;  %v6747_v58 = vcombine.high %v1170_v55, %v1174_v31 }
 0x1b1   :  { %v572_v5 = vpack.c.bf16 %v327_v2, %v326_v57  ;;  %v359_v6 = vpop.trf.xlu1  ;;  %1909 = vmatprep.subr.bf16.mxu0 %v6733_v62  ;;  %v6748_v62 = vcombine.low %v1171_v56, %v1175_v50  ;;  %v1178_v2 = vld [vmem:[#allocation2 + $0x1c0] sm:$0xff]  ;;  %v1136_v50 = vld [vmem:[#allocation2 + $0x70] sm:$0xff] }
 0x1b2   :  { %v580_v44 = vpack.c.bf16 %v359_v6, %v8138_v61  ;;  %v6746_v61 = vcombine.low %v1170_v55, %v1174_v31  ;;  %1560 = vmatprep.subr.bf16.mxu1 %v6747_v58  ;;  %v1183_v6 = vld [vmem:[#allocation2 + $0x1e8] sm:$0xff]  ;;  %v1132_v58 = vld [vmem:[#allocation2 + $0x50] sm:$0xff] }
 0x1b3   :  { %7170 = vmatmul.mubr.msk.bf16.gmra.mrb[12].mxu0 %vm640_vm2, %v572_v5 }
 0x1b4   :  { %v328_v9 = vpop.trf.xlu0  ;;  %1910 = vmatpush1.bf16.msra.mxu0 %v6732_v3  ;;  %1561 = vmatpush1.bf16.msra.mxu1 %v6746_v61  ;;  %v1182_v3 = vld [vmem:[#allocation2 + $0x1e0] sm:$0xff] }
 0x1b5   :  { %v360_v12 = vpop.trf.xlu1  ;;  %1911 = vmatprep.subr.bf16.mxu0 %v6741_v7  ;;  %v6755_v5 = vcombine.high %v1178_v2, %v1182_v3  ;;  %v6754_v7 = vcombine.low %v1178_v2, %v1182_v3  ;;  %v6711_v2 = vcombine.high %v1132_v58, %v1136_v50  ;;  %v1140_v3 = vld [vmem:[#allocation2 + $0x90] sm:$0xff] }
 0x1b7   :  { %1562 = vmatprep.subr.bf16.mxu1 %v6755_v5 }
 0x1b8   :  { %v329_v13 = vpop.trf.xlu0  ;;  %1912 = vmatpush1.bf16.msra.mxu0 %v6740_v10  ;;  %v6757_v10 = vcombine.high %v1179_v4, %v1183_v6  ;;  %1563 = vmatpush1.bf16.msra.mxu1 %v6754_v7 }
 0x1b9   :  { %v573_v14 = vpack.c.bf16 %v329_v13, %v328_v9  ;;  %v361_v15 = vpop.trf.xlu1  ;;  %1913 = vmatprep.subr.bf16.mxu0 %v6749_v59  ;;  %v6756_v9 = vcombine.low %v1179_v4, %v1183_v6  ;;  %v1133_v59 = vld [vmem:[#allocation2 + $0x58] sm:$0xff]  ;;  %v1144_v4 = vld [vmem:[#allocation2 + $0xb0] sm:$0xff]  ;;  %v6710_v6 = vcombine.low %v1132_v58, %v1136_v50 }
 0x1ba   :  { %v581_v45 = vpack.c.bf16 %v361_v15, %v360_v12  ;;  %v8179_v15 = vld [vmem:[#allocation2 + $0x30] sm:$0xff]  ;;  %v6719_v7 = vcombine.high %v1140_v3, %v1144_v4 }
 0x1bb   :  { %7173 = vmatprep.mubr.msk.bf16.mxu0 %vm640_vm2, %v573_v14  ;;  %v8177_v14 = vld [vmem:[#allocation2 + $0x10] sm:$0xff] }
 0x1bc   :  { %v330_v16 = vpop.trf.xlu0  ;;  %1914 = vmatpush1.bf16.msra.mxu0 %v6748_v62 }
 0x1bd   :  { %v362_v18 = vpop.trf.xlu1  ;;  %1915 = vmatprep.subr.bf16.mxu0 %v6757_v10  ;;  %v1141_v10 = vld [vmem:[#allocation2 + $0x98] sm:$0xff] }
 0x1c0   :  { %v331_v19 = vpop.trf.xlu0  ;;  %1916 = vmatpush1.bf16.msra.mxu0 %v6756_v9 }
 0x1c1   :  { %v574_v20 = vpack.c.bf16 %v331_v19, %v330_v16  ;;  %v363_v21 = vpop.trf.xlu1  ;;  %v6703_v19 = vcombine.high %v8177_v14, %v8179_v15 }
 0x1c2   :  { %v582_v42 = vpack.c.bf16 %v363_v21, %v362_v18  ;;  %v6702_v18 = vcombine.low %v8177_v14, %v8179_v15 }
 0x1c3   :  { %7174 = vmatmul.mubr.msk.bf16.gmra.mrb[16].mxu0 %vm640_vm2, %v574_v20  ;;  %2254 = vmatprep.subr.bf16.mxu1 %v6703_v19 }
 0x1c4   :  { %v332_v22 = vpop.trf.xlu0 }
 0x1c5   :  { %v364_v24 = vpop.trf.xlu1 }
 0x1c8   :  { %v333_v25 = vpop.trf.xlu0 }
 0x1c9   :  { %v575_v26 = vpack.c.bf16 %v333_v25, %v332_v22  ;;  %v365_v27 = vpop.trf.xlu1 }
 0x1ca   :  { %v583_v47 = vpack.c.bf16 %v365_v27, %v364_v24 }
 0x1cb   :  { %7177 = vmatprep.mubr.msk.bf16.mxu0 %vm640_vm2, %v575_v26 }
 0x1cc   :  { %v334_v28 = vpop.trf.xlu0 }
 0x1cd   :  { %v366_v29 = vpop.trf.xlu1 }
 0x1d0   :  { %v335_v33 = vpop.trf.xlu0 }
 0x1d1   :  { %v576_v35 = vpack.c.bf16 %v335_v33, %v334_v28  ;;  %v367_v36 = vpop.trf.xlu1 }
 0x1d2   :  { %v584_v51 = vpack.c.bf16 %v367_v36, %v366_v29 }
 0x1d3   :  { %7178 = vmatmul.mubr.msk.bf16.gmra.mrb[20].mxu0 %vm640_vm2, %v576_v35 }
 0x1d4   :  { %7181 = vmatprep.mubr.msk.bf16.mxu0 %vm640_vm2, %v577_v34  ;;  %v521_v37 = vpop.trf.xlu0 }
 0x1d5   :  { %v8148_v38 = vpop.trf.xlu1 }
 0x1d8   :  { %v522_v41 = vpop.trf.xlu0 }
 0x1d9   :  { %v8154_v43 = vpop.trf.xlu1  ;;  %v585_v30 = vpack.c.bf16 %v522_v41, %v521_v37 }
 0x1da   :  { %v593_v34 = vpack.c.bf16 %v8154_v43, %v8148_v38 }
 0x1db   :  { %7182 = vmatmul.mubr.msk.bf16.gmra.mrb[24].mxu0 %vm640_vm2, %v578_v39 }
 0x1dc   :  { %7185 = vmatprep.mubr.msk.bf16.mxu0 %vm640_vm2, %v579_v40  ;;  %v523_v8 = vpop.trf.xlu0 }
 0x1dd   :  { %v8158_v11 = vpop.trf.xlu1 }
 0x1e0   :  { %v524_v46 = vpop.trf.xlu0 }
 0x1e1   :  { %v8163_v32 = vpop.trf.xlu1  ;;  %v586_v60 = vpack.c.bf16 %v524_v46, %v523_v8 }
 0x1e2   :  { %v594_v39 = vpack.c.bf16 %v8163_v32, %v8158_v11  ;;  %v1125_v32 = vld [vmem:[#allocation2 + $0x18] sm:$0xff] }
 0x1e3   :  { %7186 = vmatmul.mubr.msk.bf16.gmra.mrb[28].mxu0 %vm640_vm2, %v580_v44 }
 0x1e4   :  { %7189 = vmatprep.mubr.msk.bf16.mxu0 %vm640_vm2, %v581_v45  ;;  %v525_v17 = vpop.trf.xlu0 }
 0x1e5   :  { %v8165_v49 = vpop.trf.xlu1 }
 0x1e8   :  { %v526_v48 = vpop.trf.xlu0 }
 0x1e9   :  { %v8169_v53 = vpop.trf.xlu1  ;;  %v587_v63 = vpack.c.bf16 %v526_v48, %v525_v17 }
 0x1ea   :  { %v595_v40 = vpack.c.bf16 %v8169_v53, %v8165_v49  ;;  %v8209_v49 = vld [vmem:[%s9339_s4] ss:$0 sm:$0xff] }
 0x1eb   :  { %7190 = vmatmul.mubr.msk.bf16.gmra.mrb[32].mxu0 %vm640_vm2, %v582_v42  ;;  %v1129_v42 = vld [vmem:[#allocation2 + $0x38] sm:$0xff] }
 0x1ec   :  { %7193 = vmatprep.mubr.msk.bf16.mxu0 %vm640_vm2, %v583_v47  ;;  %v527_v23 = vpop.trf.xlu0  ;;  %v6704_v47 = vcombine.low %v1125_v32, %v1129_v42  ;;  %v6705_v48 = vcombine.high %v1125_v32, %v1129_v42  ;;  %v1153_v32 = vld [vmem:[#allocation2 + $0xf8] sm:$0xff] }
 0x1ed   :  { %v8173_v57 = vpop.trf.xlu1 }
 0x1ee   :  { %2607 = vmatprep.subr.bf16.mxu0 %v6705_v48 }
 0x1f0   :  { %v528_v52 = vpop.trf.xlu0 }
 0x1f1   :  { %v560_v13 = vpop.trf.xlu1  ;;  %v588_v16 = vpack.c.bf16 %v528_v52, %v527_v23 }
 0x1f2   :  { %v596_v38 = vpack.c.bf16 %v560_v13, %v8173_v57  ;;  %v1148_v13 = vld [vmem:[#allocation2 + $0xd0] sm:$0xff] }
 0x1f3   :  { %7194 = vmatmul.mubr.msk.bf16.gmra.mrb[36].mxu0 %vm640_vm2, %v584_v51 }
 0x1f4   :  { %7197 = vmatprep.mubr.msk.bf16.mxu0 %vm640_vm2, %v585_v30  ;;  %v529_v54 = vpop.trf.xlu0 }
 0x1f5   :  { %v561_v22 = vpop.trf.xlu1 }
 0x1f8   :  { %v530_v0 = vpop.trf.xlu0 }
 0x1f9   :  { %v589_v20 = vpack.c.bf16 %v530_v0, %v529_v54  ;;  %v562_v27 = vpop.trf.xlu1 }
 0x1fa   :  { %v597_v43 = vpack.c.bf16 %v562_v27, %v561_v22  ;;  %v1160_v27 = vld [vmem:[#allocation2 + $0x130] sm:$0xff] }
 0x1fb   :  { %7198 = vmatmul.mubr.msk.bf16.gmra.mrb[40].mxu0 %vm640_vm2, %v586_v60 }
 0x1fc   :  { %7201 = vmatprep.mubr.msk.bf16.mxu0 %vm640_vm2, %v587_v63  ;;  %v531_v12 = vpop.trf.xlu0  ;;  %v1137_v63 = vld [vmem:[#allocation2 + $0x78] sm:$0xff] }
 0x1fd   :  { %v563_v33 = vpop.trf.xlu1  ;;  %v6713_v5 = vcombine.high %v1133_v59, %v1137_v63  ;;  %v6712_v9 = vcombine.low %v1133_v59, %v1137_v63 }
 0x200   :  { %v532_v21 = vpop.trf.xlu0 }
 0x201   :  { %v590_v25 = vpack.c.bf16 %v532_v21, %v531_v12  ;;  %v564_v37 = vpop.trf.xlu1  ;;  %v1145_v12 = vld [vmem:[#allocation2 + $0xb8] sm:$0xff] }
 0x202   :  { %v598_v45 = vpack.c.bf16 %v564_v37, %v563_v33  ;;  %v6721_v14 = vcombine.high %v1141_v10, %v1145_v12  ;;  %v6720_v22 = vcombine.low %v1141_v10, %v1145_v12 }
 0x203   :  { %7202 = vmatmul.mubr.msk.bf16.gmra.mrb[44].mxu0 %vm640_vm2, %v588_v16  ;;  %v1152_v16 = vld [vmem:[#allocation2 + $0xf0] sm:$0xff] }
 0x204   :  { %7205 = vmatprep.mubr.msk.bf16.mxu0 %vm640_vm2, %v589_v20  ;;  %v533_v24 = vpop.trf.xlu0  ;;  %v6718_v20 = vcombine.low %v1140_v3, %v1144_v4  ;;  %v6727_v21 = vcombine.high %v1148_v13, %v1152_v16 }
 0x205   :  { %v565_v41 = vpop.trf.xlu1 }
 0x208   :  { %v534_v26 = vpop.trf.xlu0 }
 0x209   :  { %v591_v28 = vpack.c.bf16 %v534_v26, %v533_v24  ;;  %v566_v8 = vpop.trf.xlu1  ;;  %v1156_v26 = vld [vmem:[#allocation2 + $0x110] sm:$0xff] }
 0x20a   :  { %v599_v46 = vpack.c.bf16 %v566_v8, %v565_v41  ;;  %v6735_v37 = vcombine.high %v1156_v26, %v1160_v27 }
 0x20b   :  { %7206 = vmatmul.mubr.msk.bf16.gmra.mrb[48].mxu0 %vm640_vm2, %v590_v25 }
 0x20c   :  { %v535_v29 = vpop.trf.xlu0  ;;  %7209 = vmatprep.mubr.msk.bf16.mxu0 %vm640_vm2, %v591_v28 }
 0x20d   :  { %v567_v44 = vpop.trf.xlu1 }
 0x210   :  { %v536_v35 = vpop.trf.xlu0 }
 0x211   :  { %v592_v36 = vpack.c.bf16 %v536_v35, %v535_v29  ;;  %v568_v11 = vpop.trf.xlu1 }
 0x212   :  { %v600_v17 = vpack.c.bf16 %v568_v11, %v567_v44 }
 0x213   :  { %7210 = vmatmul.mubr.msk.bf16.gmra.mrb[52].mxu0 %vm640_vm2, %v592_v36 }
 0x214   :  { %7213 = vmatprep.mubr.msk.bf16.mxu0 %vm640_vm2, %v593_v34  ;;  %v6726_v34 = vcombine.low %v1148_v13, %v1152_v16 }
 0x21b   :  { %7214 = vmatmul.mubr.msk.bf16.gmra.mrb[56].mxu0 %vm640_vm2, %v594_v39 }
 0x21c   :  { %7217 = vmatprep.mubr.msk.bf16.mxu0 %vm640_vm2, %v595_v40 }
 0x223   :  { %7218 = vmatmul.mubr.msk.bf16.gmra.mrb[60].mxu0 %vm640_vm2, %v596_v38 }
 0x224   :  { %7221 = vmatprep.mubr.msk.bf16.mxu0 %vm640_vm2, %v597_v43  ;;  %v6734_v43 = vcombine.low %v1156_v26, %v1160_v27 }
 0x22b   :  { %7222 = vmatmul.mubr.msk.bf16.gmra.mrb[64].mxu0 %vm640_vm2, %v598_v45 }
 0x22c   :  { %7225 = vmatprep.mubr.msk.bf16.mxu0 %vm640_vm2, %v599_v46 }
 0x233   :  { %7226 = vmatmul.mubr.msk.bf16.gmra.mrb[68].mxu0 %vm640_vm2, %v600_v17  ;;  %v1149_v17 = vld [vmem:[#allocation2 + $0xd8] sm:$0xff] }
 0x234   :  { %1933 = vmatprep.mubr.bf16.mxu0 %v9353_v1  ;;  %v6728_v48 = vcombine.low %v1149_v17, %v1153_v32 }
 0x276   :  { %v7167_v23 = vpop.f32.mrb[8].mxu0 }
 0x277   :  { %v780_v51 = vadd.f32 %v7167_v23, %v8209_v49  ;;  %v771_v30 = vpop.f32.mrb[9].mxu0  ;;  %v6729_v23 = vcombine.high %v1149_v17, %v1153_v32  ;;  %v1176_v17 = vld [vmem:[#allocation2 + $0x1b0] sm:$0xff] }
 0x278   :  { %v772_v52 = vadd.f32 %v8209_v49, %v771_v30  ;;  %v7168_v53 = vpop.f32.mrb[10].mxu0  ;;  %v1168_v30 = vld [vmem:[#allocation2 + $0x170] sm:$0xff] }
 0x279   :  { %v783_v54 = vadd.f32 %v7168_v53, %v8209_v49  ;;  %v774_v55 = vpop.f32.mrb[11].mxu0  ;;  %v1028_v56 = vmax.f32 %v780_v51, 0.0  ;;  %v1164_v51 = vld [vmem:[#allocation2 + $0x150] sm:$0xff] }
 0x27a   :  { %v775_v31 = vadd.f32 %v8209_v49, %v774_v55  ;;  %v1026_v60 = vmax.f32 %v772_v52, 0.0  ;;  %v6742_v53 = vcombine.low %v1164_v51, %v1168_v30 }
 0x27b   :  { %v1029_v57 = vmax.f32 %v783_v54, 0.0  ;;  %v6743_v54 = vcombine.high %v1164_v51, %v1168_v30 }
 0x27c   :  { %v1027_v61 = vmax.f32 %v775_v31, 0.0 }
 0x27d   :  { %v8215_v62 = vpack.c.bf16 %v1029_v57, %v1028_v56 }
 0x27e   :  { %v8217_v0 = vpack.c.bf16 %v1027_v61, %v1026_v60 }
 0x280   :  { %1581 = vmatmul.mubr.bf16.vlgmr.msra.gmra.mrb[24].mxu1 %v8217_v0  ;;  %1934 = vmatmul.mubr.bf16.vlgmr.msra.gmra.mrb[72].mxu0 %v8217_v0 }
 0x281   :  { %2255 = vmatpush1.bf16.msra.mxu1 %v6702_v18  ;;  %1590 = vmatprep.mubr.bf16.mxu1 %v9353_v1 }
 0x282   :  { %1943 = vmatprep.mubr.bf16.mxu0 %v9353_v1  ;;  %2256 = vmatprep.subr.bf16.mxu1 %v6711_v2 }
 0x283   :  { %2608 = vmatpush1.bf16.msra.mxu0 %v6704_v47 }
 0x284   :  { %2609 = vmatprep.subr.bf16.mxu0 %v6713_v5 }
 0x285   :  { %2257 = vmatpush1.bf16.msra.mxu1 %v6710_v6 }
 0x286   :  { %v7171_v19 = vpop.f32.mrb[12].mxu0  ;;  %2258 = vmatprep.subr.bf16.mxu1 %v6719_v7 }
 0x287   :  { %v796_v15 = vadd.f32 %v7171_v19, %v8209_v49  ;;  %v787_v18 = vpop.f32.mrb[13].mxu0  ;;  %2610 = vmatpush1.bf16.msra.mxu0 %v6712_v9 }
 0x288   :  { %v788_v24 = vadd.f32 %v8209_v49, %v787_v18  ;;  %v7172_v25 = vpop.f32.mrb[14].mxu0  ;;  %1591 = vmatmul.mubr.bf16.gmra.mrb[28].mxu1 %v8215_v62  ;;  %1944 = vmatmul.mubr.bf16.gmra.mrb[76].mxu0 %v8215_v62 }
 0x289   :  { %v799_v28 = vadd.f32 %v7172_v25, %v8209_v49  ;;  %v790_v29 = vpop.f32.mrb[15].mxu0  ;;  %1600 = vmatprep.mubr.bf16.mxu1 %v9353_v1  ;;  %1953 = vmatprep.mubr.bf16.mxu0 %v9353_v1  ;;  %v1032_v35 = vmax.f32 %v796_v15, 0.0 }
 0x28a   :  { %v791_v33 = vadd.f32 %v8209_v49, %v790_v29  ;;  %2259 = vmatpush1.bf16.msra.mxu1 %v6718_v20  ;;  %2611 = vmatprep.subr.bf16.mxu0 %v6721_v14  ;;  %v1030_v39 = vmax.f32 %v788_v24, 0.0 }
 0x28b   :  { %v1033_v36 = vmax.f32 %v799_v28, 0.0  ;;  %2260 = vmatprep.subr.bf16.mxu1 %v6727_v21  ;;  %2612 = vmatpush1.bf16.msra.mxu0 %v6720_v22 }
 0x28c   :  { %v1031_v40 = vmax.f32 %v791_v33, 0.0  ;;  %2613 = vmatprep.subr.bf16.mxu0 %v6729_v23 }
 0x28d   :  { %v8234_v41 = vpack.c.bf16 %v1033_v36, %v1032_v35 }
 0x28e   :  { %v8236_v38 = vpack.c.bf16 %v1031_v40, %v1030_v39  ;;  %2261 = vmatpush1.bf16.msra.mxu1 %v6726_v34  ;;  %v1157_v39 = vld [vmem:[#allocation2 + $0x118] sm:$0xff] }
 0x28f   :  { %2262 = vmatprep.subr.bf16.mxu1 %v6735_v37  ;;  %2614 = vmatpush1.bf16.msra.mxu0 %v6728_v48  ;;  %v1161_v40 = vld [vmem:[#allocation2 + $0x138] sm:$0xff] }
 0x290   :  { %1601 = vmatmul.mubr.bf16.gmra.mrb[32].mxu1 %v8236_v38  ;;  %1954 = vmatmul.mubr.bf16.gmra.mrb[80].mxu0 %v8236_v38 }
 0x291   :  { %1610 = vmatprep.mubr.bf16.mxu1 %v9353_v1  ;;  %1963 = vmatprep.mubr.bf16.mxu0 %v9353_v1 }
 0x292   :  { %2263 = vmatpush1.bf16.msra.mxu1 %v6734_v43 }
 0x293   :  { %2264 = vmatprep.subr.bf16.mxu1 %v6743_v54 }
 0x296   :  { %v7175_v8 = vpop.f32.mrb[16].mxu0  ;;  %2265 = vmatpush1.bf16.msra.mxu1 %v6742_v53 }
 0x297   :  { %v812_v44 = vadd.f32 %v7175_v8, %v8209_v49  ;;  %v803_v45 = vpop.f32.mrb[17].mxu0 }
 0x298   :  { %v804_v46 = vadd.f32 %v8209_v49, %v803_v45  ;;  %v7176_v11 = vpop.f32.mrb[18].mxu0  ;;  %1611 = vmatmul.mubr.bf16.gmra.mrb[36].mxu1 %v8234_v41  ;;  %1964 = vmatmul.mubr.bf16.gmra.mrb[84].mxu0 %v8234_v41  ;;  %v6736_v45 = vcombine.low %v1157_v39, %v1161_v40 }
 0x299   :  { %v815_v42 = vadd.f32 %v7176_v11, %v8209_v49  ;;  %v806_v47 = vpop.f32.mrb[19].mxu0  ;;  %1620 = vmatprep.mubr.bf16.mxu1 %v9353_v1  ;;  %1973 = vmatprep.mubr.bf16.mxu0 %v9353_v1  ;;  %v1036_v55 = vmax.f32 %v812_v44, 0.0  ;;  %v1172_v11 = vld [vmem:[#allocation2 + $0x190] sm:$0xff] }
 0x29a   :  { %v807_v52 = vadd.f32 %v8209_v49, %v806_v47  ;;  %v1034_v56 = vmax.f32 %v804_v46, 0.0  ;;  %v6737_v46 = vcombine.high %v1157_v39, %v1161_v40  ;;  %v6750_v47 = vcombine.low %v1172_v11, %v1176_v17 }
 0x29b   :  { %v1037_v31 = vmax.f32 %v815_v42, 0.0  ;;  %v6751_v48 = vcombine.high %v1172_v11, %v1176_v17 }
 0x29c   :  { %v1035_v57 = vmax.f32 %v807_v52, 0.0  ;;  %2615 = vmatprep.subr.bf16.mxu0 %v6737_v46 }
 0x29d   :  { %v8250_v58 = vpack.c.bf16 %v1037_v31, %v1036_v55  ;;  %2266 = vmatprep.subr.bf16.mxu1 %v6751_v48  ;;  %2616 = vmatpush1.bf16.msra.mxu0 %v6736_v45 }
 0x29e   :  { %v8252_v50 = vpack.c.bf16 %v1035_v57, %v1034_v56  ;;  %2267 = vmatpush1.bf16.msra.mxu1 %v6750_v47 }
 0x2a0   :  { %1621 = vmatmul.mubr.bf16.gmra.mrb[40].mxu1 %v8252_v50  ;;  %1974 = vmatmul.mubr.bf16.gmra.mrb[88].mxu0 %v8252_v50 }
 0x2a1   :  { %1630 = vmatprep.mubr.bf16.mxu1 %v9353_v1  ;;  %1983 = vmatprep.mubr.bf16.mxu0 %v9353_v1 }
 0x2a6   :  { %v7179_v60 = vpop.f32.mrb[20].mxu0 }
 0x2a7   :  { %v828_v61 = vadd.f32 %v7179_v60, %v8209_v49  ;;  %v819_v59 = vpop.f32.mrb[21].mxu0 }
 0x2a8   :  { %v820_v63 = vadd.f32 %v8209_v49, %v819_v59  ;;  %v7180_v2 = vpop.f32.mrb[22].mxu0  ;;  %1631 = vmatmul.mubr.bf16.gmra.mrb[44].mxu1 %v8250_v58  ;;  %1984 = vmatmul.mubr.bf16.gmra.mrb[92].mxu0 %v8250_v58 }
 0x2a9   :  { %v831_v3 = vadd.f32 %v7180_v2, %v8209_v49  ;;  %v822_v4 = vpop.f32.mrb[23].mxu0  ;;  %1640 = vmatprep.mubr.bf16.mxu1 %v9353_v1  ;;  %1993 = vmatprep.mubr.bf16.mxu0 %v9353_v1  ;;  %v1040_v6 = vmax.f32 %v828_v61, 0.0 }
 0x2aa   :  { %v823_v5 = vadd.f32 %v8209_v49, %v822_v4  ;;  %v1038_v9 = vmax.f32 %v820_v63, 0.0 }
 0x2ab   :  { %v1041_v7 = vmax.f32 %v831_v3, 0.0 }
 0x2ac   :  { %v1039_v10 = vmax.f32 %v823_v5, 0.0 }
 0x2ad   :  { %v8266_v12 = vpack.c.bf16 %v1041_v7, %v1040_v6 }
 0x2ae   :  { %v8268_v13 = vpack.c.bf16 %v1039_v10, %v1038_v9  ;;  %v7183_v16 = vpop.f32.mrb[24].mxu0 }
 0x2af   :  { %v844_v19 = vadd.f32 %v7183_v16, %v8209_v49  ;;  %v835_v20 = vpop.f32.mrb[25].mxu0 }
 0x2b0   :  { %v836_v14 = vadd.f32 %v8209_v49, %v835_v20  ;;  %1641 = vmatmul.mubr.bf16.gmra.mrb[48].mxu1 %v8268_v13  ;;  %1994 = vmatmul.mubr.bf16.gmra.mrb[96].mxu0 %v8268_v13  ;;  %v7184_v15 = vpop.f32.mrb[26].mxu0 }
 0x2b1   :  { %v1044_v18 = vmax.f32 %v844_v19, 0.0  ;;  %v847_v21 = vadd.f32 %v7184_v15, %v8209_v49  ;;  %v838_v22 = vpop.f32.mrb[27].mxu0  ;;  %1650 = vmatprep.mubr.bf16.mxu1 %v9353_v1  ;;  %2003 = vmatprep.mubr.bf16.mxu0 %v9353_v1 }
 0x2b2   :  { %v1042_v24 = vmax.f32 %v836_v14, 0.0  ;;  %v839_v25 = vadd.f32 %v8209_v49, %v838_v22 }
 0x2b3   :  { %v1045_v26 = vmax.f32 %v847_v21, 0.0 }
 0x2b4   :  { %v1043_v27 = vmax.f32 %v839_v25, 0.0 }
 0x2b5   :  { %v8278_v28 = vpack.c.bf16 %v1045_v26, %v1044_v18 }
 0x2b6   :  { %v8280_v29 = vpack.c.bf16 %v1043_v27, %v1042_v24  ;;  %v7187_v33 = vpop.f32.mrb[28].mxu0 }
 0x2b7   :  { %v860_v34 = vadd.f32 %v7187_v33, %v8209_v49  ;;  %v851_v35 = vpop.f32.mrb[29].mxu0 }
 0x2b8   :  { %1651 = vmatmul.mubr.bf16.gmra.mrb[52].mxu1 %v8266_v12  ;;  %2004 = vmatmul.mubr.bf16.gmra.mrb[100].mxu0 %v8266_v12  ;;  %v852_v36 = vadd.f32 %v8209_v49, %v851_v35  ;;  %v7188_v37 = vpop.f32.mrb[30].mxu0 }
 0x2b9   :  { %v1048_v43 = vmax.f32 %v860_v34, 0.0  ;;  %1660 = vmatprep.mubr.bf16.mxu1 %v9353_v1  ;;  %2013 = vmatprep.mubr.bf16.mxu0 %v9353_v1  ;;  %v863_v8 = vadd.f32 %v7188_v37, %v8209_v49  ;;  %v854_v44 = vpop.f32.mrb[31].mxu0 }
 0x2ba   :  { %v1046_v32 = vmax.f32 %v852_v36, 0.0  ;;  %v855_v42 = vadd.f32 %v8209_v49, %v854_v44 }
 0x2bb   :  { %v1049_v23 = vmax.f32 %v863_v8, 0.0 }
 0x2bc   :  { %v1047_v51 = vmax.f32 %v855_v42, 0.0 }
 0x2bd   :  { %v8290_v30 = vpack.c.bf16 %v1049_v23, %v1048_v43 }
 0x2be   :  { %v8292_v52 = vpack.c.bf16 %v1047_v51, %v1046_v32  ;;  %v7191_v53 = vpop.f32.mrb[32].mxu0 }
 0x2bf   :  { %v876_v54 = vadd.f32 %v7191_v53, %v8209_v49  ;;  %v867_v55 = vpop.f32.mrb[33].mxu0 }
 0x2c0   :  { %1661 = vmatmul.mubr.bf16.gmra.mrb[56].mxu1 %v8280_v29  ;;  %2014 = vmatmul.mubr.bf16.gmra.mrb[104].mxu0 %v8280_v29  ;;  %v868_v31 = vadd.f32 %v8209_v49, %v867_v55  ;;  %v7192_v56 = vpop.f32.mrb[34].mxu0 }
 0x2c1   :  { %1670 = vmatprep.mubr.bf16.mxu1 %v9353_v1  ;;  %2023 = vmatprep.mubr.bf16.mxu0 %v9353_v1  ;;  %v1052_v57 = vmax.f32 %v876_v54, 0.0  ;;  %v879_v60 = vadd.f32 %v7192_v56, %v8209_v49  ;;  %v870_v61 = vpop.f32.mrb[35].mxu0 }
 0x2c2   :  { %v1050_v59 = vmax.f32 %v868_v31, 0.0  ;;  %v871_v63 = vadd.f32 %v8209_v49, %v870_v61 }
 0x2c3   :  { %v1053_v2 = vmax.f32 %v879_v60, 0.0 }
 0x2c4   :  { %v1051_v3 = vmax.f32 %v871_v63, 0.0 }
 0x2c5   :  { %v8302_v4 = vpack.c.bf16 %v1053_v2, %v1052_v57 }
 0x2c6   :  { %v8304_v5 = vpack.c.bf16 %v1051_v3, %v1050_v59  ;;  %v7195_v6 = vpop.f32.mrb[36].mxu0 }
 0x2c7   :  { %v892_v7 = vadd.f32 %v7195_v6, %v8209_v49  ;;  %v883_v9 = vpop.f32.mrb[37].mxu0 }
 0x2c8   :  { %1671 = vmatmul.mubr.bf16.gmra.mrb[60].mxu1 %v8278_v28  ;;  %2024 = vmatmul.mubr.bf16.gmra.mrb[108].mxu0 %v8278_v28  ;;  %v884_v10 = vadd.f32 %v8209_v49, %v883_v9  ;;  %v7196_v16 = vpop.f32.mrb[38].mxu0  ;;  %v1165_v9 = vld [vmem:[#allocation2 + $0x158] sm:$0xff] }
 0x2c9   :  { %1680 = vmatprep.mubr.bf16.mxu1 %v9353_v1  ;;  %2033 = vmatprep.mubr.bf16.mxu0 %v9353_v1  ;;  %v1056_v19 = vmax.f32 %v892_v7, 0.0  ;;  %v895_v20 = vadd.f32 %v7196_v16, %v8209_v49  ;;  %v886_v14 = vpop.f32.mrb[39].mxu0  ;;  %v1180_v16 = vld [vmem:[#allocation2 + $0x1d0] sm:$0xff] }
 0x2ca   :  { %v1054_v15 = vmax.f32 %v884_v10, 0.0  ;;  %v887_v18 = vadd.f32 %v8209_v49, %v886_v14  ;;  %v1169_v10 = vld [vmem:[#allocation2 + $0x178] sm:$0xff] }
 0x2cb   :  { %v1057_v21 = vmax.f32 %v895_v20, 0.0  ;;  %v6744_v14 = vcombine.low %v1165_v9, %v1169_v10 }
 0x2cc   :  { %v1055_v22 = vmax.f32 %v887_v18, 0.0  ;;  %v1184_v18 = vld [vmem:[#allocation2 + $0x1f0] sm:$0xff] }
 0x2cd   :  { %v8314_v24 = vpack.c.bf16 %v1057_v21, %v1056_v19 }
 0x2ce   :  { %v8316_v25 = vpack.c.bf16 %v1055_v22, %v1054_v15  ;;  %v7199_v26 = vpop.f32.mrb[40].mxu0  ;;  %v6745_v15 = vcombine.high %v1165_v9, %v1169_v10  ;;  %v6758_v22 = vcombine.low %v1180_v16, %v1184_v18  ;;  %v1177_v9 = vld [vmem:[#allocation2 + $0x1b8] sm:$0xff] }
 0x2cf   :  { %v908_v27 = vadd.f32 %v7199_v26, %v8209_v49  ;;  %v899_v33 = vpop.f32.mrb[41].mxu0  ;;  %v6759_v26 = vcombine.high %v1180_v16, %v1184_v18 }
 0x2d0   :  { %1681 = vmatmul.mubr.bf16.gmra.mrb[64].mxu1 %v8292_v52  ;;  %2034 = vmatmul.mubr.bf16.gmra.mrb[112].mxu0 %v8292_v52  ;;  %v900_v34 = vadd.f32 %v8209_v49, %v899_v33  ;;  %v7200_v35 = vpop.f32.mrb[42].mxu0 }
 0x2d1   :  { %1690 = vmatprep.mubr.bf16.mxu1 %v9353_v1  ;;  %2043 = vmatprep.mubr.bf16.mxu0 %v9353_v1  ;;  %v1060_v36 = vmax.f32 %v908_v27, 0.0  ;;  %v911_v37 = vadd.f32 %v7200_v35, %v8209_v49  ;;  %v902_v39 = vpop.f32.mrb[43].mxu0 }
 0x2d2   :  { %v1058_v40 = vmax.f32 %v900_v34, 0.0  ;;  %v903_v43 = vadd.f32 %v8209_v49, %v902_v39  ;;  %2617 = vmatprep.subr.bf16.mxu0 %v6745_v15  ;;  %2268 = vmatprep.subr.bf16.mxu1 %v6759_v26 }
 0x2d3   :  { %v1061_v8 = vmax.f32 %v911_v37, 0.0  ;;  %2618 = vmatpush1.bf16.msra.mxu0 %v6744_v14  ;;  %2269 = vmatpush1.bf16.msra.mxu1 %v6758_v22 }
 0x2d4   :  { %v1059_v44 = vmax.f32 %v903_v43, 0.0 }
 0x2d5   :  { %v8326_v45 = vpack.c.bf16 %v1061_v8, %v1060_v36 }
 0x2d6   :  { %v8328_v46 = vpack.c.bf16 %v1059_v44, %v1058_v40  ;;  %v7203_v11 = vpop.f32.mrb[44].mxu0 }
 0x2d7   :  { %v924_v17 = vadd.f32 %v7203_v11, %v8209_v49  ;;  %v915_v32 = vpop.f32.mrb[45].mxu0 }
 0x2d8   :  { %1691 = vmatmul.mubr.bf16.gmra.mrb[68].mxu1 %v8290_v30  ;;  %2044 = vmatmul.mubr.bf16.gmra.mrb[116].mxu0 %v8290_v30  ;;  %v916_v42 = vadd.f32 %v8209_v49, %v915_v32  ;;  %v7204_v47 = vpop.f32.mrb[46].mxu0 }
 0x2d9   :  { %1700 = vmatprep.mubr.bf16.mxu1 %v9353_v1  ;;  %2053 = vmatprep.mubr.bf16.mxu0 %v9353_v1  ;;  %v1064_v48 = vmax.f32 %v924_v17, 0.0  ;;  %v927_v23 = vadd.f32 %v7204_v47, %v8209_v49  ;;  %v918_v51 = vpop.f32.mrb[47].mxu0 }
 0x2da   :  { %v1062_v53 = vmax.f32 %v916_v42, 0.0  ;;  %v919_v54 = vadd.f32 %v8209_v49, %v918_v51 }
 0x2db   :  { %v1065_v55 = vmax.f32 %v927_v23, 0.0 }
 0x2dc   :  { %v1063_v31 = vmax.f32 %v919_v54, 0.0 }
 0x2dd   :  { %v8338_v56 = vpack.c.bf16 %v1065_v55, %v1064_v48 }
 0x2de   :  { %v8340_v57 = vpack.c.bf16 %v1063_v31, %v1062_v53  ;;  %v7207_v60 = vpop.f32.mrb[48].mxu0 }
 0x2df   :  { %v940_v61 = vadd.f32 %v7207_v60, %v8209_v49  ;;  %v931_v59 = vpop.f32.mrb[49].mxu0 }
 0x2e0   :  { %1701 = vmatmul.mubr.bf16.gmra.mrb[72].mxu1 %v8304_v5  ;;  %2054 = vmatmul.mubr.bf16.gmra.mrb[120].mxu0 %v8304_v5  ;;  %v932_v63 = vadd.f32 %v8209_v49, %v931_v59  ;;  %v7208_v2 = vpop.f32.mrb[50].mxu0 }
 0x2e1   :  { %1710 = vmatprep.mubr.bf16.mxu1 %v9353_v1  ;;  %2063 = vmatprep.mubr.bf16.mxu0 %v9353_v1  ;;  %v1068_v3 = vmax.f32 %v940_v61, 0.0  ;;  %v943_v6 = vadd.f32 %v7208_v2, %v8209_v49  ;;  %v934_v7 = vpop.f32.mrb[51].mxu0 }
 0x2e2   :  { %v1066_v19 = vmax.f32 %v932_v63, 0.0  ;;  %v935_v20 = vadd.f32 %v8209_v49, %v934_v7  ;;  %v1173_v7 = vld [vmem:[#allocation2 + $0x198] sm:$0xff] }
 0x2e3   :  { %v1069_v21 = vmax.f32 %v943_v6, 0.0  ;;  %v6752_v15 = vcombine.low %v1173_v7, %v1177_v9 }
 0x2e4   :  { %v1067_v27 = vmax.f32 %v935_v20, 0.0 }
 0x2e5   :  { %v8350_v33 = vpack.c.bf16 %v1069_v21, %v1068_v3 }
 0x2e6   :  { %v8352_v34 = vpack.c.bf16 %v1067_v27, %v1066_v19  ;;  %v7211_v35 = vpop.f32.mrb[52].mxu0  ;;  %v6753_v19 = vcombine.high %v1173_v7, %v1177_v9 }
 0x2e7   :  { %v956_v36 = vadd.f32 %v7211_v35, %v8209_v49  ;;  %v947_v37 = vpop.f32.mrb[53].mxu0  ;;  %v1181_v35 = vld [vmem:[#allocation2 + $0x1d8] sm:$0xff] }
 0x2e8   :  { %1711 = vmatmul.mubr.bf16.gmra.mrb[76].mxu1 %v8302_v4  ;;  %2064 = vmatmul.mubr.bf16.gmra.mrb[124].mxu0 %v8302_v4  ;;  %v948_v39 = vadd.f32 %v8209_v49, %v947_v37  ;;  %v7212_v40 = vpop.f32.mrb[54].mxu0 }
 0x2e9   :  { %1720 = vmatprep.mubr.bf16.mxu1 %v9353_v1  ;;  %2073 = vmatprep.mubr.bf16.mxu0 %v9353_v1  ;;  %v1072_v43 = vmax.f32 %v956_v36, 0.0  ;;  %v959_v8 = vadd.f32 %v7212_v40, %v8209_v49  ;;  %v950_v44 = vpop.f32.mrb[55].mxu0  ;;  %v1185_v36 = vld [vmem:[#allocation2 + $0x1f8] sm:$0xff] }
 0x2ea   :  { %v1070_v11 = vmax.f32 %v948_v39, 0.0  ;;  %v951_v17 = vadd.f32 %v8209_v49, %v950_v44  ;;  %2619 = vmatprep.subr.bf16.mxu0 %v6753_v19  ;;  %v6761_v40 = vcombine.high %v1181_v35, %v1185_v36 }
 0x2eb   :  { %v1073_v32 = vmax.f32 %v959_v8, 0.0  ;;  %2620 = vmatpush1.bf16.msra.mxu0 %v6752_v15  ;;  %v6760_v8 = vcombine.low %v1181_v35, %v1185_v36 }
 0x2ec   :  { %v1071_v42 = vmax.f32 %v951_v17, 0.0  ;;  %2621 = vmatprep.subr.bf16.mxu0 %v6761_v40 }
 0x2ed   :  { %v8362_v47 = vpack.c.bf16 %v1073_v32, %v1072_v43 }
 0x2ee   :  { %v8364_v48 = vpack.c.bf16 %v1071_v42, %v1070_v11  ;;  %v7215_v23 = vpop.f32.mrb[56].mxu0 }
 0x2ef   :  { %v972_v51 = vadd.f32 %v7215_v23, %v8209_v49  ;;  %v963_v53 = vpop.f32.mrb[57].mxu0  ;;  %2622 = vmatpush1.bf16.msra.mxu0 %v6760_v8 }
 0x2f0   :  { %1721 = vmatmul.mubr.bf16.gmra.mrb[80].mxu1 %v8316_v25  ;;  %2074 = vmatmul.mubr.bf16.gmra.mrb[128].mxu0 %v8316_v25  ;;  %v964_v54 = vadd.f32 %v8209_v49, %v963_v53  ;;  %v7216_v55 = vpop.f32.mrb[58].mxu0 }
 0x2f1   :  { %1730 = vmatprep.mubr.bf16.mxu1 %v9353_v1  ;;  %2083 = vmatprep.mubr.bf16.mxu0 %v9353_v1  ;;  %v1076_v31 = vmax.f32 %v972_v51, 0.0  ;;  %v975_v60 = vadd.f32 %v7216_v55, %v8209_v49  ;;  %v966_v61 = vpop.f32.mrb[59].mxu0 }
 0x2f2   :  { %v1074_v59 = vmax.f32 %v964_v54, 0.0  ;;  %v967_v63 = vadd.f32 %v8209_v49, %v966_v61 }
 0x2f3   :  { %v1077_v2 = vmax.f32 %v975_v60, 0.0 }
 0x2f4   :  { %v1075_v3 = vmax.f32 %v967_v63, 0.0 }
 0x2f5   :  { %v8374_v6 = vpack.c.bf16 %v1077_v2, %v1076_v31 }
 0x2f6   :  { %v8376_v10 = vpack.c.bf16 %v1075_v3, %v1074_v59  ;;  %v7219_v16 = vpop.f32.mrb[60].mxu0 }
 0x2f7   :  { %v988_v20 = vadd.f32 %v7219_v16, %v8209_v49  ;;  %v979_v14 = vpop.f32.mrb[61].mxu0 }
 0x2f8   :  { %1731 = vmatmul.mubr.bf16.gmra.mrb[84].mxu1 %v8314_v24  ;;  %2084 = vmatmul.mubr.bf16.gmra.mrb[132].mxu0 %v8314_v24  ;;  %v980_v18 = vadd.f32 %v8209_v49, %v979_v14  ;;  %v7220_v21 = vpop.f32.mrb[62].mxu0 }
 0x2f9   :  { %1740 = vmatprep.mubr.bf16.mxu1 %v9353_v1  ;;  %2093 = vmatprep.mubr.bf16.mxu0 %v9353_v1  ;;  %v1080_v22 = vmax.f32 %v988_v20, 0.0  ;;  %v991_v26 = vadd.f32 %v7220_v21, %v8209_v49  ;;  %v982_v27 = vpop.f32.mrb[63].mxu0 }
 0x2fa   :  { %v1078_v37 = vmax.f32 %v980_v18, 0.0  ;;  %v983_v39 = vadd.f32 %v8209_v49, %v982_v27 }
 0x2fb   :  { %v1081_v43 = vmax.f32 %v991_v26, 0.0 }
 0x2fc   :  { %v1079_v44 = vmax.f32 %v983_v39, 0.0 }
 0x2fd   :  { %v8386_v11 = vpack.c.bf16 %v1081_v43, %v1080_v22  ;;  %v1186_v43 = vld [vmem:[%s9341_s6] sm:$0xff] }
 0x2fe   :  { %v8388_v17 = vpack.c.bf16 %v1079_v44, %v1078_v37  ;;  %v7223_v32 = vpop.f32.mrb[64].mxu0 }
 0x2ff   :  { %v1004_v42 = vadd.f32 %v7223_v32, %v8209_v49  ;;  %v995_v23 = vpop.f32.mrb[65].mxu0 }
 0x300   :  { %1741 = vmatmul.mubr.bf16.gmra.mrb[88].mxu1 %v8328_v46  ;;  %2094 = vmatmul.mubr.bf16.gmra.mrb[136].mxu0 %v8328_v46  ;;  %v996_v51 = vadd.f32 %v8209_v49, %v995_v23  ;;  %v7224_v53 = vpop.f32.mrb[66].mxu0 }
 0x301   :  { %1750 = vmatprep.mubr.bf16.mxu1 %v9353_v1  ;;  %2103 = vmatprep.mubr.bf16.mxu0 %v9353_v1  ;;  %v1084_v54 = vmax.f32 %v1004_v42, 0.0  ;;  %v1007_v55 = vadd.f32 %v7224_v53, %v8209_v49  ;;  %v998_v31 = vpop.f32.mrb[67].mxu0 }
 0x302   :  { %v1082_v60 = vmax.f32 %v996_v51, 0.0  ;;  %v999_v61 = vadd.f32 %v8209_v49, %v998_v31 }
 0x303   :  { %v1085_v59 = vmax.f32 %v1007_v55, 0.0 }
 0x304   :  { %v1083_v63 = vmax.f32 %v999_v61, 0.0 }
 0x305   :  { %v8398_v2 = vpack.c.bf16 %v1085_v59, %v1084_v54 }
 0x306   :  { %v8400_v3 = vpack.c.bf16 %v1083_v63, %v1082_v60  ;;  %v7227_v7 = vpop.f32.mrb[68].mxu0 }
 0x307   :  { %v1020_v9 = vadd.f32 %v7227_v7, %v8209_v49  ;;  %v1011_v16 = vpop.f32.mrb[69].mxu0 }
 0x308   :  { %1751 = vmatmul.mubr.bf16.gmra.mrb[92].mxu1 %v8326_v45  ;;  %2104 = vmatmul.mubr.bf16.gmra.mrb[140].mxu0 %v8326_v45  ;;  %v1012_v19 = vadd.f32 %v8209_v49, %v1011_v16  ;;  %v7228_v20 = vpop.f32.mrb[70].mxu0 }
 0x309   :  { %1760 = vmatprep.mubr.bf16.mxu1 %v9353_v1  ;;  %2113 = vmatprep.mubr.bf16.mxu0 %v9353_v1  ;;  %v1088_v14 = vmax.f32 %v1020_v9, 0.0  ;;  %v1023_v15 = vadd.f32 %v7228_v20, %v8209_v49  ;;  %v1014_v18 = vpop.f32.mrb[71].mxu0 }
 0x30a   :  { %v1086_v21 = vmax.f32 %v1012_v19, 0.0  ;;  %v1015_v22 = vadd.f32 %v8209_v49, %v1014_v18  ;;  %v1188_v49 = vlaneseq }
 0x30b   :  { %v1089_v26 = vmax.f32 %v1023_v15, 0.0 }
 0x30c   :  { %v1087_v27 = vmax.f32 %v1015_v22, 0.0  ;;  %v8444_v37 = vshrl.u32 %v1188_v49, 7 }
 0x30d   :  { %v8410_v35 = vpack.c.bf16 %v1089_v26, %v1088_v14 }
 0x30e   :  { %v8412_v36 = vpack.c.bf16 %v1087_v27, %v1086_v21  ;;  %v8449_v39 = vsub.s32 0, %v8444_v37  ;;  %v9349_v40 = vsub.s32 2, %v8444_v37  ;;  %v8456_v8 = vsub.s32 1, %v8444_v37 }
 0x30f   :  { %v9350_v44 = vsub.s32 3, %v8444_v37 }
 0x310   :  { %1761 = vmatmul.mubr.bf16.gmra.mrb[96].mxu1 %v8340_v57  ;;  %2114 = vmatmul.mubr.bf16.gmra.mrb[144].mxu0 %v8340_v57  ;;  %9357 = vst [vmem:[#allocation9_spill] sm:$0xff] %v8449_v39  ;;  %9358 = vst [vmem:[#allocation10_spill] sm:$0xff] %v8456_v8  ;;  %v8462_v32 = vrot.slane %v1186_v43, %v8449_v39  ;;  %v8466_v42 = vrot.slane %v1186_v43, %v9349_v40  ;;  %v9359_v39 = vmov 0  }
 0x311   :  { %1770 = vmatprep.mubr.bf16.mxu1 %v9353_v1  ;;  %2123 = vmatprep.mubr.bf16.mxu0 %v9353_v1  ;;  %v8471_v23 = vrot.slane %v1186_v43, %v8456_v8  ;;  %v8475_v51 = vrot.slane %v1186_v43, %v9350_v44 }
 0x318   :  { %1771 = vmatmul.mubr.bf16.gmra.mrb[100].mxu1 %v8338_v56  ;;  %2124 = vmatmul.mubr.bf16.gmra.mrb[148].mxu0 %v8338_v56 }
 0x319   :  { %1780 = vmatprep.mubr.bf16.mxu1 %v9353_v1  ;;  %2133 = vmatprep.mubr.bf16.mxu0 %v9353_v1 }
 0x320   :  { %1781 = vmatmul.mubr.bf16.gmra.mrb[104].mxu1 %v8352_v34  ;;  %2134 = vmatmul.mubr.bf16.gmra.mrb[152].mxu0 %v8352_v34 }
 0x321   :  { %1790 = vmatprep.mubr.bf16.mxu1 %v9353_v1  ;;  %2143 = vmatprep.mubr.bf16.mxu0 %v9353_v1 }
 0x328   :  { %1791 = vmatmul.mubr.bf16.gmra.mrb[108].mxu1 %v8350_v33  ;;  %2144 = vmatmul.mubr.bf16.gmra.mrb[156].mxu0 %v8350_v33 }
 0x329   :  { %1800 = vmatprep.mubr.bf16.mxu1 %v9353_v1  ;;  %2153 = vmatprep.mubr.bf16.mxu0 %v9353_v1 }
 0x330   :  { %1801 = vmatmul.mubr.bf16.gmra.mrb[112].mxu1 %v8364_v48  ;;  %2154 = vmatmul.mubr.bf16.gmra.mrb[160].mxu0 %v8364_v48 }
 0x331   :  { %1810 = vmatprep.mubr.bf16.mxu1 %v9353_v1  ;;  %2163 = vmatprep.mubr.bf16.mxu0 %v9353_v1 }
 0x338   :  { %1811 = vmatmul.mubr.bf16.gmra.mrb[116].mxu1 %v8362_v47  ;;  %2164 = vmatmul.mubr.bf16.gmra.mrb[164].mxu0 %v8362_v47 }
 0x339   :  { %1820 = vmatprep.mubr.bf16.mxu1 %v9353_v1  ;;  %2173 = vmatprep.mubr.bf16.mxu0 %v9353_v1 }
 0x340   :  { %1821 = vmatmul.mubr.bf16.gmra.mrb[120].mxu1 %v8376_v10  ;;  %2174 = vmatmul.mubr.bf16.gmra.mrb[168].mxu0 %v8376_v10 }
 0x341   :  { %1830 = vmatprep.mubr.bf16.mxu1 %v9353_v1  ;;  %2183 = vmatprep.mubr.bf16.mxu0 %v9353_v1 }
 0x348   :  { %1831 = vmatmul.mubr.bf16.gmra.mrb[124].mxu1 %v8374_v6  ;;  %2184 = vmatmul.mubr.bf16.gmra.mrb[172].mxu0 %v8374_v6 }
 0x349   :  { %1840 = vmatprep.mubr.bf16.mxu1 %v9353_v1  ;;  %2193 = vmatprep.mubr.bf16.mxu0 %v9353_v1 }
 0x350   :  { %1841 = vmatmul.mubr.bf16.gmra.mrb[128].mxu1 %v8388_v17  ;;  %2194 = vmatmul.mubr.bf16.gmra.mrb[176].mxu0 %v8388_v17 }
 0x351   :  { %1850 = vmatprep.mubr.bf16.mxu1 %v9353_v1  ;;  %2203 = vmatprep.mubr.bf16.mxu0 %v9353_v1 }
 0x353   :  { %v1582_v53 = vpop.f32.mrb[24].mxu1  ;;  %v1935_v54 = vpop.f32.mrb[72].mxu0 }
 0x354   :  { %v1584_v55 = vpop.f32.mrb[25].mxu1  ;;  %v1937_v31 = vpop.f32.mrb[73].mxu0  ;;  %v1936_v60 = vadd.f32 %v1935_v54, %v8466_v42  ;;  %v1583_v61 = vadd.f32 %v1582_v53, %v8462_v32 }
 0x355   :  { %v1586_v59 = vpop.f32.mrb[26].mxu1  ;;  %v1939_v63 = vpop.f32.mrb[74].mxu0  ;;  %v1938_v7 = vadd.f32 %v1937_v31, %v8475_v51  ;;  %v1585_v9 = vadd.f32 %v1584_v55, %v8471_v23 }
 0x356   :  { %v1588_v16 = vpop.f32.mrb[27].mxu1  ;;  %v1941_v19 = vpop.f32.mrb[75].mxu0  ;;  %v1940_v20 = vadd.f32 %v1939_v63, %v8466_v42  ;;  %v1587_v14 = vadd.f32 %v1586_v59, %v8462_v32  ;;  %v2962_v21 = vmax.f32 %v1936_v60, 0.0  ;;  %v2960_v26 = vmax.f32 %v1583_v61, 0.0 }
 0x357   :  { %v1942_v15 = vadd.f32 %v1941_v19, %v8475_v51  ;;  %v1589_v18 = vadd.f32 %v1588_v16, %v8471_v23  ;;  %v2963_v49 = vmax.f32 %v1938_v7, 0.0  ;;  %v2961_v53 = vmax.f32 %v1585_v9, 0.0 }
 0x358   :  { %1851 = vmatmul.mubr.bf16.gmra.mrb[132].mxu1 %v8386_v11  ;;  %2204 = vmatmul.mubr.bf16.gmra.mrb[180].mxu0 %v8386_v11  ;;  %v2970_v22 = vmax.f32 %v1940_v20, 0.0  ;;  %v2968_v27 = vmax.f32 %v1587_v14, 0.0 }
 0x359   :  { %v2971_v43 = vmax.f32 %v1942_v15, 0.0  ;;  %1860 = vmatprep.mubr.bf16.mxu1 %v9353_v1  ;;  %2213 = vmatprep.mubr.bf16.mxu0 %v9353_v1  ;;  %v2969_v54 = vmax.f32 %v1589_v18, 0.0 }
 0x35a   :  { %v3546_v55 = vmax.f32 %v2962_v21, %v2970_v22  ;;  %v3472_v31 = vmax.f32 %v2960_v26, %v2968_v27 }
 0x35b   :  { %v1592_v59 = vpop.f32.mrb[28].mxu1  ;;  %v1945_v63 = vpop.f32.mrb[76].mxu0  ;;  %v3583_v16 = vmax.f32 %v2963_v49, %v2971_v43  ;;  %v3509_v19 = vmax.f32 %v2961_v53, %v2969_v54 }
 0x35c   :  { %v1593_v40 = vadd.f32 %v1592_v59, %v8462_v32  ;;  %v1946_v60 = vadd.f32 %v1945_v63, %v8466_v42  ;;  %v1594_v61 = vpop.f32.mrb[29].mxu1  ;;  %v1947_v20 = vpop.f32.mrb[77].mxu0 }
 0x35d   :  { %v1595_v7 = vadd.f32 %v1594_v61, %v8471_v23  ;;  %v1948_v14 = vadd.f32 %v1947_v20, %v8475_v51  ;;  %v1596_v15 = vpop.f32.mrb[30].mxu1  ;;  %v1949_v44 = vpop.f32.mrb[78].mxu0 }
 0x35e   :  { %v2976_v9 = vmax.f32 %v1593_v40, 0.0  ;;  %v2978_v18 = vmax.f32 %v1946_v60, 0.0  ;;  %v1597_v21 = vadd.f32 %v1596_v15, %v8462_v32  ;;  %v1950_v22 = vadd.f32 %v1949_v44, %v8466_v42  ;;  %v1598_v26 = vpop.f32.mrb[31].mxu1  ;;  %v1951_v27 = vpop.f32.mrb[79].mxu0 }
 0x35f   :  { %v2977_v49 = vmax.f32 %v1595_v7, 0.0  ;;  %v2979_v43 = vmax.f32 %v1948_v14, 0.0  ;;  %v1599_v53 = vadd.f32 %v1598_v26, %v8471_v23  ;;  %v1952_v54 = vadd.f32 %v1951_v27, %v8475_v51 }
 0x360   :  { %v3547_v59 = vmax.f32 %v3546_v55, %v2978_v18  ;;  %v2984_v63 = vmax.f32 %v1597_v21, 0.0  ;;  %v2986_v61 = vmax.f32 %v1950_v22, 0.0  ;;  %1861 = vmatmul.mubr.bf16.gmra.mrb[136].mxu1 %v8400_v3  ;;  %2214 = vmatmul.mubr.bf16.gmra.mrb[184].mxu0 %v8400_v3  ;;  %v3473_v40 = vmax.f32 %v3472_v31, %v2976_v9 }
 0x361   :  { %v3584_v60 = vmax.f32 %v3583_v16, %v2979_v43  ;;  %v2985_v20 = vmax.f32 %v1599_v53, 0.0  ;;  %v2987_v15 = vmax.f32 %v1952_v54, 0.0  ;;  %v3510_v44 = vmax.f32 %v3509_v19, %v2977_v49  ;;  %1870 = vmatprep.mubr.bf16.mxu1 %v9353_v1  ;;  %2223 = vmatprep.mubr.bf16.mxu0 %v9353_v1 }
 0x362   :  { %v3474_v7 = vmax.f32 %v3473_v40, %v2984_v63  ;;  %v3548_v14 = vmax.f32 %v3547_v59, %v2986_v61 }
 0x363   :  { %v1602_v26 = vpop.f32.mrb[32].mxu1  ;;  %v1955_v27 = vpop.f32.mrb[80].mxu0  ;;  %v3511_v55 = vmax.f32 %v3510_v44, %v2985_v20  ;;  %v3585_v18 = vmax.f32 %v3584_v60, %v2987_v15 }
 0x364   :  { %v1603_v21 = vadd.f32 %v1602_v26, %v8462_v32  ;;  %v1956_v22 = vadd.f32 %v1955_v27, %v8466_v42  ;;  %v1604_v8 = vpop.f32.mrb[33].mxu1  ;;  %v1957_v31 = vpop.f32.mrb[81].mxu0 }
 0x365   :  { %v1605_v16 = vadd.f32 %v1604_v8, %v8471_v23  ;;  %v1958_v19 = vadd.f32 %v1957_v31, %v8475_v51  ;;  %v1606_v9 = vpop.f32.mrb[34].mxu1  ;;  %v1959_v49 = vpop.f32.mrb[82].mxu0 }
 0x366   :  { %v2992_v43 = vmax.f32 %v1603_v21, 0.0  ;;  %v2994_v53 = vmax.f32 %v1956_v22, 0.0  ;;  %v1607_v54 = vadd.f32 %v1606_v9, %v8462_v32  ;;  %v1960_v59 = vadd.f32 %v1959_v49, %v8466_v42  ;;  %v1608_v63 = vpop.f32.mrb[35].mxu1  ;;  %v1961_v61 = vpop.f32.mrb[83].mxu0 }
 0x367   :  { %v2993_v40 = vmax.f32 %v1605_v16, 0.0  ;;  %v2995_v60 = vmax.f32 %v1958_v19, 0.0  ;;  %v1609_v20 = vadd.f32 %v1608_v63, %v8471_v23  ;;  %v1962_v15 = vadd.f32 %v1961_v61, %v8475_v51  ;;  %v7286_v16 = vld [vmem:[#allocation4 + $0x4] ss:$16 sps:$4 sm:$0xff]  }
 0x368   :  { %v3475_v44 = vmax.f32 %v3474_v7, %v2992_v43  ;;  %v3549_v8 = vmax.f32 %v3548_v14, %v2994_v53  ;;  %v3000_v26 = vmax.f32 %v1607_v54, 0.0  ;;  %v3002_v27 = vmax.f32 %v1960_v59, 0.0  ;;  %1871 = vmatmul.mubr.bf16.gmra.mrb[140].mxu1 %v8398_v2  ;;  %2224 = vmatmul.mubr.bf16.gmra.mrb[188].mxu0 %v8398_v2 }
 0x369   :  { %v3512_v21 = vmax.f32 %v3511_v55, %v2993_v40  ;;  %v3586_v22 = vmax.f32 %v3585_v18, %v2995_v60  ;;  %v3001_v31 = vmax.f32 %v1609_v20, 0.0  ;;  %v3003_v9 = vmax.f32 %v1962_v15, 0.0  ;;  %1880 = vmatprep.mubr.bf16.mxu1 %v9353_v1  ;;  %2233 = vmatprep.mubr.bf16.mxu0 %v9353_v1 }
 0x36a   :  { %v3476_v19 = vmax.f32 %v3475_v44, %v3000_v26  ;;  %v3550_v49 = vmax.f32 %v3549_v8, %v3002_v27  ;;  %5639 = vmatprep.subr.bf16.mxu1 %v7286_v16 }
 0x36b   :  { %v3513_v63 = vmax.f32 %v3512_v21, %v3001_v31  ;;  %v3587_v7 = vmax.f32 %v3586_v22, %v3003_v9  ;;  %v1612_v14 = vpop.f32.mrb[36].mxu1  ;;  %v1965_v43 = vpop.f32.mrb[84].mxu0 }
 0x36c   :  { %v1613_v53 = vadd.f32 %v1612_v14, %v8462_v32  ;;  %v1966_v54 = vadd.f32 %v1965_v43, %v8466_v42  ;;  %v1614_v55 = vpop.f32.mrb[37].mxu1  ;;  %v1967_v18 = vpop.f32.mrb[85].mxu0 }
 0x36d   :  { %v1615_v59 = vadd.f32 %v1614_v55, %v8471_v23  ;;  %v1968_v61 = vadd.f32 %v1967_v18, %v8475_v51  ;;  %v1616_v40 = vpop.f32.mrb[38].mxu1  ;;  %v1969_v60 = vpop.f32.mrb[86].mxu0 }
 0x36e   :  { %v3008_v20 = vmax.f32 %v1613_v53, 0.0  ;;  %v3010_v15 = vmax.f32 %v1966_v54, 0.0  ;;  %v1617_v44 = vadd.f32 %v1616_v40, %v8462_v32  ;;  %v1970_v8 = vadd.f32 %v1969_v60, %v8466_v42  ;;  %v1618_v26 = vpop.f32.mrb[39].mxu1  ;;  %v1971_v27 = vpop.f32.mrb[87].mxu0 }
 0x36f   :  { %v3009_v21 = vmax.f32 %v1615_v59, 0.0  ;;  %v3011_v22 = vmax.f32 %v1968_v61, 0.0  ;;  %v1619_v31 = vadd.f32 %v1618_v26, %v8471_v23  ;;  %v1972_v9 = vadd.f32 %v1971_v27, %v8475_v51 }
 0x370   :  { %v3477_v16 = vmax.f32 %v3476_v19, %v3008_v20  ;;  %v3551_v14 = vmax.f32 %v3550_v49, %v3010_v15  ;;  %v3016_v43 = vmax.f32 %v1617_v44, 0.0  ;;  %v3018_v55 = vmax.f32 %v1970_v8, 0.0  ;;  %1881 = vmatmul.mubr.bf16.gmra.mrb[144].mxu1 %v8412_v36  ;;  %2234 = vmatmul.mubr.bf16.gmra.mrb[192].mxu0 %v8412_v36 }
 0x371   :  { %v3514_v53 = vmax.f32 %v3513_v63, %v3009_v21  ;;  %v3588_v54 = vmax.f32 %v3587_v7, %v3011_v22  ;;  %v3017_v18 = vmax.f32 %v1619_v31, 0.0  ;;  %v3019_v40 = vmax.f32 %v1972_v9, 0.0  ;;  %1890 = vmatprep.mubr.bf16.mxu1 %v9353_v1  ;;  %2243 = vmatprep.mubr.bf16.mxu0 %v9353_v1 }
 0x372   :  { %v3478_v59 = vmax.f32 %v3477_v16, %v3016_v43  ;;  %v3552_v61 = vmax.f32 %v3551_v14, %v3018_v55 }
 0x373   :  { %v3515_v60 = vmax.f32 %v3514_v53, %v3017_v18  ;;  %v3589_v26 = vmax.f32 %v3588_v54, %v3019_v40  ;;  %v1622_v19 = vpop.f32.mrb[40].mxu1  ;;  %v1975_v49 = vpop.f32.mrb[88].mxu0 }
 0x374   :  { %v1623_v20 = vadd.f32 %v1622_v19, %v8462_v32  ;;  %v1976_v15 = vadd.f32 %v1975_v49, %v8466_v42  ;;  %v1624_v44 = vpop.f32.mrb[41].mxu1  ;;  %v1977_v8 = vpop.f32.mrb[89].mxu0 }
 0x375   :  { %v1625_v63 = vadd.f32 %v1624_v44, %v8471_v23  ;;  %v1978_v7 = vadd.f32 %v1977_v8, %v8475_v51  ;;  %v1626_v27 = vpop.f32.mrb[42].mxu1  ;;  %v1979_v21 = vpop.f32.mrb[90].mxu0 }
 0x376   :  { %v3024_v22 = vmax.f32 %v1623_v20, 0.0  ;;  %v3026_v31 = vmax.f32 %v1976_v15, 0.0  ;;  %v1627_v9 = vadd.f32 %v1626_v27, %v8462_v32  ;;  %v1980_v16 = vadd.f32 %v1979_v21, %v8466_v42  ;;  %v1628_v14 = vpop.f32.mrb[43].mxu1  ;;  %v1981_v43 = vpop.f32.mrb[91].mxu0 }
 0x377   :  { %v3025_v55 = vmax.f32 %v1625_v63, 0.0  ;;  %v3027_v53 = vmax.f32 %v1978_v7, 0.0  ;;  %v1629_v54 = vadd.f32 %v1628_v14, %v8471_v23  ;;  %v1982_v18 = vadd.f32 %v1981_v43, %v8475_v51 }
 0x378   :  { %v3479_v40 = vmax.f32 %v3478_v59, %v3024_v22  ;;  %v3553_v19 = vmax.f32 %v3552_v61, %v3026_v31  ;;  %v3032_v49 = vmax.f32 %v1627_v9, 0.0  ;;  %v3034_v44 = vmax.f32 %v1980_v16, 0.0  ;;  %1891 = vmatmul.mubr.bf16.gmra.mrb[148].mxu1 %v8410_v35  ;;  %2244 = vmatmul.mubr.bf16.gmra.mrb[196].mxu0 %v8410_v35 }
 0x379   :  { %v3516_v20 = vmax.f32 %v3515_v60, %v3025_v55  ;;  %v3590_v15 = vmax.f32 %v3589_v26, %v3027_v53  ;;  %v3033_v8 = vmax.f32 %v1629_v54, 0.0  ;;  %v3035_v27 = vmax.f32 %v1982_v18, 0.0  ;;  %2286 = vmatprep.mubr.bf16.mxu1 %v9353_v1  ;;  %2639 = vmatprep.mubr.bf16.mxu0 %v9353_v1 }
 0x37a   :  { %v3480_v63 = vmax.f32 %v3479_v40, %v3032_v49  ;;  %v3554_v7 = vmax.f32 %v3553_v19, %v3034_v44  ;;  %v7284_v44 = vld [vmem:[#allocation4] ss:$16 sps:$4 sm:$0xff]  }
 0x37b   :  { %v3517_v21 = vmax.f32 %v3516_v20, %v3033_v8  ;;  %v3591_v14 = vmax.f32 %v3590_v15, %v3035_v27  ;;  %v1632_v59 = vpop.f32.mrb[44].mxu1  ;;  %v1985_v61 = vpop.f32.mrb[92].mxu0 }
 0x37c   :  { %v1633_v22 = vadd.f32 %v1632_v59, %v8462_v32  ;;  %v1986_v31 = vadd.f32 %v1985_v61, %v8466_v42  ;;  %v1634_v9 = vpop.f32.mrb[45].mxu1  ;;  %v1987_v16 = vpop.f32.mrb[93].mxu0  ;;  %v7289_v59 = vld [vmem:[#allocation4 + $0x24] ss:$16 sps:$4 sm:$0xff]  }
 0x37d   :  { %v1635_v60 = vadd.f32 %v1634_v9, %v8471_v23  ;;  %v1988_v26 = vadd.f32 %v1987_v16, %v8475_v51  ;;  %v1636_v43 = vpop.f32.mrb[46].mxu1  ;;  %v1989_v55 = vpop.f32.mrb[94].mxu0 }
 0x37e   :  { %v3040_v53 = vmax.f32 %v1633_v22, 0.0  ;;  %v3042_v54 = vmax.f32 %v1986_v31, 0.0  ;;  %v1637_v18 = vadd.f32 %v1636_v43, %v8462_v32  ;;  %v1990_v40 = vadd.f32 %v1989_v55, %v8466_v42  ;;  %v1638_v19 = vpop.f32.mrb[47].mxu1  ;;  %v1991_v49 = vpop.f32.mrb[95].mxu0 }
 0x37f   :  { %v3041_v20 = vmax.f32 %v1635_v60, 0.0  ;;  %v3043_v15 = vmax.f32 %v1988_v26, 0.0  ;;  %v1639_v8 = vadd.f32 %v1638_v19, %v8471_v23  ;;  %v1992_v27 = vadd.f32 %v1991_v49, %v8475_v51  ;;  %v7287_v19 = vld [vmem:[#allocation4 + $0x20] ss:$16 sps:$4 sm:$0xff]  }
 0x380   :  { %v3481_v61 = vmax.f32 %v3480_v63, %v3040_v53  ;;  %v3555_v9 = vmax.f32 %v3554_v7, %v3042_v54  ;;  %v3048_v16 = vmax.f32 %v1637_v18, 0.0  ;;  %v3050_v1 = vmax.f32 %v1990_v40, 0.0  ;;  %2287 = vmatmul.mubr.bf16.vlgmr.msra.gmra.mrb[152].mxu1 %v8217_v0  ;;  %2640 = vmatmul.mubr.bf16.vlgmr.msra.gmra.mrb[200].mxu0 %v8217_v0 }
 0x381   :  { %v3518_v22 = vmax.f32 %v3517_v21, %v3041_v20  ;;  %v3592_v31 = vmax.f32 %v3591_v14, %v3043_v15  ;;  %v3049_v43 = vmax.f32 %v1639_v8, 0.0  ;;  %v3051_v55 = vmax.f32 %v1992_v27, 0.0  ;;  %2296 = vmatprep.mubr.bf16.mxu1 %v9359_v39  ;;  %2649 = vmatprep.mubr.bf16.mxu0 %v9359_v39 }
 0x382   :  { %v3482_v60 = vmax.f32 %v3481_v61, %v3048_v16  ;;  %v3556_v26 = vmax.f32 %v3555_v9, %v3050_v1  ;;  %5640 = vmatpush1.bf16.msra.mxu1 %v7284_v44 }
 0x383   :  { %v3519_v63 = vmax.f32 %v3518_v22, %v3049_v43  ;;  %v3593_v7 = vmax.f32 %v3592_v31, %v3051_v55  ;;  %v1642_v53 = vpop.f32.mrb[48].mxu1  ;;  %v1995_v54 = vpop.f32.mrb[96].mxu0  ;;  %5641 = vmatprep.subr.bf16.mxu1 %v7289_v59 }
 0x384   :  { %v1643_v18 = vadd.f32 %v1642_v53, %v8462_v32  ;;  %v1996_v0 = vadd.f32 %v1995_v54, %v8466_v42  ;;  %v1644_v21 = vpop.f32.mrb[49].mxu1  ;;  %v1997_v14 = vpop.f32.mrb[97].mxu0 }
 0x385   :  { %v1645_v40 = vadd.f32 %v1644_v21, %v8471_v23  ;;  %v1998_v49 = vadd.f32 %v1997_v14, %v8475_v51  ;;  %v1646_v20 = vpop.f32.mrb[50].mxu1  ;;  %v1999_v15 = vpop.f32.mrb[98].mxu0 }
 0x386   :  { %v3056_v1 = vmax.f32 %v1643_v18, 0.0  ;;  %v3058_v44 = vmax.f32 %v1996_v0, 0.0  ;;  %v1647_v8 = vadd.f32 %v1646_v20, %v8462_v32  ;;  %v2000_v27 = vadd.f32 %v1999_v15, %v8466_v42  ;;  %v1648_v61 = vpop.f32.mrb[51].mxu1  ;;  %v2001_v59 = vpop.f32.mrb[99].mxu0  ;;  %5642 = vmatpush1.bf16.msra.mxu1 %v7287_v19  ;;  %v7290_v19 = vld [vmem:[#allocation4 + $0x40] ss:$16 sps:$4 sm:$0xff]  }
 0x387   :  { %v3057_v9 = vmax.f32 %v1645_v40, 0.0  ;;  %v3059_v16 = vmax.f32 %v1998_v49, 0.0  ;;  %v1649_v22 = vadd.f32 %v1648_v61, %v8471_v23  ;;  %v2002_v31 = vadd.f32 %v2001_v59, %v8475_v51  ;;  %v7292_v40 = vld [vmem:[#allocation4 + $0x44] ss:$16 sps:$4 sm:$0xff]  }
 0x388   :  { %v3483_v43 = vmax.f32 %v3482_v60, %v3056_v1  ;;  %v3557_v55 = vmax.f32 %v3556_v26, %v3058_v44  ;;  %v3064_v53 = vmax.f32 %v1647_v8, 0.0  ;;  %v3066_v54 = vmax.f32 %v2000_v27, 0.0  ;;  %2297 = vmatmul.mubr.bf16.gmra.mrb[156].mxu1 %v8215_v62  ;;  %2650 = vmatmul.mubr.bf16.gmra.mrb[204].mxu0 %v8215_v62 }
 0x389   :  { %v3520_v18 = vmax.f32 %v3519_v63, %v3057_v9  ;;  %v3594_v0 = vmax.f32 %v3593_v7, %v3059_v16  ;;  %v3065_v21 = vmax.f32 %v1649_v22, 0.0  ;;  %v3067_v14 = vmax.f32 %v2002_v31, 0.0  ;;  %2306 = vmatprep.mubr.bf16.mxu1 %v9359_v39  ;;  %2659 = vmatprep.mubr.bf16.mxu0 %v9359_v39 }
 0x38a   :  { %v3484_v49 = vmax.f32 %v3483_v43, %v3064_v53  ;;  %v3558_v20 = vmax.f32 %v3557_v55, %v3066_v54  ;;  %5643 = vmatprep.subr.bf16.mxu1 %v7292_v40 }
 0x38b   :  { %v3521_v60 = vmax.f32 %v3520_v18, %v3065_v21  ;;  %v3595_v26 = vmax.f32 %v3594_v0, %v3067_v14  ;;  %v1652_v15 = vpop.f32.mrb[52].mxu1  ;;  %v2005_v1 = vpop.f32.mrb[100].mxu0  ;;  %5644 = vmatpush1.bf16.msra.mxu1 %v7290_v19 }
 0x38c   :  { %v1653_v44 = vadd.f32 %v1652_v15, %v8462_v32  ;;  %v2006_v62 = vadd.f32 %v2005_v1, %v8466_v42  ;;  %v1654_v63 = vpop.f32.mrb[53].mxu1  ;;  %v2007_v7 = vpop.f32.mrb[101].mxu0 }
 0x38d   :  { %v1655_v8 = vadd.f32 %v1654_v63, %v8471_v23  ;;  %v2008_v27 = vadd.f32 %v2007_v7, %v8475_v51  ;;  %v1656_v61 = vpop.f32.mrb[54].mxu1  ;;  %v2009_v59 = vpop.f32.mrb[102].mxu0 }
 0x38e   :  { %v3072_v9 = vmax.f32 %v1653_v44, 0.0  ;;  %v3074_v16 = vmax.f32 %v2006_v62, 0.0  ;;  %v1657_v22 = vadd.f32 %v1656_v61, %v8462_v32  ;;  %v2010_v31 = vadd.f32 %v2009_v59, %v8466_v42  ;;  %v1658_v43 = vpop.f32.mrb[55].mxu1  ;;  %v2011_v55 = vpop.f32.mrb[103].mxu0 }
 0x38f   :  { %v3073_v53 = vmax.f32 %v1655_v8, 0.0  ;;  %v3075_v54 = vmax.f32 %v2008_v27, 0.0  ;;  %v1659_v18 = vadd.f32 %v1658_v43, %v8471_v23  ;;  %v2012_v0 = vadd.f32 %v2011_v55, %v8475_v51 }
 0x390   :  { %v3485_v21 = vmax.f32 %v3484_v49, %v3072_v9  ;;  %v3559_v14 = vmax.f32 %v3558_v20, %v3074_v16  ;;  %v3080_v19 = vmax.f32 %v1657_v22, 0.0  ;;  %v3082_v40 = vmax.f32 %v2010_v31, 0.0  ;;  %2307 = vmatmul.mubr.bf16.gmra.mrb[160].mxu1 %v8236_v38  ;;  %2660 = vmatmul.mubr.bf16.gmra.mrb[208].mxu0 %v8236_v38 }
 0x391   :  { %v3522_v15 = vmax.f32 %v3521_v60, %v3073_v53  ;;  %v3596_v1 = vmax.f32 %v3595_v26, %v3075_v54  ;;  %v3081_v44 = vmax.f32 %v1659_v18, 0.0  ;;  %v3083_v62 = vmax.f32 %v2012_v0, 0.0  ;;  %2316 = vmatprep.mubr.bf16.mxu1 %v9359_v39  ;;  %2669 = vmatprep.mubr.bf16.mxu0 %v9359_v39 }
 0x392   :  { %v3486_v63 = vmax.f32 %v3485_v21, %v3080_v19  ;;  %v3560_v7 = vmax.f32 %v3559_v14, %v3082_v40 }
 0x393   :  { %v3523_v8 = vmax.f32 %v3522_v15, %v3081_v44  ;;  %v3597_v27 = vmax.f32 %v3596_v1, %v3083_v62  ;;  %v1662_v49 = vpop.f32.mrb[56].mxu1  ;;  %v2015_v20 = vpop.f32.mrb[104].mxu0 }
 0x394   :  { %v1663_v61 = vadd.f32 %v1662_v49, %v8462_v32  ;;  %v2016_v59 = vadd.f32 %v2015_v20, %v8466_v42  ;;  %v1664_v9 = vpop.f32.mrb[57].mxu1  ;;  %v2017_v38 = vpop.f32.mrb[105].mxu0 }
 0x395   :  { %v1665_v60 = vadd.f32 %v1664_v9, %v8471_v23  ;;  %v2018_v26 = vadd.f32 %v2017_v38, %v8475_v51  ;;  %v1666_v16 = vpop.f32.mrb[58].mxu1  ;;  %v2019_v22 = vpop.f32.mrb[106].mxu0  ;;  %v7295_v9 = vld [vmem:[#allocation4 + $0x64] ss:$16 sps:$4 sm:$0xff]  }
 0x396   :  { %v3088_v31 = vmax.f32 %v1663_v61, 0.0  ;;  %v3090_v43 = vmax.f32 %v2016_v59, 0.0  ;;  %v1667_v55 = vadd.f32 %v1666_v16, %v8462_v32  ;;  %v2020_v53 = vadd.f32 %v2019_v22, %v8466_v42  ;;  %v1668_v54 = vpop.f32.mrb[59].mxu1  ;;  %v2021_v18 = vpop.f32.mrb[107].mxu0  ;;  %v7293_v59 = vld [vmem:[#allocation4 + $0x60] ss:$16 sps:$4 sm:$0xff]   ;;  %5645 = vmatprep.subr.bf16.mxu1 %v7295_v9 }
 0x397   :  { %v3089_v0 = vmax.f32 %v1665_v60, 0.0  ;;  %v3091_v21 = vmax.f32 %v2018_v26, 0.0  ;;  %v1669_v14 = vadd.f32 %v1668_v54, %v8471_v23  ;;  %v2022_v19 = vadd.f32 %v2021_v18, %v8475_v51  ;;  %5646 = vmatpush1.bf16.msra.mxu1 %v7293_v59 }
 0x398   :  { %v3487_v40 = vmax.f32 %v3486_v63, %v3088_v31  ;;  %v3561_v15 = vmax.f32 %v3560_v7, %v3090_v43  ;;  %v3096_v1 = vmax.f32 %v1667_v55, 0.0  ;;  %v3098_v44 = vmax.f32 %v2020_v53, 0.0  ;;  %2317 = vmatmul.mubr.bf16.gmra.mrb[164].mxu1 %v8234_v41  ;;  %2670 = vmatmul.mubr.bf16.gmra.mrb[212].mxu0 %v8234_v41 }
 0x399   :  { %v3524_v62 = vmax.f32 %v3523_v8, %v3089_v0  ;;  %v3598_v49 = vmax.f32 %v3597_v27, %v3091_v21  ;;  %v3097_v20 = vmax.f32 %v1669_v14, 0.0  ;;  %v3099_v61 = vmax.f32 %v2022_v19, 0.0  ;;  %2326 = vmatprep.mubr.bf16.mxu1 %v9359_v39  ;;  %2679 = vmatprep.mubr.bf16.mxu0 %v9359_v39 }
 0x39a   :  { %v3488_v38 = vmax.f32 %v3487_v40, %v3096_v1  ;;  %v3562_v60 = vmax.f32 %v3561_v15, %v3098_v44 }
 0x39b   :  { %v3525_v63 = vmax.f32 %v3524_v62, %v3097_v20  ;;  %v3599_v7 = vmax.f32 %v3598_v49, %v3099_v61  ;;  %v1672_v26 = vpop.f32.mrb[60].mxu1  ;;  %v2025_v16 = vpop.f32.mrb[108].mxu0 }
 0x39c   :  { %v1673_v22 = vadd.f32 %v1672_v26, %v8462_v32  ;;  %v2026_v41 = vadd.f32 %v2025_v16, %v8466_v42  ;;  %v1674_v8 = vpop.f32.mrb[61].mxu1  ;;  %v2027_v27 = vpop.f32.mrb[109].mxu0 }
 0x39d   :  { %v1675_v31 = vadd.f32 %v1674_v8, %v8471_v23  ;;  %v2028_v43 = vadd.f32 %v2027_v27, %v8475_v51  ;;  %v1676_v55 = vpop.f32.mrb[62].mxu1  ;;  %v2029_v53 = vpop.f32.mrb[110].mxu0 }
 0x39e   :  { %v3104_v54 = vmax.f32 %v1673_v22, 0.0  ;;  %v3106_v18 = vmax.f32 %v2026_v41, 0.0  ;;  %v1677_v0 = vadd.f32 %v1676_v55, %v8462_v32  ;;  %v2030_v21 = vadd.f32 %v2029_v53, %v8466_v42  ;;  %v1678_v14 = vpop.f32.mrb[63].mxu1  ;;  %v2031_v19 = vpop.f32.mrb[111].mxu0 }
 0x39f   :  { %v3105_v40 = vmax.f32 %v1675_v31, 0.0  ;;  %v3107_v15 = vmax.f32 %v2028_v43, 0.0  ;;  %v1679_v1 = vadd.f32 %v1678_v14, %v8471_v23  ;;  %v2032_v44 = vadd.f32 %v2031_v19, %v8475_v51 }
 0x3a0   :  { %v3489_v62 = vmax.f32 %v3488_v38, %v3104_v54  ;;  %v3563_v49 = vmax.f32 %v3562_v60, %v3106_v18  ;;  %v3112_v20 = vmax.f32 %v1677_v0, 0.0  ;;  %v3114_v61 = vmax.f32 %v2030_v21, 0.0  ;;  %2327 = vmatmul.mubr.bf16.gmra.mrb[168].mxu1 %v8252_v50  ;;  %2680 = vmatmul.mubr.bf16.gmra.mrb[216].mxu0 %v8252_v50 }
 0x3a1   :  { %v3526_v59 = vmax.f32 %v3525_v63, %v3105_v40  ;;  %v3600_v9 = vmax.f32 %v3599_v7, %v3107_v15  ;;  %v3113_v26 = vmax.f32 %v1679_v1, 0.0  ;;  %v3115_v16 = vmax.f32 %v2032_v44, 0.0  ;;  %2336 = vmatprep.mubr.bf16.mxu1 %v9359_v39  ;;  %2689 = vmatprep.mubr.bf16.mxu0 %v9359_v39 }
 0x3a2   :  { %v3490_v22 = vmax.f32 %v3489_v62, %v3112_v20  ;;  %v3564_v41 = vmax.f32 %v3563_v49, %v3114_v61 }
 0x3a3   :  { %v3527_v8 = vmax.f32 %v3526_v59, %v3113_v26  ;;  %v3601_v27 = vmax.f32 %v3600_v9, %v3115_v16  ;;  %v1682_v38 = vpop.f32.mrb[64].mxu1  ;;  %v2035_v60 = vpop.f32.mrb[112].mxu0  ;;  %v7296_v9 = vld [vmem:[#allocation4 + $0x8] ss:$16 sps:$4 sm:$0xff]   ;;  %v7298_v26 = vld [vmem:[#allocation4 + $0xc] ss:$16 sps:$4 sm:$0xff]  }
 0x3a4   :  { %v1683_v31 = vadd.f32 %v1682_v38, %v8462_v32  ;;  %v2036_v43 = vadd.f32 %v2035_v60, %v8466_v42  ;;  %v1684_v55 = vpop.f32.mrb[65].mxu1  ;;  %v2037_v50 = vpop.f32.mrb[113].mxu0  ;;  %5803 = vmatprep.subr.bf16.mxu0 %v7298_v26 }
 0x3a5   :  { %v1685_v63 = vadd.f32 %v1684_v55, %v8471_v23  ;;  %v2038_v7 = vadd.f32 %v2037_v50, %v8475_v51  ;;  %v1686_v53 = vpop.f32.mrb[66].mxu1  ;;  %v2039_v54 = vpop.f32.mrb[114].mxu0  ;;  %v7301_v55 = vld [vmem:[#allocation4 + $0x84] ss:$16 sps:$4 sm:$0xff]   ;;  %5804 = vmatpush1.bf16.msra.mxu0 %v7296_v9 }
 0x3a6   :  { %v3120_v18 = vmax.f32 %v1683_v31, 0.0  ;;  %v3122_v0 = vmax.f32 %v2036_v43, 0.0  ;;  %v1687_v21 = vadd.f32 %v1686_v53, %v8462_v32  ;;  %v2040_v14 = vadd.f32 %v2039_v54, %v8466_v42  ;;  %v1688_v19 = vpop.f32.mrb[67].mxu1  ;;  %v2041_v40 = vpop.f32.mrb[115].mxu0  ;;  %v7299_v43 = vld [vmem:[#allocation4 + $0x80] ss:$16 sps:$4 sm:$0xff]   ;;  %5647 = vmatprep.subr.bf16.mxu1 %v7301_v55 }
 0x3a7   :  { %v3121_v15 = vmax.f32 %v1685_v63, 0.0  ;;  %v3123_v1 = vmax.f32 %v2038_v7, 0.0  ;;  %v1689_v44 = vadd.f32 %v1688_v19, %v8471_v23  ;;  %v2042_v62 = vadd.f32 %v2041_v40, %v8475_v51  ;;  %5648 = vmatpush1.bf16.msra.mxu1 %v7299_v43 }
 0x3a8   :  { %v3491_v49 = vmax.f32 %v3490_v22, %v3120_v18  ;;  %v3565_v20 = vmax.f32 %v3564_v41, %v3122_v0  ;;  %v3128_v61 = vmax.f32 %v1687_v21, 0.0  ;;  %v3130_v59 = vmax.f32 %v2040_v14, 0.0  ;;  %2337 = vmatmul.mubr.bf16.gmra.mrb[172].mxu1 %v8250_v58  ;;  %2690 = vmatmul.mubr.bf16.gmra.mrb[220].mxu0 %v8250_v58 }
 0x3a9   :  { %v3528_v16 = vmax.f32 %v3527_v8, %v3121_v15  ;;  %v3602_v38 = vmax.f32 %v3601_v27, %v3123_v1  ;;  %v3129_v60 = vmax.f32 %v1689_v44, 0.0  ;;  %v3131_v31 = vmax.f32 %v2042_v62, 0.0  ;;  %2346 = vmatprep.mubr.bf16.mxu1 %v9359_v39  ;;  %2699 = vmatprep.mubr.bf16.mxu0 %v9359_v39 }
 0x3aa   :  { %v3492_v22 = vmax.f32 %v3491_v49, %v3128_v61  ;;  %v3566_v41 = vmax.f32 %v3565_v20, %v3130_v59 }
 0x3ab   :  { %v3529_v50 = vmax.f32 %v3528_v16, %v3129_v60  ;;  %v3603_v63 = vmax.f32 %v3602_v38, %v3131_v31  ;;  %v1692_v7 = vpop.f32.mrb[68].mxu1  ;;  %v2045_v53 = vpop.f32.mrb[116].mxu0 }
 0x3ac   :  { %v1693_v58 = vadd.f32 %v1692_v7, %v8462_v32  ;;  %v2046_v8 = vadd.f32 %v2045_v53, %v8466_v42  ;;  %v1694_v27 = vpop.f32.mrb[69].mxu1  ;;  %v2047_v54 = vpop.f32.mrb[117].mxu0 }
 0x3ad   :  { %v1695_v18 = vadd.f32 %v1694_v27, %v8471_v23  ;;  %v2048_v0 = vadd.f32 %v2047_v54, %v8475_v51  ;;  %v1696_v21 = vpop.f32.mrb[70].mxu1  ;;  %v2049_v14 = vpop.f32.mrb[118].mxu0 }
 0x3ae   :  { %v3136_v19 = vmax.f32 %v1693_v58, 0.0  ;;  %v3138_v40 = vmax.f32 %v2046_v8, 0.0  ;;  %v1697_v15 = vadd.f32 %v1696_v21, %v8462_v32  ;;  %v2050_v1 = vadd.f32 %v2049_v14, %v8466_v42  ;;  %v1698_v44 = vpop.f32.mrb[71].mxu1  ;;  %v2051_v62 = vpop.f32.mrb[119].mxu0 }
 0x3af   :  { %v3137_v49 = vmax.f32 %v1695_v18, 0.0  ;;  %v3139_v20 = vmax.f32 %v2048_v0, 0.0  ;;  %v1699_v61 = vadd.f32 %v1698_v44, %v8471_v23  ;;  %v2052_v59 = vadd.f32 %v2051_v62, %v8475_v51 }
 0x3b0   :  { %v3493_v9 = vmax.f32 %v3492_v22, %v3136_v19  ;;  %v3567_v26 = vmax.f32 %v3566_v41, %v3138_v40  ;;  %v3144_v16 = vmax.f32 %v1697_v15, 0.0  ;;  %v3146_v38 = vmax.f32 %v2050_v1, 0.0  ;;  %2347 = vmatmul.mubr.bf16.gmra.mrb[176].mxu1 %v8268_v13  ;;  %2700 = vmatmul.mubr.bf16.gmra.mrb[224].mxu0 %v8268_v13 }
 0x3b1   :  { %v3530_v60 = vmax.f32 %v3529_v50, %v3137_v49  ;;  %v3604_v31 = vmax.f32 %v3603_v63, %v3139_v20  ;;  %v3145_v43 = vmax.f32 %v1699_v61, 0.0  ;;  %v3147_v55 = vmax.f32 %v2052_v59, 0.0  ;;  %2356 = vmatprep.mubr.bf16.mxu1 %v9359_v39  ;;  %2709 = vmatprep.mubr.bf16.mxu0 %v9359_v39 }
 0x3b2   :  { %v3494_v7 = vmax.f32 %v3493_v9, %v3144_v16  ;;  %v3568_v53 = vmax.f32 %v3567_v26, %v3146_v38  ;;  %v7302_v38 = vld [vmem:[#allocation4 + $0x28] ss:$16 sps:$4 sm:$0xff]  }
 0x3b3   :  { %v3531_v58 = vmax.f32 %v3530_v60, %v3145_v43  ;;  %v3605_v8 = vmax.f32 %v3604_v31, %v3147_v55  ;;  %v1702_v22 = vpop.f32.mrb[72].mxu1  ;;  %v2055_v41 = vpop.f32.mrb[120].mxu0  ;;  %v7304_v60 = vld [vmem:[#allocation4 + $0x2c] ss:$16 sps:$4 sm:$0xff]  }
 0x3b4   :  { %v1703_v27 = vadd.f32 %v1702_v22, %v8462_v32  ;;  %v2056_v54 = vadd.f32 %v2055_v41, %v8466_v42  ;;  %v1704_v18 = vpop.f32.mrb[73].mxu1  ;;  %v2057_v13 = vpop.f32.mrb[121].mxu0  ;;  %v7305_v41 = vld [vmem:[#allocation4 + $0xa0] ss:$16 sps:$4 sm:$0xff]   ;;  %5805 = vmatprep.subr.bf16.mxu0 %v7304_v60 }
 0x3b5   :  { %v1705_v50 = vadd.f32 %v1704_v18, %v8471_v23  ;;  %v2058_v63 = vadd.f32 %v2057_v13, %v8475_v51  ;;  %v1706_v0 = vpop.f32.mrb[74].mxu1  ;;  %v2059_v21 = vpop.f32.mrb[122].mxu0  ;;  %5806 = vmatpush1.bf16.msra.mxu0 %v7302_v38 }
 0x3b6   :  { %v3152_v14 = vmax.f32 %v1703_v27, 0.0  ;;  %v3154_v19 = vmax.f32 %v2056_v54, 0.0  ;;  %v1707_v40 = vadd.f32 %v1706_v0, %v8462_v32  ;;  %v2060_v15 = vadd.f32 %v2059_v21, %v8466_v42  ;;  %v1708_v1 = vpop.f32.mrb[75].mxu1  ;;  %v2061_v44 = vpop.f32.mrb[123].mxu0  ;;  %v7307_v27 = vld [vmem:[#allocation4 + $0xa4] ss:$16 sps:$4 sm:$0xff]  }
 0x3b7   :  { %v3153_v62 = vmax.f32 %v1705_v50, 0.0  ;;  %v3155_v49 = vmax.f32 %v2058_v63, 0.0  ;;  %v1709_v20 = vadd.f32 %v1708_v1, %v8471_v23  ;;  %v2062_v61 = vadd.f32 %v2061_v44, %v8475_v51  ;;  %5649 = vmatprep.subr.bf16.mxu1 %v7307_v27 }
 0x3b8   :  { %v3495_v59 = vmax.f32 %v3494_v7, %v3152_v14  ;;  %v3569_v9 = vmax.f32 %v3568_v53, %v3154_v19  ;;  %v3160_v26 = vmax.f32 %v1707_v40, 0.0  ;;  %v3162_v16 = vmax.f32 %v2060_v15, 0.0  ;;  %2357 = vmatmul.mubr.bf16.gmra.mrb[180].mxu1 %v8266_v12  ;;  %2710 = vmatmul.mubr.bf16.gmra.mrb[228].mxu0 %v8266_v12 }
 0x3b9   :  { %v3532_v31 = vmax.f32 %v3531_v58, %v3153_v62  ;;  %v3606_v43 = vmax.f32 %v3605_v8, %v3155_v49  ;;  %v3161_v55 = vmax.f32 %v1709_v20, 0.0  ;;  %v3163_v22 = vmax.f32 %v2062_v61, 0.0  ;;  %2366 = vmatprep.mubr.bf16.mxu1 %v9359_v39  ;;  %2719 = vmatprep.mubr.bf16.mxu0 %v9359_v39 }
 0x3ba   :  { %v3496_v7 = vmax.f32 %v3495_v59, %v3160_v26  ;;  %v3570_v53 = vmax.f32 %v3569_v9, %v3162_v16  ;;  %5650 = vmatpush1.bf16.msra.mxu1 %v7305_v41 }
 0x3bb   :  { %v3533_v54 = vmax.f32 %v3532_v31, %v3161_v55  ;;  %v3607_v18 = vmax.f32 %v3606_v43, %v3163_v22  ;;  %v1712_v13 = vpop.f32.mrb[76].mxu1  ;;  %v2065_v50 = vpop.f32.mrb[124].mxu0 }
 0x3bc   :  { %v1713_v12 = vadd.f32 %v1712_v13, %v8462_v32  ;;  %v2066_v58 = vadd.f32 %v2065_v50, %v8466_v42  ;;  %v1714_v8 = vpop.f32.mrb[77].mxu1  ;;  %v2067_v63 = vpop.f32.mrb[125].mxu0 }
 0x3bd   :  { %v1715_v0 = vadd.f32 %v1714_v8, %v8471_v23  ;;  %v2068_v21 = vadd.f32 %v2067_v63, %v8475_v51  ;;  %v1716_v14 = vpop.f32.mrb[78].mxu1  ;;  %v2069_v19 = vpop.f32.mrb[126].mxu0 }
 0x3be   :  { %v3168_v40 = vmax.f32 %v1713_v12, 0.0  ;;  %v3170_v15 = vmax.f32 %v2066_v58, 0.0  ;;  %v1717_v1 = vadd.f32 %v1716_v14, %v8462_v32  ;;  %v2070_v44 = vadd.f32 %v2069_v19, %v8466_v42  ;;  %v1718_v62 = vpop.f32.mrb[79].mxu1  ;;  %v2071_v49 = vpop.f32.mrb[127].mxu0 }
 0x3bf   :  { %v3169_v20 = vmax.f32 %v1715_v0, 0.0  ;;  %v3171_v61 = vmax.f32 %v2068_v21, 0.0  ;;  %v1719_v59 = vadd.f32 %v1718_v62, %v8471_v23  ;;  %v2072_v9 = vadd.f32 %v2071_v49, %v8475_v51 }
 0x3c0   :  { %v3497_v26 = vmax.f32 %v3496_v7, %v3168_v40  ;;  %v3571_v16 = vmax.f32 %v3570_v53, %v3170_v15  ;;  %v3176_v38 = vmax.f32 %v1717_v1, 0.0  ;;  %v3178_v60 = vmax.f32 %v2070_v44, 0.0  ;;  %2367 = vmatmul.mubr.bf16.gmra.mrb[184].mxu1 %v8280_v29  ;;  %2720 = vmatmul.mubr.bf16.gmra.mrb[232].mxu0 %v8280_v29 }
 0x3c1   :  { %v3534_v31 = vmax.f32 %v3533_v54, %v3169_v20  ;;  %v3608_v43 = vmax.f32 %v3607_v18, %v3171_v61  ;;  %v3177_v55 = vmax.f32 %v1719_v59, 0.0  ;;  %v3179_v22 = vmax.f32 %v2072_v9, 0.0  ;;  %2376 = vmatprep.mubr.bf16.mxu1 %v9359_v39  ;;  %2729 = vmatprep.mubr.bf16.mxu0 %v9359_v39  ;;  %v7310_v61 = vld [vmem:[#allocation4 + $0x4c] ss:$16 sps:$4 sm:$0xff]  }
 0x3c2   :  { %v3498_v41 = vmax.f32 %v3497_v26, %v3176_v38  ;;  %v3572_v27 = vmax.f32 %v3571_v16, %v3178_v60  ;;  %v7308_v38 = vld [vmem:[#allocation4 + $0x48] ss:$16 sps:$4 sm:$0xff]   ;;  %5807 = vmatprep.subr.bf16.mxu0 %v7310_v61 }
 0x3c3   :  { %v3535_v13 = vmax.f32 %v3534_v31, %v3177_v55  ;;  %v3609_v50 = vmax.f32 %v3608_v43, %v3179_v22  ;;  %v1722_v7 = vpop.f32.mrb[80].mxu1  ;;  %v2075_v53 = vpop.f32.mrb[128].mxu0  ;;  %v7311_v22 = vld [vmem:[#allocation4 + $0xc0] ss:$16 sps:$4 sm:$0xff]   ;;  %5808 = vmatpush1.bf16.msra.mxu0 %v7308_v38 }
 0x3c4   :  { %v1723_v12 = vadd.f32 %v1722_v7, %v8462_v32  ;;  %v2076_v58 = vadd.f32 %v2075_v53, %v8466_v42  ;;  %v1724_v8 = vpop.f32.mrb[81].mxu1  ;;  %v2077_v29 = vpop.f32.mrb[129].mxu0  ;;  %v7313_v7 = vld [vmem:[#allocation4 + $0xc4] ss:$16 sps:$4 sm:$0xff]  }
 0x3c5   :  { %v1725_v54 = vadd.f32 %v1724_v8, %v8471_v23  ;;  %v2078_v18 = vadd.f32 %v2077_v29, %v8475_v51  ;;  %v1726_v63 = vpop.f32.mrb[82].mxu1  ;;  %v2079_v0 = vpop.f32.mrb[130].mxu0  ;;  %5651 = vmatprep.subr.bf16.mxu1 %v7313_v7 }
 0x3c6   :  { %v3184_v21 = vmax.f32 %v1723_v12, 0.0  ;;  %v3186_v14 = vmax.f32 %v2076_v58, 0.0  ;;  %v1727_v19 = vadd.f32 %v1726_v63, %v8462_v32  ;;  %v2080_v40 = vadd.f32 %v2079_v0, %v8466_v42  ;;  %v1728_v15 = vpop.f32.mrb[83].mxu1  ;;  %v2081_v1 = vpop.f32.mrb[131].mxu0  ;;  %5652 = vmatpush1.bf16.msra.mxu1 %v7311_v22 }
 0x3c7   :  { %v3185_v44 = vmax.f32 %v1725_v54, 0.0  ;;  %v3187_v62 = vmax.f32 %v2078_v18, 0.0  ;;  %v1729_v49 = vadd.f32 %v1728_v15, %v8471_v23  ;;  %v2082_v20 = vadd.f32 %v2081_v1, %v8475_v51  ;;  %v7314_v18 = vld [vmem:[#allocation4 + $0x68] ss:$16 sps:$4 sm:$0xff]  }
 0x3c8   :  { %v3499_v59 = vmax.f32 %v3498_v41, %v3184_v21  ;;  %v3573_v9 = vmax.f32 %v3572_v27, %v3186_v14  ;;  %v3192_v26 = vmax.f32 %v1727_v19, 0.0  ;;  %v3194_v16 = vmax.f32 %v2080_v40, 0.0  ;;  %2377 = vmatmul.mubr.bf16.gmra.mrb[188].mxu1 %v8278_v28  ;;  %2730 = vmatmul.mubr.bf16.gmra.mrb[236].mxu0 %v8278_v28  ;;  %v7316_v28 = vld [vmem:[#allocation4 + $0x6c] ss:$16 sps:$4 sm:$0xff]  }
 0x3c9   :  { %v3536_v60 = vmax.f32 %v3535_v13, %v3185_v44  ;;  %v3610_v31 = vmax.f32 %v3609_v50, %v3187_v62  ;;  %v3193_v43 = vmax.f32 %v1729_v49, 0.0  ;;  %v3195_v55 = vmax.f32 %v2082_v20, 0.0  ;;  %2386 = vmatprep.mubr.bf16.mxu1 %v9359_v39  ;;  %2739 = vmatprep.mubr.bf16.mxu0 %v9359_v39 }
 0x3ca   :  { %v3500_v53 = vmax.f32 %v3499_v59, %v3192_v26  ;;  %v3574_v41 = vmax.f32 %v3573_v9, %v3194_v16  ;;  %5809 = vmatprep.subr.bf16.mxu0 %v7316_v28  ;;  %v7319_v9 = vld [vmem:[#allocation4 + $0x8c] ss:$16 sps:$4 sm:$0xff]  }
 0x3cb   :  { %v3537_v27 = vmax.f32 %v3536_v60, %v3193_v43  ;;  %v3611_v12 = vmax.f32 %v3610_v31, %v3195_v55  ;;  %v1732_v58 = vpop.f32.mrb[84].mxu1  ;;  %v2085_v8 = vpop.f32.mrb[132].mxu0  ;;  %5810 = vmatpush1.bf16.msra.mxu0 %v7314_v18  ;;  %v7317_v31 = vld [vmem:[#allocation4 + $0x88] ss:$16 sps:$4 sm:$0xff]  }
 0x3cc   :  { %v1733_v13 = vadd.f32 %v1732_v58, %v8462_v32  ;;  %v2086_v50 = vadd.f32 %v2085_v8, %v8466_v42  ;;  %v1734_v29 = vpop.f32.mrb[85].mxu1  ;;  %v2087_v54 = vpop.f32.mrb[133].mxu0  ;;  %5811 = vmatprep.subr.bf16.mxu0 %v7319_v9 }
 0x3cd   :  { %v1735_v63 = vadd.f32 %v1734_v29, %v8471_v23  ;;  %v2088_v0 = vadd.f32 %v2087_v54, %v8475_v51  ;;  %v1736_v21 = vpop.f32.mrb[86].mxu1  ;;  %v2089_v14 = vpop.f32.mrb[134].mxu0 }
 0x3ce   :  { %v3200_v19 = vmax.f32 %v1733_v13, 0.0  ;;  %v3202_v40 = vmax.f32 %v2086_v50, 0.0  ;;  %v1737_v15 = vadd.f32 %v1736_v21, %v8462_v32  ;;  %v2090_v1 = vadd.f32 %v2089_v14, %v8466_v42  ;;  %v1738_v44 = vpop.f32.mrb[87].mxu1  ;;  %v2091_v62 = vpop.f32.mrb[135].mxu0  ;;  %v7320_v50 = vld [vmem:[#allocation4 + $0xa8] ss:$16 sps:$4 sm:$0xff]  }
 0x3cf   :  { %v3201_v49 = vmax.f32 %v1735_v63, 0.0  ;;  %v3203_v20 = vmax.f32 %v2088_v0, 0.0  ;;  %v1739_v61 = vadd.f32 %v1738_v44, %v8471_v23  ;;  %v2092_v59 = vadd.f32 %v2091_v62, %v8475_v51  ;;  %5812 = vmatpush1.bf16.msra.mxu0 %v7317_v31  ;;  %v7326_v44 = vld [vmem:[#allocation4 + $0xc8] ss:$16 sps:$4 sm:$0xff]  }
 0x3d0   :  { %v3501_v26 = vmax.f32 %v3500_v53, %v3200_v19  ;;  %v3575_v16 = vmax.f32 %v3574_v41, %v3202_v40  ;;  %v3208_v38 = vmax.f32 %v1737_v15, 0.0  ;;  %v3210_v60 = vmax.f32 %v2090_v1, 0.0  ;;  %2387 = vmatmul.mubr.bf16.gmra.mrb[192].mxu1 %v8292_v52  ;;  %2740 = vmatmul.mubr.bf16.gmra.mrb[240].mxu0 %v8292_v52  ;;  %v7328_v40 = vld [vmem:[#allocation4 + $0xcc] ss:$16 sps:$4 sm:$0xff]  }
 0x3d1   :  { %v3538_v43 = vmax.f32 %v3537_v27, %v3201_v49  ;;  %v3612_v55 = vmax.f32 %v3611_v12, %v3203_v20  ;;  %v3209_v22 = vmax.f32 %v1739_v61, 0.0  ;;  %v3211_v7 = vmax.f32 %v2092_v59, 0.0  ;;  %2396 = vmatprep.mubr.bf16.mxu1 %v9359_v39  ;;  %2749 = vmatprep.mubr.bf16.mxu0 %v9359_v39  ;;  %v7322_v27 = vld [vmem:[#allocation4 + $0xac] ss:$16 sps:$4 sm:$0xff]  }
 0x3d2   :  { %v8669_v58 = vmax.f32 %v3501_v26, %v3208_v38  ;;  %v8671_v8 = vmax.f32 %v3575_v16, %v3210_v60  ;;  %5813 = vmatprep.subr.bf16.mxu0 %v7322_v27 }
 0x3d3   :  { %v8673_v53 = vmax.f32 %v3538_v43, %v3209_v22  ;;  %v8675_v41 = vmax.f32 %v3612_v55, %v3211_v7  ;;  %v1742_v28 = vpop.f32.mrb[88].mxu1  ;;  %v2095_v52 = vpop.f32.mrb[136].mxu0  ;;  %5814 = vmatpush1.bf16.msra.mxu0 %v7320_v50  ;;  %v7325_v43 = vld [vmem:[#allocation4 + $0xe4] ss:$16 sps:$4 sm:$0xff]  }
 0x3d4   :  { %v1744_v12 = vpop.f32.mrb[89].mxu1  ;;  %v2097_v13 = vpop.f32.mrb[137].mxu0  ;;  %v1743_v29 = vadd.f32 %v1742_v28, %v8462_v32  ;;  %v2096_v54 = vadd.f32 %v2095_v52, %v8466_v42  ;;  %5815 = vmatprep.subr.bf16.mxu0 %v7328_v40  ;;  %v7323_v52 = vld [vmem:[#allocation4 + $0xe0] ss:$16 sps:$4 sm:$0xff]   ;;  %5653 = vmatprep.subr.bf16.mxu1 %v7325_v43 }
 0x3d5   :  { %v1746_v18 = vpop.f32.mrb[90].mxu1  ;;  %v2099_v63 = vpop.f32.mrb[138].mxu0  ;;  %v1745_v0 = vadd.f32 %v1744_v12, %v8471_v23  ;;  %v2098_v21 = vadd.f32 %v2097_v13, %v8475_v51  ;;  %5654 = vmatpush1.bf16.msra.mxu1 %v7323_v52 }
 0x3d6   :  { %v1748_v14 = vpop.f32.mrb[91].mxu1  ;;  %v2101_v19 = vpop.f32.mrb[139].mxu0  ;;  %v1747_v15 = vadd.f32 %v1746_v18, %v8462_v32  ;;  %v2100_v1 = vadd.f32 %v2099_v63, %v8466_v42  ;;  %v3216_v62 = vmax.f32 %v1743_v29, 0.0  ;;  %v3218_v49 = vmax.f32 %v2096_v54, 0.0 }
 0x3d7   :  { %v1749_v20 = vadd.f32 %v1748_v14, %v8471_v23  ;;  %v2102_v61 = vadd.f32 %v2101_v19, %v8475_v51  ;;  %v3217_v59 = vmax.f32 %v1745_v0, 0.0  ;;  %v3219_v9 = vmax.f32 %v2098_v21, 0.0  ;;  %5816 = vmatpush1.bf16.msra.mxu0 %v7326_v44  ;;  %v7331_v0 = vld [vmem:[#allocation4 + $0xec] ss:$16 sps:$4 sm:$0xff]  }
 0x3d8   :  { %2397 = vmatmul.mubr.bf16.gmra.mrb[196].mxu1 %v8290_v30  ;;  %2750 = vmatmul.mubr.bf16.gmra.mrb[244].mxu0 %v8290_v30  ;;  %v3224_v26 = vmax.f32 %v1747_v15, 0.0  ;;  %v3226_v16 = vmax.f32 %v2100_v1, 0.0  ;;  %v7329_v15 = vld [vmem:[#allocation4 + $0xe8] ss:$16 sps:$4 sm:$0xff]  }
 0x3d9   :  { %2406 = vmatprep.mubr.bf16.mxu1 %v9359_v39  ;;  %2759 = vmatprep.mubr.bf16.mxu0 %v9359_v39  ;;  %v3225_v38 = vmax.f32 %v1749_v20, 0.0  ;;  %v3227_v60 = vmax.f32 %v2102_v61, 0.0 }
 0x3da   :  { %v3768_v55 = vmax.f32 %v3216_v62, %v3224_v26  ;;  %v3842_v22 = vmax.f32 %v3218_v49, %v3226_v16  ;;  %v7334_v26 = vld [vmem:[#allocation4 + $0x104] ss:$16 sps:$4 sm:$0xff]   ;;  %5817 = vmatprep.subr.bf16.mxu0 %v7331_v0 }
 0x3db   :  { %v1752_v31 = vpop.f32.mrb[92].mxu1  ;;  %v2105_v30 = vpop.f32.mrb[140].mxu0  ;;  %v3805_v27 = vmax.f32 %v3217_v59, %v3225_v38  ;;  %v3879_v12 = vmax.f32 %v3219_v9, %v3227_v60  ;;  %5818 = vmatpush1.bf16.msra.mxu0 %v7329_v15  ;;  %5655 = vmatprep.subr.bf16.mxu1 %v7334_v26 }
 0x3dc   :  { %v1754_v7 = vpop.f32.mrb[93].mxu1  ;;  %v2107_v28 = vpop.f32.mrb[141].mxu0  ;;  %v1753_v29 = vadd.f32 %v1752_v31, %v8462_v32  ;;  %v2106_v54 = vadd.f32 %v2105_v30, %v8466_v42  ;;  %v7332_v30 = vld [vmem:[#allocation4 + $0x100] ss:$16 sps:$4 sm:$0xff]  }
 0x3dd   :  { %v1756_v13 = vpop.f32.mrb[94].mxu1  ;;  %v2109_v50 = vpop.f32.mrb[142].mxu0  ;;  %v1755_v21 = vadd.f32 %v1754_v7, %v8471_v23  ;;  %v2108_v14 = vadd.f32 %v2107_v28, %v8475_v51  ;;  %5656 = vmatpush1.bf16.msra.mxu1 %v7332_v30 }
 0x3de   :  { %v1758_v18 = vpop.f32.mrb[95].mxu1  ;;  %v2111_v63 = vpop.f32.mrb[143].mxu0  ;;  %v1757_v19 = vadd.f32 %v1756_v13, %v8462_v32  ;;  %v2110_v40 = vadd.f32 %v2109_v50, %v8466_v42  ;;  %v3232_v1 = vmax.f32 %v1753_v29, 0.0  ;;  %v3234_v44 = vmax.f32 %v2106_v54, 0.0  ;;  %v7337_v13 = vld [vmem:[#allocation4 + $0x10c] ss:$16 sps:$4 sm:$0xff]  }
 0x3df   :  { %v1759_v62 = vadd.f32 %v1758_v18, %v8471_v23  ;;  %v2112_v49 = vadd.f32 %v2111_v63, %v8475_v51  ;;  %v3233_v20 = vmax.f32 %v1755_v21, 0.0  ;;  %v3235_v61 = vmax.f32 %v2108_v14, 0.0  ;;  %5819 = vmatprep.subr.bf16.mxu0 %v7337_v13 }
 0x3e0   :  { %2407 = vmatmul.mubr.bf16.gmra.mrb[200].mxu1 %v8304_v5  ;;  %2760 = vmatmul.mubr.bf16.gmra.mrb[248].mxu0 %v8304_v5  ;;  %v3240_v59 = vmax.f32 %v1757_v19, 0.0  ;;  %v3242_v9 = vmax.f32 %v2110_v40, 0.0  ;;  %v3769_v16 = vmax.f32 %v3768_v55, %v3232_v1  ;;  %v3843_v38 = vmax.f32 %v3842_v22, %v3234_v44  ;;  %v7335_v5 = vld [vmem:[#allocation4 + $0x108] ss:$16 sps:$4 sm:$0xff]   ;;  %v7340_v19 = vld [vmem:[#allocation4 + $0x124] ss:$16 sps:$4 sm:$0xff]  }
 0x3e1   :  { %2416 = vmatprep.mubr.bf16.mxu1 %v9359_v39  ;;  %2769 = vmatprep.mubr.bf16.mxu0 %v9359_v39  ;;  %v3241_v60 = vmax.f32 %v1759_v62, 0.0  ;;  %v3243_v31 = vmax.f32 %v2112_v49, 0.0  ;;  %v3806_v43 = vmax.f32 %v3805_v27, %v3233_v20  ;;  %v3880_v7 = vmax.f32 %v3879_v12, %v3235_v61  ;;  %v7343_v20 = vld [vmem:[#allocation4 + $0x12c] ss:$16 sps:$4 sm:$0xff]  }
 0x3e2   :  { %v3770_v50 = vmax.f32 %v3769_v16, %v3240_v59  ;;  %v3844_v29 = vmax.f32 %v3843_v38, %v3242_v9  ;;  %5820 = vmatpush1.bf16.msra.mxu0 %v7335_v5  ;;  %v7338_v16 = vld [vmem:[#allocation4 + $0x120] ss:$16 sps:$4 sm:$0xff]   ;;  %5657 = vmatprep.subr.bf16.mxu1 %v7340_v19  ;;  %v7341_v38 = vld [vmem:[#allocation4 + $0x128] ss:$16 sps:$4 sm:$0xff]   ;;  %v7346_v5 = vld [vmem:[#allocation4 + $0x144] ss:$16 sps:$4 sm:$0xff]  }
 0x3e3   :  { %v1762_v28 = vpop.f32.mrb[96].mxu1  ;;  %v2115_v52 = vpop.f32.mrb[144].mxu0  ;;  %v3807_v63 = vmax.f32 %v3806_v43, %v3241_v60  ;;  %v3881_v0 = vmax.f32 %v3880_v7, %v3243_v31  ;;  %5821 = vmatprep.subr.bf16.mxu0 %v7343_v20  ;;  %5658 = vmatpush1.bf16.msra.mxu1 %v7338_v16 }
 0x3e4   :  { %v1763_v54 = vadd.f32 %v1762_v28, %v8462_v32  ;;  %v2116_v18 = vadd.f32 %v2115_v52, %v8466_v42  ;;  %v1764_v55 = vpop.f32.mrb[97].mxu1  ;;  %v2117_v22 = vpop.f32.mrb[145].mxu0  ;;  %5659 = vmatprep.subr.bf16.mxu1 %v7346_v5 }
 0x3e5   :  { %v1765_v27 = vadd.f32 %v1764_v55, %v8471_v23  ;;  %v2118_v12 = vadd.f32 %v2117_v22, %v8475_v51  ;;  %v1766_v21 = vpop.f32.mrb[98].mxu1  ;;  %v2119_v14 = vpop.f32.mrb[146].mxu0 }
 0x3e6   :  { %v3248_v40 = vmax.f32 %v1763_v54, 0.0  ;;  %v3250_v15 = vmax.f32 %v2116_v18, 0.0  ;;  %v1767_v1 = vadd.f32 %v1766_v21, %v8462_v32  ;;  %v2120_v44 = vadd.f32 %v2119_v14, %v8466_v42  ;;  %v1768_v62 = vpop.f32.mrb[99].mxu1  ;;  %v2121_v49 = vpop.f32.mrb[147].mxu0  ;;  %v7349_v54 = vld [vmem:[#allocation4 + $0x14c] ss:$16 sps:$4 sm:$0xff]   ;;  %5822 = vmatpush1.bf16.msra.mxu0 %v7341_v38 }
 0x3e7   :  { %v3249_v61 = vmax.f32 %v1765_v27, 0.0  ;;  %v3251_v59 = vmax.f32 %v2118_v12, 0.0  ;;  %v1769_v9 = vadd.f32 %v1768_v62, %v8471_v23  ;;  %v2122_v26 = vadd.f32 %v2121_v49, %v8475_v51  ;;  %5823 = vmatprep.subr.bf16.mxu0 %v7349_v54 }
 0x3e8   :  { %v3771_v60 = vmax.f32 %v3770_v50, %v3248_v40  ;;  %v3845_v31 = vmax.f32 %v3844_v29, %v3250_v15  ;;  %v3256_v30 = vmax.f32 %v1767_v1, 0.0  ;;  %v3258_v43 = vmax.f32 %v2120_v44, 0.0  ;;  %2417 = vmatmul.mubr.bf16.gmra.mrb[204].mxu1 %v8302_v4  ;;  %2770 = vmatmul.mubr.bf16.gmra.mrb[252].mxu0 %v8302_v4  ;;  %v7344_v4 = vld [vmem:[#allocation4 + $0x140] ss:$16 sps:$4 sm:$0xff]   ;;  %v7352_v44 = vld [vmem:[#allocation4 + $0x164] ss:$16 sps:$4 sm:$0xff]  }
 0x3e9   :  { %v3808_v7 = vmax.f32 %v3807_v63, %v3249_v61  ;;  %v3882_v28 = vmax.f32 %v3881_v0, %v3251_v59  ;;  %v3257_v52 = vmax.f32 %v1769_v9, 0.0  ;;  %v3259_v13 = vmax.f32 %v2122_v26, 0.0  ;;  %2426 = vmatprep.mubr.bf16.mxu1 %v9359_v39  ;;  %2779 = vmatprep.mubr.bf16.mxu0 %v9359_v39  ;;  %v7347_v63 = vld [vmem:[#allocation4 + $0x148] ss:$16 sps:$4 sm:$0xff]   ;;  %v7355_v26 = vld [vmem:[#allocation4 + $0x16c] ss:$16 sps:$4 sm:$0xff]  }
 0x3ea   :  { %v3772_v18 = vmax.f32 %v3771_v60, %v3256_v30  ;;  %v3846_v55 = vmax.f32 %v3845_v31, %v3258_v43  ;;  %5660 = vmatpush1.bf16.msra.mxu1 %v7344_v4  ;;  %5824 = vmatpush1.bf16.msra.mxu0 %v7347_v63  ;;  %v7350_v30 = vld [vmem:[#allocation4 + $0x160] ss:$16 sps:$4 sm:$0xff]   ;;  %v7353_v43 = vld [vmem:[#allocation4 + $0x168] ss:$16 sps:$4 sm:$0xff]   ;;  %v7358_v4 = vld [vmem:[#allocation4 + $0x184] ss:$16 sps:$4 sm:$0xff]  }
 0x3eb   :  { %v3809_v50 = vmax.f32 %v3808_v7, %v3257_v52  ;;  %v3883_v29 = vmax.f32 %v3882_v28, %v3259_v13  ;;  %v1772_v22 = vpop.f32.mrb[100].mxu1  ;;  %v2125_v27 = vpop.f32.mrb[148].mxu0  ;;  %v7361_v63 = vld [vmem:[#allocation4 + $0x18c] ss:$16 sps:$4 sm:$0xff]   ;;  %5661 = vmatprep.subr.bf16.mxu1 %v7352_v44  ;;  %5825 = vmatprep.subr.bf16.mxu0 %v7355_v26 }
 0x3ec   :  { %v1773_v0 = vadd.f32 %v1772_v22, %v8462_v32  ;;  %v2126_v12 = vadd.f32 %v2125_v27, %v8466_v42  ;;  %v1774_v21 = vpop.f32.mrb[101].mxu1  ;;  %v2127_v14 = vpop.f32.mrb[149].mxu0 }
 0x3ed   :  { %v1775_v19 = vadd.f32 %v1774_v21, %v8471_v23  ;;  %v2128_v40 = vadd.f32 %v2127_v14, %v8475_v51  ;;  %v1776_v15 = vpop.f32.mrb[102].mxu1  ;;  %v2129_v1 = vpop.f32.mrb[150].mxu0 }
 0x3ee   :  { %v3264_v62 = vmax.f32 %v1773_v0, 0.0  ;;  %v3266_v49 = vmax.f32 %v2126_v12, 0.0  ;;  %v1777_v20 = vadd.f32 %v1776_v15, %v8462_v32  ;;  %v2130_v61 = vadd.f32 %v2129_v1, %v8466_v42  ;;  %v1778_v59 = vpop.f32.mrb[103].mxu1  ;;  %v2131_v9 = vpop.f32.mrb[151].mxu0  ;;  %5662 = vmatpush1.bf16.msra.mxu1 %v7350_v30  ;;  %5826 = vmatpush1.bf16.msra.mxu0 %v7353_v43 }
 0x3ef   :  { %v3265_v16 = vmax.f32 %v1775_v19, 0.0  ;;  %v3267_v38 = vmax.f32 %v2128_v40, 0.0  ;;  %v1779_v60 = vadd.f32 %v1778_v59, %v8471_v23  ;;  %v2132_v31 = vadd.f32 %v2131_v9, %v8475_v51  ;;  %5663 = vmatprep.subr.bf16.mxu1 %v7358_v4  ;;  %5827 = vmatprep.subr.bf16.mxu0 %v7361_v63 }
 0x3f0   :  { %v3773_v7 = vmax.f32 %v3772_v18, %v3264_v62  ;;  %v3847_v28 = vmax.f32 %v3846_v55, %v3266_v49  ;;  %v3272_v52 = vmax.f32 %v1777_v20, 0.0  ;;  %v3274_v13 = vmax.f32 %v2130_v61, 0.0  ;;  %2427 = vmatmul.mubr.bf16.gmra.mrb[208].mxu1 %v8316_v25  ;;  %2780 = vmatmul.mubr.bf16.gmra.mrb[0].mxu0 %v8316_v25  ;;  %v7356_v25 = vld [vmem:[#allocation4 + $0x180] ss:$16 sps:$4 sm:$0xff]   ;;  %v7364_v20 = vld [vmem:[#allocation4 + $0x1a4] ss:$16 sps:$4 sm:$0xff]  }
 0x3f1   :  { %v3810_v5 = vmax.f32 %v3809_v50, %v3265_v16  ;;  %v3884_v54 = vmax.f32 %v3883_v29, %v3267_v38  ;;  %v3273_v22 = vmax.f32 %v1779_v60, 0.0  ;;  %v3275_v27 = vmax.f32 %v2132_v31, 0.0  ;;  %2436 = vmatprep.mubr.bf16.mxu1 %v9359_v39  ;;  %2789 = vmatprep.mubr.bf16.mxu0 %v9359_v39  ;;  %v7359_v50 = vld [vmem:[#allocation4 + $0x188] ss:$16 sps:$4 sm:$0xff]   ;;  %v7367_v60 = vld [vmem:[#allocation4 + $0x1ac] ss:$16 sps:$4 sm:$0xff]  }
 0x3f2   :  { %v3774_v0 = vmax.f32 %v3773_v7, %v3272_v52  ;;  %v3848_v12 = vmax.f32 %v3847_v28, %v3274_v13  ;;  %5664 = vmatpush1.bf16.msra.mxu1 %v7356_v25  ;;  %5828 = vmatpush1.bf16.msra.mxu0 %v7359_v50  ;;  %v7362_v28 = vld [vmem:[#allocation4 + $0x1a0] ss:$16 sps:$4 sm:$0xff]   ;;  %v7365_v52 = vld [vmem:[#allocation4 + $0x1a8] ss:$16 sps:$4 sm:$0xff]   ;;  %v7373_v25 = vld [vmem:[#allocation4 + $0x1cc] ss:$16 sps:$4 sm:$0xff]  }
 0x3f3   :  { %v3811_v18 = vmax.f32 %v3810_v5, %v3273_v22  ;;  %v3885_v55 = vmax.f32 %v3884_v54, %v3275_v27  ;;  %v1782_v21 = vpop.f32.mrb[104].mxu1  ;;  %v2135_v14 = vpop.f32.mrb[152].mxu0  ;;  %5665 = vmatprep.subr.bf16.mxu1 %v7364_v20  ;;  %5829 = vmatprep.subr.bf16.mxu0 %v7367_v60 }
 0x3f4   :  { %v1783_v29 = vadd.f32 %v1782_v21, %v8462_v32  ;;  %v2136_v19 = vadd.f32 %v2135_v14, %v8466_v42  ;;  %v1784_v40 = vpop.f32.mrb[105].mxu1  ;;  %v2137_v15 = vpop.f32.mrb[153].mxu0  ;;  %v7370_v14 = vld [vmem:[#allocation4 + $0x1c4] ss:$16 sps:$4 sm:$0xff]  }
 0x3f5   :  { %v1785_v1 = vadd.f32 %v1784_v40, %v8471_v23  ;;  %v2138_v44 = vadd.f32 %v2137_v15, %v8475_v51  ;;  %v1786_v62 = vpop.f32.mrb[106].mxu1  ;;  %v2139_v49 = vpop.f32.mrb[154].mxu0 }
 0x3f6   :  { %v3280_v61 = vmax.f32 %v1783_v29, 0.0  ;;  %v3282_v59 = vmax.f32 %v2136_v19, 0.0  ;;  %v1787_v9 = vadd.f32 %v1786_v62, %v8462_v32  ;;  %v2140_v26 = vadd.f32 %v2139_v49, %v8466_v42  ;;  %v1788_v16 = vpop.f32.mrb[107].mxu1  ;;  %v2141_v38 = vpop.f32.mrb[155].mxu0  ;;  %5666 = vmatpush1.bf16.msra.mxu1 %v7362_v28  ;;  %5830 = vmatpush1.bf16.msra.mxu0 %v7365_v52 }
 0x3f7   :  { %v3281_v31 = vmax.f32 %v1785_v1, 0.0  ;;  %v3283_v30 = vmax.f32 %v2138_v44, 0.0  ;;  %v1789_v43 = vadd.f32 %v1788_v16, %v8471_v23  ;;  %v2142_v7 = vadd.f32 %v2141_v38, %v8475_v51  ;;  %5667 = vmatprep.subr.bf16.mxu1 %v7370_v14  ;;  %5831 = vmatprep.subr.bf16.mxu0 %v7373_v25  ;;  %v7377_v14 = vld [vmem:[#allocation4 + $0x1e8] ss:$16 sps:$4 sm:$0xff]   ;;  %v7379_v25 = vld [vmem:[#allocation4 + $0x1ec] ss:$16 sps:$4 sm:$0xff]  }
 0x3f8   :  { %v3775_v13 = vmax.f32 %v3774_v0, %v3280_v61  ;;  %v3849_v5 = vmax.f32 %v3848_v12, %v3282_v59  ;;  %v3288_v54 = vmax.f32 %v1787_v9, 0.0  ;;  %v3290_v22 = vmax.f32 %v2140_v26, 0.0  ;;  %2437 = vmatmul.mubr.bf16.gmra.mrb[212].mxu1 %v8314_v24  ;;  %2790 = vmatmul.mubr.bf16.gmra.mrb[4].mxu0 %v8314_v24  ;;  %v7368_v24 = vld [vmem:[#allocation4 + $0x1c0] ss:$16 sps:$4 sm:$0xff]  }
 0x3f9   :  { %v3812_v27 = vmax.f32 %v3811_v18, %v3281_v31  ;;  %v3886_v4 = vmax.f32 %v3885_v55, %v3283_v30  ;;  %v3289_v63 = vmax.f32 %v1789_v43, 0.0  ;;  %v3291_v21 = vmax.f32 %v2142_v7, 0.0  ;;  %2446 = vmatprep.mubr.bf16.mxu1 %v9359_v39  ;;  %2799 = vmatprep.mubr.bf16.mxu0 %v9359_v39  ;;  %v7371_v18 = vld [vmem:[#allocation4 + $0x1c8] ss:$16 sps:$4 sm:$0xff]  }
 0x3fa   :  { %v3776_v50 = vmax.f32 %v3775_v13, %v3288_v54  ;;  %v3850_v29 = vmax.f32 %v3849_v5, %v3290_v22  ;;  %5668 = vmatpush1.bf16.msra.mxu1 %v7368_v24  ;;  %5832 = vmatpush1.bf16.msra.mxu0 %v7371_v18  ;;  %v7374_v54 = vld [vmem:[#allocation4 + $0x1e0] ss:$16 sps:$4 sm:$0xff]   ;;  %v7376_v22 = vld [vmem:[#allocation4 + $0x1e4] ss:$16 sps:$4 sm:$0xff]  }
 0x3fb   :  { %v3813_v0 = vmax.f32 %v3812_v27, %v3289_v63  ;;  %v3887_v12 = vmax.f32 %v3886_v4, %v3291_v21  ;;  %v1792_v19 = vpop.f32.mrb[108].mxu1  ;;  %v2145_v40 = vpop.f32.mrb[156].mxu0  ;;  %5669 = vmatprep.subr.bf16.mxu1 %v7376_v22  ;;  %5833 = vmatprep.subr.bf16.mxu0 %v7379_v25 }
 0x3fc   :  { %v1793_v55 = vadd.f32 %v1792_v19, %v8462_v32  ;;  %v2146_v15 = vadd.f32 %v2145_v40, %v8466_v42  ;;  %v1794_v1 = vpop.f32.mrb[109].mxu1  ;;  %v2147_v44 = vpop.f32.mrb[157].mxu0 }
 0x3fd   :  { %v1795_v62 = vadd.f32 %v1794_v1, %v8471_v23  ;;  %v2148_v49 = vadd.f32 %v2147_v44, %v8475_v51  ;;  %v1796_v20 = vpop.f32.mrb[110].mxu1  ;;  %v2149_v61 = vpop.f32.mrb[158].mxu0  ;;  %v7385_v1 = vld [vmem:[#allocation4 + $0x20c] ss:$16 sps:$4 sm:$0xff]  }
 0x3fe   :  { %v3296_v59 = vmax.f32 %v1793_v55, 0.0  ;;  %v3298_v9 = vmax.f32 %v2146_v15, 0.0  ;;  %v1797_v26 = vadd.f32 %v1796_v20, %v8462_v32  ;;  %v2150_v16 = vadd.f32 %v2149_v61, %v8466_v42  ;;  %v1798_v38 = vpop.f32.mrb[111].mxu1  ;;  %v2151_v60 = vpop.f32.mrb[159].mxu0  ;;  %5670 = vmatpush1.bf16.msra.mxu1 %v7374_v54  ;;  %5834 = vmatpush1.bf16.msra.mxu0 %v7377_v14 }
 0x3ff   :  { %v3297_v31 = vmax.f32 %v1795_v62, 0.0  ;;  %v3299_v30 = vmax.f32 %v2148_v49, 0.0  ;;  %v1799_v43 = vadd.f32 %v1798_v38, %v8471_v23  ;;  %v2152_v7 = vadd.f32 %v2151_v60, %v8475_v51  ;;  %5844 = vmatprep.subr.bf16.mxu0 %v7385_v1 }
 0x400   :  { %v3777_v28 = vmax.f32 %v3776_v50, %v3296_v59  ;;  %v3851_v52 = vmax.f32 %v3850_v29, %v3298_v9  ;;  %v3304_v13 = vmax.f32 %v1797_v26, 0.0  ;;  %v3306_v5 = vmax.f32 %v2150_v16, 0.0  ;;  %2447 = vmatmul.mubr.bf16.gmra.mrb[216].mxu1 %v8328_v46  ;;  %2800 = vmatmul.mubr.bf16.gmra.mrb[8].mxu0 %v8328_v46  ;;  %v7382_v46 = vld [vmem:[#allocation4 + $0x204] ss:$16 sps:$4 sm:$0xff]  }
 0x401   :  { %v3814_v27 = vmax.f32 %v3813_v0, %v3297_v31  ;;  %v3888_v4 = vmax.f32 %v3887_v12, %v3299_v30  ;;  %v3305_v63 = vmax.f32 %v1799_v43, 0.0  ;;  %v3307_v21 = vmax.f32 %v2152_v7, 0.0  ;;  %2456 = vmatprep.mubr.bf16.mxu1 %v9359_v39  ;;  %2809 = vmatprep.mubr.bf16.mxu0 %v9359_v39 }
 0x402   :  { %v3778_v50 = vmax.f32 %v3777_v28, %v3304_v13  ;;  %v3852_v29 = vmax.f32 %v3851_v52, %v3306_v5  ;;  %5680 = vmatprep.subr.bf16.mxu1 %v7382_v46 }
 0x403   :  { %v3815_v19 = vmax.f32 %v3814_v27, %v3305_v63  ;;  %v3889_v40 = vmax.f32 %v3888_v4, %v3307_v21  ;;  %v1802_v24 = vpop.f32.mrb[112].mxu1  ;;  %v2155_v18 = vpop.f32.mrb[160].mxu0 }
 0x404   :  { %v1803_v0 = vadd.f32 %v1802_v24, %v8462_v32  ;;  %v2156_v12 = vadd.f32 %v2155_v18, %v8466_v42  ;;  %v1804_v55 = vpop.f32.mrb[113].mxu1  ;;  %v2157_v15 = vpop.f32.mrb[161].mxu0 }
 0x405   :  { %v1805_v44 = vadd.f32 %v1804_v55, %v8471_v23  ;;  %v2158_v62 = vadd.f32 %v2157_v15, %v8475_v51  ;;  %v1806_v49 = vpop.f32.mrb[114].mxu1  ;;  %v2159_v20 = vpop.f32.mrb[162].mxu0 }
 0x406   :  { %v3312_v61 = vmax.f32 %v1803_v0, 0.0  ;;  %v3314_v59 = vmax.f32 %v2156_v12, 0.0  ;;  %v1807_v9 = vadd.f32 %v1806_v49, %v8462_v32  ;;  %v2160_v26 = vadd.f32 %v2159_v20, %v8466_v42  ;;  %v1808_v16 = vpop.f32.mrb[115].mxu1  ;;  %v2161_v38 = vpop.f32.mrb[163].mxu0 }
 0x407   :  { %v3313_v60 = vmax.f32 %v1805_v44, 0.0  ;;  %v3315_v31 = vmax.f32 %v2158_v62, 0.0  ;;  %v1809_v30 = vadd.f32 %v1808_v16, %v8471_v23  ;;  %v2162_v43 = vadd.f32 %v2161_v38, %v8475_v51 }
 0x408   :  { %v3779_v7 = vmax.f32 %v3778_v50, %v3312_v61  ;;  %v3853_v28 = vmax.f32 %v3852_v29, %v3314_v59  ;;  %v3320_v52 = vmax.f32 %v1807_v9, 0.0  ;;  %v3322_v13 = vmax.f32 %v2160_v26, 0.0  ;;  %2457 = vmatmul.mubr.bf16.gmra.mrb[220].mxu1 %v8326_v45  ;;  %2810 = vmatmul.mubr.bf16.gmra.mrb[12].mxu0 %v8326_v45 }
 0x409   :  { %v3816_v5 = vmax.f32 %v3815_v19, %v3313_v60  ;;  %v3890_v54 = vmax.f32 %v3889_v40, %v3315_v31  ;;  %v3321_v22 = vmax.f32 %v1809_v30, 0.0  ;;  %v3323_v27 = vmax.f32 %v2162_v43, 0.0  ;;  %2466 = vmatprep.mubr.bf16.mxu1 %v9359_v39  ;;  %2819 = vmatprep.mubr.bf16.mxu0 %v9359_v39 }
 0x40a   :  { %v3780_v4 = vmax.f32 %v3779_v7, %v3320_v52  ;;  %v3854_v63 = vmax.f32 %v3853_v28, %v3322_v13 }
 0x40b   :  { %v3817_v21 = vmax.f32 %v3816_v5, %v3321_v22  ;;  %v3891_v14 = vmax.f32 %v3890_v54, %v3323_v27  ;;  %v1812_v25 = vpop.f32.mrb[116].mxu1  ;;  %v2165_v50 = vpop.f32.mrb[164].mxu0 }
 0x40c   :  { %v1813_v29 = vadd.f32 %v1812_v25, %v8462_v32  ;;  %v2166_v24 = vadd.f32 %v2165_v50, %v8466_v42  ;;  %v1814_v18 = vpop.f32.mrb[117].mxu1  ;;  %v2167_v45 = vpop.f32.mrb[165].mxu0 }
 0x40d   :  { %v1815_v19 = vadd.f32 %v1814_v18, %v8471_v23  ;;  %v2168_v40 = vadd.f32 %v2167_v45, %v8475_v51  ;;  %v1816_v46 = vpop.f32.mrb[118].mxu1  ;;  %v2169_v0 = vpop.f32.mrb[166].mxu0 }
 0x40e   :  { %v3328_v12 = vmax.f32 %v1813_v29, 0.0  ;;  %v3330_v55 = vmax.f32 %v2166_v24, 0.0  ;;  %v1817_v15 = vadd.f32 %v1816_v46, %v8462_v32  ;;  %v2170_v1 = vadd.f32 %v2169_v0, %v8466_v42  ;;  %v1818_v44 = vpop.f32.mrb[119].mxu1  ;;  %v2171_v62 = vpop.f32.mrb[167].mxu0 }
 0x40f   :  { %v3329_v49 = vmax.f32 %v1815_v19, 0.0  ;;  %v3331_v20 = vmax.f32 %v2168_v40, 0.0  ;;  %v1819_v61 = vadd.f32 %v1818_v44, %v8471_v23  ;;  %v2172_v59 = vadd.f32 %v2171_v62, %v8475_v51 }
 0x410   :  { %v3781_v9 = vmax.f32 %v3780_v4, %v3328_v12  ;;  %v3855_v26 = vmax.f32 %v3854_v63, %v3330_v55  ;;  %v3336_v16 = vmax.f32 %v1817_v15, 0.0  ;;  %v3338_v38 = vmax.f32 %v2170_v1, 0.0  ;;  %2467 = vmatmul.mubr.bf16.gmra.mrb[224].mxu1 %v8340_v57  ;;  %2820 = vmatmul.mubr.bf16.gmra.mrb[16].mxu0 %v8340_v57 }
 0x411   :  { %v3818_v60 = vmax.f32 %v3817_v21, %v3329_v49  ;;  %v3892_v31 = vmax.f32 %v3891_v14, %v3331_v20  ;;  %v3337_v30 = vmax.f32 %v1819_v61, 0.0  ;;  %v3339_v43 = vmax.f32 %v2172_v59, 0.0  ;;  %2476 = vmatprep.mubr.bf16.mxu1 %v9359_v39  ;;  %2829 = vmatprep.mubr.bf16.mxu0 %v9359_v39 }
 0x412   :  { %v3782_v7 = vmax.f32 %v3781_v9, %v3336_v16  ;;  %v3856_v28 = vmax.f32 %v3855_v26, %v3338_v38 }
 0x413   :  { %v3819_v52 = vmax.f32 %v3818_v60, %v3337_v30  ;;  %v3893_v13 = vmax.f32 %v3892_v31, %v3339_v43  ;;  %v1822_v5 = vpop.f32.mrb[120].mxu1  ;;  %v2175_v54 = vpop.f32.mrb[168].mxu0 }
 0x414   :  { %v1823_v22 = vadd.f32 %v1822_v5, %v8462_v32  ;;  %v2176_v27 = vadd.f32 %v2175_v54, %v8466_v42  ;;  %v1824_v4 = vpop.f32.mrb[121].mxu1  ;;  %v2177_v57 = vpop.f32.mrb[169].mxu0 }
 0x415   :  { %v1825_v63 = vadd.f32 %v1824_v4, %v8471_v23  ;;  %v2178_v21 = vadd.f32 %v2177_v57, %v8475_v51  ;;  %v1826_v14 = vpop.f32.mrb[122].mxu1  ;;  %v2179_v25 = vpop.f32.mrb[170].mxu0 }
 0x416   :  { %v3344_v50 = vmax.f32 %v1823_v22, 0.0  ;;  %v3346_v29 = vmax.f32 %v2176_v27, 0.0  ;;  %v1827_v24 = vadd.f32 %v1826_v14, %v8462_v32  ;;  %v2180_v18 = vadd.f32 %v2179_v25, %v8466_v42  ;;  %v1828_v45 = vpop.f32.mrb[123].mxu1  ;;  %v2181_v19 = vpop.f32.mrb[171].mxu0 }
 0x417   :  { %v3345_v40 = vmax.f32 %v1825_v63, 0.0  ;;  %v3347_v46 = vmax.f32 %v2178_v21, 0.0  ;;  %v1829_v0 = vadd.f32 %v1828_v45, %v8471_v23  ;;  %v2182_v12 = vadd.f32 %v2181_v19, %v8475_v51 }
 0x418   :  { %v3783_v55 = vmax.f32 %v3782_v7, %v3344_v50  ;;  %v3857_v15 = vmax.f32 %v3856_v28, %v3346_v29  ;;  %v3352_v1 = vmax.f32 %v1827_v24, 0.0  ;;  %v3354_v44 = vmax.f32 %v2180_v18, 0.0  ;;  %2477 = vmatmul.mubr.bf16.gmra.mrb[228].mxu1 %v8338_v56  ;;  %2830 = vmatmul.mubr.bf16.gmra.mrb[20].mxu0 %v8338_v56 }
 0x419   :  { %v3820_v62 = vmax.f32 %v3819_v52, %v3345_v40  ;;  %v3894_v49 = vmax.f32 %v3893_v13, %v3347_v46  ;;  %v3353_v20 = vmax.f32 %v1829_v0, 0.0  ;;  %v3355_v61 = vmax.f32 %v2182_v12, 0.0  ;;  %2486 = vmatprep.mubr.bf16.mxu1 %v9359_v39  ;;  %2839 = vmatprep.mubr.bf16.mxu0 %v9359_v39 }
 0x41a   :  { %v3784_v59 = vmax.f32 %v3783_v55, %v3352_v1  ;;  %v3858_v9 = vmax.f32 %v3857_v15, %v3354_v44 }
 0x41b   :  { %v3821_v26 = vmax.f32 %v3820_v62, %v3353_v20  ;;  %v3895_v16 = vmax.f32 %v3894_v49, %v3355_v61  ;;  %v1832_v38 = vpop.f32.mrb[124].mxu1  ;;  %v2185_v60 = vpop.f32.mrb[172].mxu0 }
 0x41c   :  { %v1833_v31 = vadd.f32 %v1832_v38, %v8462_v32  ;;  %v2186_v30 = vadd.f32 %v2185_v60, %v8466_v42  ;;  %v1834_v43 = vpop.f32.mrb[125].mxu1  ;;  %v2187_v56 = vpop.f32.mrb[173].mxu0 }
 0x41d   :  { %v1835_v7 = vadd.f32 %v1834_v43, %v8471_v23  ;;  %v2188_v28 = vadd.f32 %v2187_v56, %v8475_v51  ;;  %v1836_v52 = vpop.f32.mrb[126].mxu1  ;;  %v2189_v13 = vpop.f32.mrb[174].mxu0 }
 0x41e   :  { %v3360_v5 = vmax.f32 %v1833_v31, 0.0  ;;  %v3362_v54 = vmax.f32 %v2186_v30, 0.0  ;;  %v1837_v22 = vadd.f32 %v1836_v52, %v8462_v32  ;;  %v2190_v27 = vadd.f32 %v2189_v13, %v8466_v42  ;;  %v1838_v4 = vpop.f32.mrb[127].mxu1  ;;  %v2191_v57 = vpop.f32.mrb[175].mxu0 }
 0x41f   :  { %v3361_v63 = vmax.f32 %v1835_v7, 0.0  ;;  %v3363_v21 = vmax.f32 %v2188_v28, 0.0  ;;  %v1839_v14 = vadd.f32 %v1838_v4, %v8471_v23  ;;  %v2192_v25 = vadd.f32 %v2191_v57, %v8475_v51 }
 0x420   :  { %v3785_v50 = vmax.f32 %v3784_v59, %v3360_v5  ;;  %v3859_v29 = vmax.f32 %v3858_v9, %v3362_v54  ;;  %v3368_v24 = vmax.f32 %v1837_v22, 0.0  ;;  %v3370_v18 = vmax.f32 %v2190_v27, 0.0  ;;  %2487 = vmatmul.mubr.bf16.gmra.mrb[232].mxu1 %v8352_v34  ;;  %2840 = vmatmul.mubr.bf16.gmra.mrb[24].mxu0 %v8352_v34 }
 0x421   :  { %v3822_v45 = vmax.f32 %v3821_v26, %v3361_v63  ;;  %v3896_v19 = vmax.f32 %v3895_v16, %v3363_v21  ;;  %v3369_v40 = vmax.f32 %v1839_v14, 0.0  ;;  %v3371_v46 = vmax.f32 %v2192_v25, 0.0  ;;  %2496 = vmatprep.mubr.bf16.mxu1 %v9359_v39  ;;  %2849 = vmatprep.mubr.bf16.mxu0 %v9359_v39 }
 0x422   :  { %v3786_v0 = vmax.f32 %v3785_v50, %v3368_v24  ;;  %v3860_v12 = vmax.f32 %v3859_v29, %v3370_v18  ;;  %v3503_v18 = vrot.slane %v8669_v58, 4 }
 0x423   :  { %v3823_v55 = vmax.f32 %v3822_v45, %v3369_v40  ;;  %v3897_v15 = vmax.f32 %v3896_v19, %v3371_v46  ;;  %v1842_v1 = vpop.f32.mrb[128].mxu1  ;;  %v2195_v44 = vpop.f32.mrb[176].mxu0  ;;  %v3577_v45 = vrot.slane %v8671_v8, 4 }
 0x424   :  { %v1843_v62 = vadd.f32 %v1842_v1, %v8462_v32  ;;  %v2196_v49 = vadd.f32 %v2195_v44, %v8466_v42  ;;  %v1844_v20 = vpop.f32.mrb[129].mxu1  ;;  %v2197_v34 = vpop.f32.mrb[177].mxu0 }
 0x425   :  { %v1845_v61 = vadd.f32 %v1844_v20, %v8471_v23  ;;  %v2198_v59 = vadd.f32 %v2197_v34, %v8475_v51  ;;  %v1846_v9 = vpop.f32.mrb[130].mxu1  ;;  %v2199_v26 = vpop.f32.mrb[178].mxu0 }
 0x426   :  { %v3376_v16 = vmax.f32 %v1843_v62, 0.0  ;;  %v3378_v38 = vmax.f32 %v2196_v49, 0.0  ;;  %v1847_v60 = vadd.f32 %v1846_v9, %v8462_v32  ;;  %v2200_v31 = vadd.f32 %v2199_v26, %v8466_v42  ;;  %v1848_v30 = vpop.f32.mrb[131].mxu1  ;;  %v2201_v43 = vpop.f32.mrb[179].mxu0 }
 0x427   :  { %v3377_v56 = vmax.f32 %v1845_v61, 0.0  ;;  %v3379_v7 = vmax.f32 %v2198_v59, 0.0  ;;  %v1849_v28 = vadd.f32 %v1848_v30, %v8471_v23  ;;  %v2202_v52 = vadd.f32 %v2201_v43, %v8475_v51 }
 0x428   :  { %v3787_v13 = vmax.f32 %v3786_v0, %v3376_v16  ;;  %v3861_v5 = vmax.f32 %v3860_v12, %v3378_v38  ;;  %v3384_v54 = vmax.f32 %v1847_v60, 0.0  ;;  %v3386_v22 = vmax.f32 %v2200_v31, 0.0  ;;  %2497 = vmatmul.mubr.bf16.gmra.mrb[236].mxu1 %v8350_v33  ;;  %2850 = vmatmul.mubr.bf16.gmra.mrb[28].mxu0 %v8350_v33 }
 0x429   :  { %v3824_v27 = vmax.f32 %v3823_v55, %v3377_v56  ;;  %v3898_v4 = vmax.f32 %v3897_v15, %v3379_v7  ;;  %v3385_v57 = vmax.f32 %v1849_v28, 0.0  ;;  %v3387_v63 = vmax.f32 %v2202_v52, 0.0  ;;  %2506 = vmatprep.mubr.bf16.mxu1 %v9359_v39  ;;  %2859 = vmatprep.mubr.bf16.mxu0 %v9359_v39 }
 0x42a   :  { %v3788_v21 = vmax.f32 %v3787_v13, %v3384_v54  ;;  %v3862_v14 = vmax.f32 %v3861_v5, %v3386_v22  ;;  %v3540_v0 = vrot.slane %v8673_v53, 4  ;;  %v3614_v12 = vrot.slane %v8675_v41, 4 }
 0x42b   :  { %v3825_v25 = vmax.f32 %v3824_v27, %v3385_v57  ;;  %v3899_v50 = vmax.f32 %v3898_v4, %v3387_v63  ;;  %v1852_v29 = vpop.f32.mrb[132].mxu1  ;;  %v2205_v24 = vpop.f32.mrb[180].mxu0  ;;  %v8826_v57 = vmax.f32 %v8669_v58, %v3503_v18  ;;  %v8829_v63 = vmax.f32 %v8671_v8, %v3577_v45 }
 0x42c   :  { %v1853_v33 = vadd.f32 %v1852_v29, %v8462_v32  ;;  %v2206_v19 = vadd.f32 %v2205_v24, %v8466_v42  ;;  %v1854_v40 = vpop.f32.mrb[133].mxu1  ;;  %v2207_v46 = vpop.f32.mrb[181].mxu0  ;;  %v8837_v29 = vmax.f32 %v8675_v41, %v3614_v12 }
 0x42d   :  { %v1855_v55 = vadd.f32 %v1854_v40, %v8471_v23  ;;  %v2208_v15 = vadd.f32 %v2207_v46, %v8475_v51  ;;  %v1856_v1 = vpop.f32.mrb[134].mxu1  ;;  %v2209_v44 = vpop.f32.mrb[182].mxu0 }
 0x42e   :  { %v3392_v62 = vmax.f32 %v1853_v33, 0.0  ;;  %v3394_v49 = vmax.f32 %v2206_v19, 0.0  ;;  %v1857_v20 = vadd.f32 %v1856_v1, %v8462_v32  ;;  %v2210_v34 = vadd.f32 %v2209_v44, %v8466_v42  ;;  %v1858_v61 = vpop.f32.mrb[135].mxu1  ;;  %v2211_v59 = vpop.f32.mrb[183].mxu0 }
 0x42f   :  { %v3393_v9 = vmax.f32 %v1855_v55, 0.0  ;;  %v3395_v26 = vmax.f32 %v2208_v15, 0.0  ;;  %v1859_v16 = vadd.f32 %v1858_v61, %v8471_v23  ;;  %v2212_v38 = vadd.f32 %v2211_v59, %v8475_v51 }
 0x430   :  { %v3789_v60 = vmax.f32 %v3788_v21, %v3392_v62  ;;  %v3863_v31 = vmax.f32 %v3862_v14, %v3394_v49  ;;  %v3400_v30 = vmax.f32 %v1857_v20, 0.0  ;;  %v3402_v43 = vmax.f32 %v2210_v34, 0.0  ;;  %2507 = vmatmul.mubr.bf16.gmra.mrb[240].mxu1 %v8364_v48  ;;  %2860 = vmatmul.mubr.bf16.gmra.mrb[32].mxu0 %v8364_v48 }
 0x431   :  { %v3826_v56 = vmax.f32 %v3825_v25, %v3393_v9  ;;  %v3900_v7 = vmax.f32 %v3899_v50, %v3395_v26  ;;  %v3401_v28 = vmax.f32 %v1859_v16, 0.0  ;;  %v3403_v52 = vmax.f32 %v2212_v38, 0.0  ;;  %2516 = vmatprep.mubr.bf16.mxu1 %v9359_v39  ;;  %2869 = vmatprep.mubr.bf16.mxu0 %v9359_v39 }
 0x432   :  { %v3790_v13 = vmax.f32 %v3789_v60, %v3400_v30  ;;  %v3864_v5 = vmax.f32 %v3863_v31, %v3402_v43  ;;  %v8834_v50 = vmax.f32 %v8673_v53, %v3540_v0  ;;  %v3505_v31 = vrot.slane %v8826_v57, 2 }
 0x433   :  { %v3827_v54 = vmax.f32 %v3826_v56, %v3401_v28  ;;  %v3901_v22 = vmax.f32 %v3900_v7, %v3403_v52  ;;  %v1862_v27 = vpop.f32.mrb[136].mxu1  ;;  %v2215_v4 = vpop.f32.mrb[184].mxu0  ;;  %v3579_v30 = vrot.slane %v8829_v63, 2  ;;  %v3616_v52 = vrot.slane %v8837_v29, 2 }
 0x434   :  { %v1863_v48 = vadd.f32 %v1862_v27, %v8462_v32  ;;  %v2216_v21 = vadd.f32 %v2215_v4, %v8466_v42  ;;  %v1864_v14 = vpop.f32.mrb[137].mxu1  ;;  %v2217_v25 = vpop.f32.mrb[185].mxu0  ;;  %v3542_v28 = vrot.slane %v8834_v50, 2 }
 0x435   :  { %v1865_v24 = vadd.f32 %v1864_v14, %v8471_v23  ;;  %v2218_v58 = vadd.f32 %v2217_v25, %v8475_v51  ;;  %v1866_v18 = vpop.f32.mrb[138].mxu1  ;;  %v2219_v33 = vpop.f32.mrb[186].mxu0 }
 0x436   :  { %v3408_v8 = vmax.f32 %v1863_v48, 0.0  ;;  %v3410_v45 = vmax.f32 %v2216_v21, 0.0  ;;  %v1867_v19 = vadd.f32 %v1866_v18, %v8462_v32  ;;  %v2220_v40 = vadd.f32 %v2219_v33, %v8466_v42  ;;  %v1868_v46 = vpop.f32.mrb[139].mxu1  ;;  %v2221_v55 = vpop.f32.mrb[187].mxu0 }
 0x437   :  { %v3409_v15 = vmax.f32 %v1865_v24, 0.0  ;;  %v3411_v53 = vmax.f32 %v2218_v58, 0.0  ;;  %v1869_v0 = vadd.f32 %v1868_v46, %v8471_v23  ;;  %v2222_v41 = vadd.f32 %v2221_v55, %v8475_v51 }
 0x438   :  { %v3791_v12 = vmax.f32 %v3790_v13, %v3408_v8  ;;  %v3865_v1 = vmax.f32 %v3864_v5, %v3410_v45  ;;  %v3416_v44 = vmax.f32 %v1867_v19, 0.0  ;;  %v3418_v62 = vmax.f32 %v2220_v40, 0.0  ;;  %2517 = vmatmul.mubr.bf16.gmra.mrb[244].mxu1 %v8362_v47  ;;  %2870 = vmatmul.mubr.bf16.gmra.mrb[36].mxu0 %v8362_v47 }
 0x439   :  { %v3828_v49 = vmax.f32 %v3827_v54, %v3409_v15  ;;  %v3902_v20 = vmax.f32 %v3901_v22, %v3411_v53  ;;  %v3417_v34 = vmax.f32 %v1869_v0, 0.0  ;;  %v3419_v61 = vmax.f32 %v2222_v41, 0.0  ;;  %2526 = vmatprep.mubr.bf16.mxu1 %v9359_v39  ;;  %2879 = vmatprep.mubr.bf16.mxu0 %v9359_v39 }
 0x43a   :  { %v3792_v59 = vmax.f32 %v3791_v12, %v3416_v44  ;;  %v3866_v9 = vmax.f32 %v3865_v1, %v3418_v62 }
 0x43b   :  { %v3829_v26 = vmax.f32 %v3828_v49, %v3417_v34  ;;  %v3903_v16 = vmax.f32 %v3902_v20, %v3419_v61  ;;  %v1872_v38 = vpop.f32.mrb[140].mxu1  ;;  %v2225_v60 = vpop.f32.mrb[188].mxu0  ;;  %v1206_v49 = vsub.s32 4, %v8444_v37  ;;  %v1214_v20 = vsub.s32 6, %v8444_v37 }
 0x43c   :  { %v1873_v47 = vadd.f32 %v1872_v38, %v8462_v32  ;;  %v2226_v43 = vadd.f32 %v2225_v60, %v8466_v42  ;;  %v1874_v56 = vpop.f32.mrb[141].mxu1  ;;  %v2227_v7 = vpop.f32.mrb[189].mxu0  ;;  %v8871_v34 = vmax.f32 %v8829_v63, %v3579_v30  ;;  %v8879_v38 = vmax.f32 %v8837_v29, %v3616_v52 }
 0x43d   :  { %v1875_v13 = vadd.f32 %v1874_v56, %v8471_v23  ;;  %v2228_v5 = vadd.f32 %v2227_v7, %v8475_v51  ;;  %v1876_v54 = vpop.f32.mrb[142].mxu1  ;;  %v2229_v22 = vpop.f32.mrb[190].mxu0 }
 0x43e   :  { %v3424_v27 = vmax.f32 %v1873_v47, 0.0  ;;  %v3426_v4 = vmax.f32 %v2226_v43, 0.0  ;;  %v1877_v48 = vadd.f32 %v1876_v54, %v8462_v32  ;;  %v2230_v21 = vadd.f32 %v2229_v22, %v8466_v42  ;;  %v1878_v14 = vpop.f32.mrb[143].mxu1  ;;  %v2231_v25 = vpop.f32.mrb[191].mxu0 }
 0x43f   :  { %v3425_v24 = vmax.f32 %v1875_v13, 0.0  ;;  %v3427_v58 = vmax.f32 %v2228_v5, 0.0  ;;  %v1879_v18 = vadd.f32 %v1878_v14, %v8471_v23  ;;  %v2232_v33 = vadd.f32 %v2231_v25, %v8475_v51 }
 0x440   :  { %v3793_v8 = vmax.f32 %v3792_v59, %v3424_v27  ;;  %v3867_v45 = vmax.f32 %v3866_v9, %v3426_v4  ;;  %v3432_v19 = vmax.f32 %v1877_v48, 0.0  ;;  %v3434_v40 = vmax.f32 %v2230_v21, 0.0  ;;  %2527 = vmatmul.mubr.bf16.gmra.mrb[248].mxu1 %v8376_v10  ;;  %2880 = vmatmul.mubr.bf16.gmra.mrb[40].mxu0 %v8376_v10 }
 0x441   :  { %v3830_v46 = vmax.f32 %v3829_v26, %v3425_v24  ;;  %v3904_v55 = vmax.f32 %v3903_v16, %v3427_v58  ;;  %v3433_v15 = vmax.f32 %v1879_v18, 0.0  ;;  %v3435_v53 = vmax.f32 %v2232_v33, 0.0  ;;  %2536 = vmatprep.mubr.bf16.mxu1 %v9359_v39  ;;  %2889 = vmatprep.mubr.bf16.mxu0 %v9359_v39 }
 0x442   :  { %v3794_v0 = vmax.f32 %v3793_v8, %v3432_v19  ;;  %v3868_v41 = vmax.f32 %v3867_v45, %v3434_v40  ;;  %v8868_v10 = vmax.f32 %v8826_v57, %v3505_v31  ;;  %v8876_v16 = vmax.f32 %v8834_v50, %v3542_v28 }
 0x443   :  { %v3831_v12 = vmax.f32 %v3830_v46, %v3433_v15  ;;  %v3905_v1 = vmax.f32 %v3904_v55, %v3435_v53  ;;  %v1882_v44 = vpop.f32.mrb[144].mxu1  ;;  %v2235_v62 = vpop.f32.mrb[192].mxu0  ;;  %v1210_v58 = vsub.s32 5, %v8444_v37  ;;  %v1218_v18 = vsub.s32 7, %v8444_v37 }
 0x444   :  { %v1883_v61 = vadd.f32 %v1882_v44, %v8462_v32  ;;  %v2236_v59 = vadd.f32 %v2235_v62, %v8466_v42  ;;  %v1884_v9 = vpop.f32.mrb[145].mxu1  ;;  %v2237_v26 = vpop.f32.mrb[193].mxu0  ;;  %v3507_v33 = vrot.slane %v8868_v10, 1  ;;  %v3581_v8 = vrot.slane %v8871_v34, 1 }
 0x445   :  { %v1885_v60 = vadd.f32 %v1884_v9, %v8471_v23  ;;  %v2238_v57 = vadd.f32 %v2237_v26, %v8475_v51  ;;  %v1886_v31 = vpop.f32.mrb[146].mxu1  ;;  %v2239_v47 = vpop.f32.mrb[194].mxu0  ;;  %v3544_v46 = vrot.slane %v8876_v16, 1  ;;  %v3618_v55 = vrot.slane %v8879_v38, 1 }
 0x446   :  { %v3440_v63 = vmax.f32 %v1883_v61, 0.0  ;;  %v3442_v30 = vmax.f32 %v2236_v59, 0.0  ;;  %v1887_v43 = vadd.f32 %v1886_v31, %v8462_v32  ;;  %v2240_v56 = vadd.f32 %v2239_v47, %v8466_v42  ;;  %v1888_v7 = vpop.f32.mrb[147].mxu1  ;;  %v2241_v13 = vpop.f32.mrb[195].mxu0  ;;  %v7780_v61 = vld [vmem:[%s9341_s6] sm:$0xff] }
 0x447   :  { %v3441_v5 = vmax.f32 %v1885_v60, 0.0  ;;  %v3443_v50 = vmax.f32 %v2238_v57, 0.0  ;;  %v1889_v28 = vadd.f32 %v1888_v7, %v8471_v23  ;;  %v2242_v29 = vadd.f32 %v2241_v13, %v8475_v51 }
 0x448   :  { %v3795_v52 = vmax.f32 %v3794_v0, %v3440_v63  ;;  %v3869_v54 = vmax.f32 %v3868_v41, %v3442_v30  ;;  %v3448_v22 = vmax.f32 %v1887_v43, 0.0  ;;  %v3450_v27 = vmax.f32 %v2240_v56, 0.0  ;;  %2537 = vmatmul.mubr.bf16.gmra.mrb[252].mxu1 %v8374_v6  ;;  %2890 = vmatmul.mubr.bf16.gmra.mrb[44].mxu0 %v8374_v6 }
 0x449   :  { %v3832_v4 = vmax.f32 %v3831_v12, %v3441_v5  ;;  %v3906_v48 = vmax.f32 %v3905_v1, %v3443_v50  ;;  %v3449_v21 = vmax.f32 %v1889_v28, 0.0  ;;  %v3451_v14 = vmax.f32 %v2242_v29, 0.0  ;;  %2546 = vmatprep.mubr.bf16.mxu1 %v9359_v39  ;;  %2899 = vmatprep.mubr.bf16.mxu0 %v9359_v39 }
 0x44a   :  { %v3796_v25 = vmax.f32 %v3795_v52, %v3448_v22  ;;  %v3870_v24 = vmax.f32 %v3869_v54, %v3450_v27  ;;  %v8904_v59 = vrot.slane %v7780_v61, %v1206_v49  ;;  %v8906_v9 = vrot.slane %v7780_v61, %v1214_v20 }
 0x44b   :  { %v3833_v45 = vmax.f32 %v3832_v4, %v3449_v21  ;;  %v3907_v6 = vmax.f32 %v3906_v48, %v3451_v14  ;;  %v1892_v19 = vpop.f32.mrb[148].mxu1  ;;  %v2245_v40 = vpop.f32.mrb[196].mxu0  ;;  %v8916_v52 = vrot.slane %v7780_v61, %v1210_v58  ;;  %v8921_v54 = vmax.f32 %v8868_v10, %v3507_v33 }
 0x44c   :  { %v1893_v15 = vadd.f32 %v1892_v19, %v8462_v32  ;;  %v2246_v53 = vadd.f32 %v2245_v40, %v8466_v42  ;;  %v1894_v0 = vpop.f32.mrb[149].mxu1  ;;  %v2247_v41 = vpop.f32.mrb[197].mxu0  ;;  %v8924_v22 = vmax.f32 %v8871_v34, %v3581_v8  ;;  %v8929_v34 = vmax.f32 %v8876_v16, %v3544_v46 }
 0x44d   :  { %v1895_v12 = vadd.f32 %v1894_v0, %v8471_v23  ;;  %v2248_v1 = vadd.f32 %v2247_v41, %v8475_v51  ;;  %v1896_v44 = vpop.f32.mrb[150].mxu1  ;;  %v2249_v62 = vpop.f32.mrb[198].mxu0  ;;  %v8932_v8 = vmax.f32 %v8879_v38, %v3618_v55 }
 0x44e   :  { %v3456_v26 = vmax.f32 %v1893_v15, 0.0  ;;  %v3458_v60 = vmax.f32 %v2246_v53, 0.0  ;;  %v1897_v57 = vadd.f32 %v1896_v44, %v8462_v32  ;;  %v2250_v31 = vadd.f32 %v2249_v62, %v8466_v42  ;;  %v1898_v47 = vpop.f32.mrb[151].mxu1  ;;  %v2251_v63 = vpop.f32.mrb[199].mxu0 }
 0x44f   :  { %v3457_v30 = vmax.f32 %v1895_v12, 0.0  ;;  %v3459_v43 = vmax.f32 %v2248_v1, 0.0  ;;  %v1899_v56 = vadd.f32 %v1898_v47, %v8471_v23  ;;  %v2252_v7 = vadd.f32 %v2251_v63, %v8475_v51 }
 0x450   :  { %v3797_v13 = vmax.f32 %v3796_v25, %v3456_v26  ;;  %v3871_v5 = vmax.f32 %v3870_v24, %v3458_v60  ;;  %v3464_v49 = vmax.f32 %v1897_v57, 0.0  ;;  %v3466_v50 = vmax.f32 %v2250_v31, 0.0  ;;  %2547 = vmatmul.mubr.bf16.gmra.mrb[0].mxu1 %v8388_v17  ;;  %2900 = vmatmul.mubr.bf16.gmra.mrb[48].mxu0 %v8388_v17 }
 0x451   :  { %v3834_v20 = vmax.f32 %v3833_v45, %v3457_v30  ;;  %v3908_v32 = vmax.f32 %v3907_v6, %v3459_v43  ;;  %v3465_v28 = vmax.f32 %v1899_v56, 0.0  ;;  %v3467_v42 = vmax.f32 %v2252_v7, 0.0  ;;  %2556 = vmatprep.mubr.bf16.mxu1 %v9359_v39  ;;  %2909 = vmatprep.mubr.bf16.mxu0 %v9359_v39 }
 0x452   :  { %v3798_v29 = vmax.f32 %v3797_v13, %v3464_v49  ;;  %v3872_v23 = vmax.f32 %v3871_v5, %v3466_v50  ;;  %v8918_v51 = vrot.slane %v7780_v61, %v1218_v18 }
 0x453   :  { %v3835_v17 = vmax.f32 %v3834_v20, %v3465_v28  ;;  %v3909_v27 = vmax.f32 %v3908_v32, %v3467_v42  ;;  %v2288_v4 = vpop.f32.mrb[152].mxu1  ;;  %v2641_v48 = vpop.f32.mrb[200].mxu0 }
 0x454   :  { %v3799_v21 = vrot.slane %v3798_v29, 4  ;;  %v3873_v14 = vrot.slane %v3872_v23, 4  ;;  %v2289_v25 = vadd.f32 %v2288_v4, %v8904_v59  ;;  %v2642_v24 = vadd.f32 %v2641_v48, %v8906_v9  ;;  %v2290_v58 = vpop.f32.mrb[153].mxu1  ;;  %v2643_v45 = vpop.f32.mrb[201].mxu0 }
 0x455   :  { %v3836_v18 = vrot.slane %v3835_v17, 4  ;;  %v3910_v6 = vrot.slane %v3909_v27, 4  ;;  %v2292_v10 = vpop.f32.mrb[154].mxu1  ;;  %v2645_v33 = vpop.f32.mrb[202].mxu0  ;;  %v2291_v15 = vadd.f32 %v2290_v58, %v8916_v52  ;;  %v2644_v53 = vadd.f32 %v2643_v45, %v8918_v51 }
 0x456   :  { %v3800_v19 = vmax.f32 %v3798_v29, %v3799_v21  ;;  %v3874_v40 = vmax.f32 %v3872_v23, %v3873_v14  ;;  %v2294_v0 = vpop.f32.mrb[155].mxu1  ;;  %v2647_v41 = vpop.f32.mrb[203].mxu0  ;;  %v2964_v44 = vmax.f32 %v2289_v25, 0.0  ;;  %v2966_v62 = vmax.f32 %v2642_v24, 0.0 }
 0x457   :  { %v3837_v12 = vmax.f32 %v3835_v17, %v3836_v18  ;;  %v3911_v1 = vmax.f32 %v3909_v27, %v3910_v6  ;;  %v2293_v16 = vadd.f32 %v2292_v10, %v8904_v59  ;;  %v2646_v46 = vadd.f32 %v2645_v33, %v8906_v9 }
 0x458   :  { %v3801_v61 = vrot.slane %v3800_v19, 2  ;;  %v3875_v26 = vrot.slane %v3874_v40, 2  ;;  %2557 = vmatmul.mubr.bf16.gmra.mrb[4].mxu1 %v8386_v11  ;;  %2910 = vmatmul.mubr.bf16.gmra.mrb[52].mxu0 %v8386_v11  ;;  %v2295_v60 = vadd.f32 %v2294_v0, %v8916_v52  ;;  %v2648_v57 = vadd.f32 %v2647_v41, %v8918_v51 }
 0x459   :  { %v3838_v38 = vrot.slane %v3837_v12, 2  ;;  %v3912_v55 = vrot.slane %v3911_v1, 2  ;;  %2566 = vmatprep.mubr.bf16.mxu1 %v9359_v39  ;;  %2919 = vmatprep.mubr.bf16.mxu0 %v9359_v39  ;;  %v2972_v63 = vmax.f32 %v2293_v16, 0.0  ;;  %v2974_v30 = vmax.f32 %v2646_v46, 0.0 }
 0x45a   :  { %v3802_v31 = vmax.f32 %v3800_v19, %v3801_v61  ;;  %v3876_v47 = vmax.f32 %v3874_v40, %v3875_v26  ;;  %v2965_v43 = vmax.f32 %v2291_v15, 0.0  ;;  %v2967_v56 = vmax.f32 %v2644_v53, 0.0 }
 0x45b   :  { %v2973_v7 = vmax.f32 %v2295_v60, 0.0  ;;  %v2975_v13 = vmax.f32 %v2648_v57, 0.0  ;;  %v2298_v5 = vpop.f32.mrb[156].mxu1  ;;  %v2651_v11 = vpop.f32.mrb[204].mxu0  ;;  %v3620_v20 = vmax.f32 %v2964_v44, %v2972_v63  ;;  %v3694_v32 = vmax.f32 %v2966_v62, %v2974_v30 }
 0x45c   :  { %v3803_v49 = vrot.slane %v3802_v31, 1  ;;  %v3877_v50 = vrot.slane %v3876_v47, 1  ;;  %v2300_v28 = vpop.f32.mrb[157].mxu1  ;;  %v2653_v42 = vpop.f32.mrb[205].mxu0  ;;  %v8944_v29 = vmax.f32 %v3837_v12, %v3838_v38  ;;  %v8946_v23 = vmax.f32 %v3911_v1, %v3912_v55 }
 0x45d   :  { %v3657_v17 = vmax.f32 %v2965_v43, %v2973_v7  ;;  %v3731_v27 = vmax.f32 %v2967_v56, %v2975_v13  ;;  %v2302_v4 = vpop.f32.mrb[158].mxu1  ;;  %v2655_v48 = vpop.f32.mrb[206].mxu0  ;;  %v2299_v25 = vadd.f32 %v2298_v5, %v8904_v59  ;;  %v2652_v24 = vadd.f32 %v2651_v11, %v8906_v9 }
 0x45e   :  { %v3804_v21 = vmax.f32 %v3802_v31, %v3803_v49  ;;  %v3878_v14 = vmax.f32 %v3876_v47, %v3877_v50  ;;  %v2304_v58 = vpop.f32.mrb[159].mxu1  ;;  %v2657_v45 = vpop.f32.mrb[207].mxu0  ;;  %v2301_v18 = vadd.f32 %v2300_v28, %v8916_v52  ;;  %v2654_v6 = vadd.f32 %v2653_v42, %v8918_v51 }
 0x45f   :  { %v2303_v10 = vadd.f32 %v2302_v4, %v8904_v59  ;;  %v2656_v33 = vadd.f32 %v2655_v48, %v8906_v9  ;;  %v2980_v15 = vmax.f32 %v2299_v25, 0.0  ;;  %v2982_v53 = vmax.f32 %v2652_v24, 0.0 }
 0x460   :  { %v8956_v19 = vsel %vm4064_vm3, %v8921_v54, %v3804_v21  ;;  %v8960_v40 = vsel %vm4064_vm3, %v8924_v22, %v3878_v14  ;;  %2567 = vmatmul.mubr.bf16.gmra.mrb[8].mxu1 %v8400_v3  ;;  %2920 = vmatmul.mubr.bf16.gmra.mrb[56].mxu0 %v8400_v3  ;;  %v3840_v0 = vrot.slane %v8944_v29, 1  ;;  %v3914_v41 = vrot.slane %v8946_v23, 1 }
 0x461   :  { %v2981_v12 = vmax.f32 %v2301_v18, 0.0  ;;  %v2983_v1 = vmax.f32 %v2654_v6, 0.0  ;;  %2576 = vmatprep.mubr.bf16.mxu1 %v9359_v39  ;;  %2929 = vmatprep.mubr.bf16.mxu0 %v9359_v39  ;;  %v3621_v54 = vmax.f32 %v3620_v20, %v2980_v15  ;;  %v3695_v44 = vmax.f32 %v3694_v32, %v2982_v53 }
 0x462   :  { %v2988_v22 = vmax.f32 %v2303_v10, 0.0  ;;  %v2990_v62 = vmax.f32 %v2656_v33, 0.0  ;;  %v2305_v16 = vadd.f32 %v2304_v58, %v8916_v52  ;;  %v2658_v3 = vadd.f32 %v2657_v45, %v8918_v51 }
 0x463   :  { %v3658_v61 = vmax.f32 %v3657_v17, %v2981_v12  ;;  %v3732_v26 = vmax.f32 %v3731_v27, %v2983_v1  ;;  %v2308_v46 = vpop.f32.mrb[160].mxu1  ;;  %v2661_v38 = vpop.f32.mrb[208].mxu0  ;;  %v3841_v33 = vmax.f32 %v8944_v29, %v3840_v0  ;;  %v3915_v15 = vmax.f32 %v8946_v23, %v3914_v41 }
 0x464   :  { %v3622_v55 = vmax.f32 %v3621_v54, %v2988_v22  ;;  %v3696_v60 = vmax.f32 %v3695_v44, %v2990_v62  ;;  %v2309_v57 = vadd.f32 %v2308_v46, %v8904_v59  ;;  %v2662_v31 = vadd.f32 %v2661_v38, %v8906_v9  ;;  %v2310_v47 = vpop.f32.mrb[161].mxu1  ;;  %v2663_v63 = vpop.f32.mrb[209].mxu0 }
 0x465   :  { %v2989_v30 = vmax.f32 %v2305_v16, 0.0  ;;  %v2991_v43 = vmax.f32 %v2658_v3, 0.0  ;;  %v2311_v56 = vadd.f32 %v2310_v47, %v8916_v52  ;;  %v2664_v7 = vadd.f32 %v2663_v63, %v8918_v51  ;;  %v2312_v13 = vpop.f32.mrb[162].mxu1  ;;  %v2665_v5 = vpop.f32.mrb[210].mxu0 }
 0x466   :  { %v2996_v11 = vmax.f32 %v2309_v57, 0.0  ;;  %v2998_v49 = vmax.f32 %v2662_v31, 0.0  ;;  %v2313_v50 = vadd.f32 %v2312_v13, %v8904_v59  ;;  %v2666_v20 = vadd.f32 %v2665_v5, %v8906_v9  ;;  %v2314_v32 = vpop.f32.mrb[163].mxu1  ;;  %v2667_v28 = vpop.f32.mrb[211].mxu0 }
 0x467   :  { %v3659_v42 = vmax.f32 %v3658_v61, %v2989_v30  ;;  %v3733_v17 = vmax.f32 %v3732_v26, %v2991_v43  ;;  %v2997_v27 = vmax.f32 %v2311_v56, 0.0  ;;  %v2999_v4 = vmax.f32 %v2664_v7, 0.0 }
 0x468   :  { %v3623_v48 = vmax.f32 %v3622_v55, %v2996_v11  ;;  %v3697_v21 = vmax.f32 %v3696_v60, %v2998_v49  ;;  %v3004_v14 = vmax.f32 %v2313_v50, 0.0  ;;  %v3006_v25 = vmax.f32 %v2666_v20, 0.0  ;;  %2577 = vmatmul.mubr.bf16.gmra.mrb[12].mxu1 %v8398_v2  ;;  %2930 = vmatmul.mubr.bf16.gmra.mrb[60].mxu0 %v8398_v2 }
 0x469   :  { %v3660_v24 = vmax.f32 %v3659_v42, %v2997_v27  ;;  %v3734_v58 = vmax.f32 %v3733_v17, %v2999_v4  ;;  %v2315_v45 = vadd.f32 %v2314_v32, %v8916_v52  ;;  %v2668_v18 = vadd.f32 %v2667_v28, %v8918_v51  ;;  %2586 = vmatprep.mubr.bf16.mxu1 %v9359_v39 }
 0x46a   :  { %v3624_v6 = vmax.f32 %v3623_v48, %v3004_v14  ;;  %v3698_v10 = vmax.f32 %v3697_v21, %v3006_v25  ;;  %2939 = vmatprep.mubr.bf16.mxu0 %v9359_v39  ;;  %v4066_v61 = vsel %vm4064_vm3, %v8929_v34, %v3841_v33  ;;  %v8990_v26 = vsel %vm4064_vm3, %v8932_v8, %v3915_v15 }
 0x46b   :  { %v3005_v53 = vmax.f32 %v2315_v45, 0.0  ;;  %v3007_v12 = vmax.f32 %v2668_v18, 0.0  ;;  %v2318_v1 = vpop.f32.mrb[164].mxu1  ;;  %v2671_v2 = vpop.f32.mrb[212].mxu0 }
 0x46c   :  { %v2319_v54 = vadd.f32 %v2318_v1, %v8904_v59  ;;  %v2672_v44 = vadd.f32 %v2671_v2, %v8906_v9  ;;  %v2320_v22 = vpop.f32.mrb[165].mxu1  ;;  %v2673_v62 = vpop.f32.mrb[213].mxu0 }
 0x46d   :  { %v3661_v29 = vmax.f32 %v3660_v24, %v3005_v53  ;;  %v3735_v0 = vmax.f32 %v3734_v58, %v3007_v12  ;;  %v2321_v23 = vadd.f32 %v2320_v22, %v8916_v52  ;;  %v2674_v41 = vadd.f32 %v2673_v62, %v8918_v51  ;;  %v2322_v16 = vpop.f32.mrb[166].mxu1  ;;  %v2675_v3 = vpop.f32.mrb[214].mxu0 }
 0x46e   :  { %v3012_v46 = vmax.f32 %v2319_v54, 0.0  ;;  %v3014_v38 = vmax.f32 %v2672_v44, 0.0  ;;  %v2323_v55 = vadd.f32 %v2322_v16, %v8904_v59  ;;  %v2676_v60 = vadd.f32 %v2675_v3, %v8906_v9  ;;  %v2324_v57 = vpop.f32.mrb[167].mxu1  ;;  %v2677_v34 = vpop.f32.mrb[215].mxu0 }
 0x46f   :  { %v3013_v31 = vmax.f32 %v2321_v23, 0.0  ;;  %v3015_v47 = vmax.f32 %v2674_v41, 0.0  ;;  %v2325_v8 = vadd.f32 %v2324_v57, %v8916_v52  ;;  %v2678_v63 = vadd.f32 %v2677_v34, %v8918_v51 }
 0x470   :  { %v3625_v30 = vmax.f32 %v3624_v6, %v3012_v46  ;;  %v3699_v43 = vmax.f32 %v3698_v10, %v3014_v38  ;;  %v3020_v56 = vmax.f32 %v2323_v55, 0.0  ;;  %v3022_v7 = vmax.f32 %v2676_v60, 0.0  ;;  %2587 = vmatmul.mubr.bf16.gmra.mrb[16].mxu1 %v8412_v36  ;;  %2940 = vmatmul.mubr.bf16.gmra.mrb[64].mxu0 %v8412_v36 }
 0x471   :  { %v3662_v13 = vmax.f32 %v3661_v29, %v3013_v31  ;;  %v3736_v5 = vmax.f32 %v3735_v0, %v3015_v47  ;;  %v3021_v11 = vmax.f32 %v2325_v8, 0.0  ;;  %v3023_v49 = vmax.f32 %v2678_v63, 0.0  ;;  %2596 = vmatprep.mubr.bf16.mxu1 %v9359_v39  ;;  %2949 = vmatprep.mubr.bf16.mxu0 %v9359_v39 }
 0x472   :  { %v3626_v50 = vmax.f32 %v3625_v30, %v3020_v56  ;;  %v3700_v20 = vmax.f32 %v3699_v43, %v3022_v7  ;;  %v4074_v58 = vpack.c.bf16 %v4066_v61, %v4066_v61  ;;  %v7380_v30 = vld [vmem:[#allocation4 + $0x200] ss:$16 sps:$4 sm:$0xff]   ;;  %v7383_v43 = vld [vmem:[#allocation4 + $0x208] ss:$16 sps:$4 sm:$0xff]   ;;  %v4076_v56 = vpack.c.bf16 %v8990_v26, %v8990_v26 }
 0x473   :  { %v3663_v32 = vmax.f32 %v3662_v13, %v3021_v11  ;;  %v3737_v28 = vmax.f32 %v3736_v5, %v3023_v49  ;;  %v2328_v42 = vpop.f32.mrb[168].mxu1  ;;  %v2681_v17 = vpop.f32.mrb[216].mxu0 }
 0x474   :  { %v2329_v27 = vadd.f32 %v2328_v42, %v8904_v59  ;;  %v2682_v4 = vadd.f32 %v2681_v17, %v8906_v9  ;;  %v2330_v48 = vpop.f32.mrb[169].mxu1  ;;  %v2683_v36 = vpop.f32.mrb[217].mxu0  ;;  %v7388_v42 = vld [vmem:[#allocation4 + $0x224] ss:$16 sps:$4 sm:$0xff]   ;;  %v7391_v17 = vld [vmem:[#allocation4 + $0x22c] ss:$16 sps:$4 sm:$0xff]  }
 0x475   :  { %v2331_v21 = vadd.f32 %v2330_v48, %v8916_v52  ;;  %v2684_v14 = vadd.f32 %v2683_v36, %v8918_v51  ;;  %v2332_v25 = vpop.f32.mrb[170].mxu1  ;;  %v2685_v24 = vpop.f32.mrb[218].mxu0 }
 0x476   :  { %v3028_v39 = vmax.f32 %v2329_v27, 0.0  ;;  %v3030_v45 = vmax.f32 %v2682_v4, 0.0  ;;  %v2333_v18 = vadd.f32 %v2332_v25, %v8904_v59  ;;  %v2686_v6 = vadd.f32 %v2685_v24, %v8906_v9  ;;  %v2334_v10 = vpop.f32.mrb[171].mxu1  ;;  %v2687_v33 = vpop.f32.mrb[219].mxu0  ;;  %v7386_v24 = vld [vmem:[#allocation4 + $0x220] ss:$16 sps:$4 sm:$0xff]  }
 0x477   :  { %v3029_v15 = vmax.f32 %v2331_v21, 0.0  ;;  %v3031_v53 = vmax.f32 %v2684_v14, 0.0  ;;  %v2335_v12 = vadd.f32 %v2334_v10, %v8916_v52  ;;  %v2688_v1 = vadd.f32 %v2687_v33, %v8918_v51 }
 0x478   :  { %v3627_v2 = vmax.f32 %v3626_v50, %v3028_v39  ;;  %v3701_v54 = vmax.f32 %v3700_v20, %v3030_v45  ;;  %v3036_v44 = vmax.f32 %v2333_v18, 0.0  ;;  %v3038_v22 = vmax.f32 %v2686_v6, 0.0  ;;  %2597 = vmatmul.mubr.bf16.gmra.mrb[20].mxu1 %v8410_v35  ;;  %2950 = vmatmul.mubr.bf16.gmra.mrb[68].mxu0 %v8410_v35  ;;  %v7394_v18 = vld [vmem:[#allocation4 + $0x244] ss:$16 sps:$4 sm:$0xff]   ;;  %v7397_v6 = vld [vmem:[#allocation4 + $0x24c] ss:$16 sps:$4 sm:$0xff]  }
 0x479   :  { %v3664_v62 = vmax.f32 %v3663_v32, %v3029_v15  ;;  %v3738_v61 = vmax.f32 %v3737_v28, %v3031_v53  ;;  %v3037_v29 = vmax.f32 %v2335_v12, 0.0  ;;  %v3039_v0 = vmax.f32 %v2688_v1, 0.0  ;;  %5671 = vmatprep.mubr.bf16.mxu1 %v4074_v58  ;;  %5835 = vmatprep.mubr.bf16.mxu0 %v4074_v58  ;;  %v7389_v58 = vld [vmem:[#allocation4 + $0x228] ss:$16 sps:$4 sm:$0xff]  }
 0x47a   :  { %v3628_v23 = vmax.f32 %v3627_v2, %v3036_v44  ;;  %v3702_v41 = vmax.f32 %v3701_v54, %v3038_v22  ;;  %v4073_v35 = vpack.c.bf16 %v8956_v19, %v8956_v19  ;;  %v7392_v44 = vld [vmem:[#allocation4 + $0x240] ss:$16 sps:$4 sm:$0xff]  }
 0x47b   :  { %v3665_v16 = vmax.f32 %v3664_v62, %v3037_v29  ;;  %v3739_v3 = vmax.f32 %v3738_v61, %v3039_v0  ;;  %v2338_v46 = vpop.f32.mrb[172].mxu1  ;;  %v2691_v38 = vpop.f32.mrb[220].mxu0  ;;  %v7395_v0 = vld [vmem:[#allocation4 + $0x248] ss:$16 sps:$4 sm:$0xff]  }
 0x47c   :  { %v2339_v55 = vadd.f32 %v2338_v46, %v8904_v59  ;;  %v2692_v60 = vadd.f32 %v2691_v38, %v8906_v9  ;;  %v2340_v57 = vpop.f32.mrb[173].mxu1  ;;  %v2693_v34 = vpop.f32.mrb[221].mxu0 }
 0x47d   :  { %v2341_v31 = vadd.f32 %v2340_v57, %v8916_v52  ;;  %v2694_v47 = vadd.f32 %v2693_v34, %v8918_v51  ;;  %v2342_v8 = vpop.f32.mrb[174].mxu1  ;;  %v2695_v63 = vpop.f32.mrb[222].mxu0 }
 0x47e   :  { %v3044_v7 = vmax.f32 %v2339_v55, 0.0  ;;  %v3046_v13 = vmax.f32 %v2692_v60, 0.0  ;;  %v2343_v5 = vadd.f32 %v2342_v8, %v8904_v59  ;;  %v2696_v11 = vadd.f32 %v2695_v63, %v8906_v9  ;;  %v2344_v49 = vpop.f32.mrb[175].mxu1  ;;  %v2697_v50 = vpop.f32.mrb[223].mxu0  ;;  %v7403_v60 = vld [vmem:[#allocation4 + $0x26c] ss:$16 sps:$4 sm:$0xff]  }
 0x47f   :  { %v3045_v19 = vmax.f32 %v2341_v31, 0.0  ;;  %v3047_v20 = vmax.f32 %v2694_v47, 0.0  ;;  %v2345_v32 = vadd.f32 %v2344_v49, %v8916_v52  ;;  %v2698_v28 = vadd.f32 %v2697_v50, %v8918_v51 }
 0x480   :  { %v3629_v27 = vmax.f32 %v3628_v23, %v3044_v7  ;;  %v3703_v4 = vmax.f32 %v3702_v41, %v3046_v13  ;;  %v3052_v48 = vmax.f32 %v2343_v5, 0.0  ;;  %v3054_v26 = vmax.f32 %v2696_v11, 0.0  ;;  %5672 = vmatmul.mubr.bf16.vlgmr.msra.gmra.mrb[24].mxu1 %v4073_v35  ;;  %5836 = vmatmul.mubr.bf16.vlgmr.msra.gmra.mrb[72].mxu0 %v4073_v35  ;;  %v7400_v23 = vld [vmem:[#allocation4 + $0x264] ss:$16 sps:$4 sm:$0xff]   ;;  %v7398_v5 = vld [vmem:[#allocation4 + $0x260] ss:$16 sps:$4 sm:$0xff]  }
 0x481   :  { %v3666_v36 = vmax.f32 %v3665_v16, %v3045_v19  ;;  %v3740_v21 = vmax.f32 %v3739_v3, %v3047_v20  ;;  %v3053_v14 = vmax.f32 %v2345_v32, 0.0  ;;  %v3055_v25 = vmax.f32 %v2698_v28, 0.0  ;;  %5681 = vmatpush1.bf16.msra.mxu1 %v7380_v30  ;;  %5845 = vmatpush1.bf16.msra.mxu0 %v7383_v43  ;;  %v7401_v11 = vld [vmem:[#allocation4 + $0x268] ss:$16 sps:$4 sm:$0xff]   ;;  %v7406_v19 = vld [vmem:[#allocation4 + $0x284] ss:$16 sps:$4 sm:$0xff]  }
 0x482   :  { %v3630_v39 = vmax.f32 %v3629_v27, %v3052_v48  ;;  %v3704_v45 = vmax.f32 %v3703_v4, %v3054_v26  ;;  %5712 = vmatprep.mubr.bf16.mxu1 %v4076_v56  ;;  %5876 = vmatprep.mubr.bf16.mxu0 %v4076_v56  ;;  %v7409_v20 = vld [vmem:[#allocation4 + $0x28c] ss:$16 sps:$4 sm:$0xff]  }
 0x483   :  { %v3667_v10 = vmax.f32 %v3666_v36, %v3053_v14  ;;  %v3741_v33 = vmax.f32 %v3740_v21, %v3055_v25  ;;  %v2348_v15 = vpop.f32.mrb[176].mxu1  ;;  %v2701_v53 = vpop.f32.mrb[224].mxu0  ;;  %5682 = vmatprep.subr.bf16.mxu1 %v7388_v42  ;;  %5846 = vmatprep.subr.bf16.mxu0 %v7391_v17  ;;  %v7404_v36 = vld [vmem:[#allocation4 + $0x280] ss:$16 sps:$4 sm:$0xff]  }
 0x484   :  { %v2349_v12 = vadd.f32 %v2348_v15, %v8904_v59  ;;  %v2702_v1 = vadd.f32 %v2701_v53, %v8906_v9  ;;  %v2350_v2 = vpop.f32.mrb[177].mxu1  ;;  %v2703_v54 = vpop.f32.mrb[225].mxu0  ;;  %v7415_v53 = vld [vmem:[#allocation4 + $0x2ac] ss:$16 sps:$4 sm:$0xff]  }
 0x485   :  { %v2351_v22 = vadd.f32 %v2350_v2, %v8916_v52  ;;  %v2704_v62 = vadd.f32 %v2703_v54, %v8918_v51  ;;  %5683 = vmatpush1.bf16.msra.mxu1 %v7386_v24  ;;  %5847 = vmatpush1.bf16.msra.mxu0 %v7389_v58  ;;  %v2352_v61 = vpop.f32.mrb[178].mxu1  ;;  %v2705_v29 = vpop.f32.mrb[226].mxu0  ;;  %v7407_v58 = vld [vmem:[#allocation4 + $0x288] ss:$16 sps:$4 sm:$0xff]  }
 0x486   :  { %v3060_v41 = vmax.f32 %v2349_v12, 0.0  ;;  %v3062_v16 = vmax.f32 %v2702_v1, 0.0  ;;  %v2353_v3 = vadd.f32 %v2352_v61, %v8904_v59  ;;  %v2706_v46 = vadd.f32 %v2705_v29, %v8906_v9  ;;  %v2354_v38 = vpop.f32.mrb[179].mxu1  ;;  %v2707_v55 = vpop.f32.mrb[227].mxu0  ;;  %5684 = vmatprep.subr.bf16.mxu1 %v7394_v18  ;;  %5848 = vmatprep.subr.bf16.mxu0 %v7397_v6 }
 0x487   :  { %v3061_v57 = vmax.f32 %v2351_v22, 0.0  ;;  %v3063_v34 = vmax.f32 %v2704_v62, 0.0  ;;  %v2355_v35 = vadd.f32 %v2354_v38, %v8916_v52  ;;  %v2708_v31 = vadd.f32 %v2707_v55, %v8918_v51  ;;  %v7418_v55 = vld [vmem:[#allocation4 + $0x2c4] ss:$16 sps:$4 sm:$0xff]  }
 0x488   :  { %v3631_v47 = vmax.f32 %v3630_v39, %v3060_v41  ;;  %v3705_v8 = vmax.f32 %v3704_v45, %v3062_v16  ;;  %v3068_v63 = vmax.f32 %v2353_v3, 0.0  ;;  %v3070_v30 = vmax.f32 %v2706_v46, 0.0  ;;  %v7412_v39 = vld [vmem:[#allocation4 + $0x2a4] ss:$16 sps:$4 sm:$0xff]   ;;  %v7410_v16 = vld [vmem:[#allocation4 + $0x2a0] ss:$16 sps:$4 sm:$0xff]  }
 0x489   :  { %v3668_v43 = vmax.f32 %v3667_v10, %v3061_v57  ;;  %v3742_v56 = vmax.f32 %v3741_v33, %v3063_v34  ;;  %v3069_v7 = vmax.f32 %v2355_v35, 0.0  ;;  %v3071_v13 = vmax.f32 %v2708_v31, 0.0  ;;  %5685 = vmatpush1.bf16.msra.mxu1 %v7392_v44  ;;  %5849 = vmatpush1.bf16.msra.mxu0 %v7395_v0  ;;  %v7413_v3 = vld [vmem:[#allocation4 + $0x2a8] ss:$16 sps:$4 sm:$0xff]  }
 0x48a   :  { %v3632_v49 = vmax.f32 %v3631_v47, %v3068_v63  ;;  %v3706_v50 = vmax.f32 %v3705_v8, %v3070_v30  ;;  %5686 = vmatprep.subr.bf16.mxu1 %v7400_v23  ;;  %5850 = vmatprep.subr.bf16.mxu0 %v7403_v60  ;;  %v7421_v60 = vld [vmem:[#allocation4 + $0x2cc] ss:$16 sps:$4 sm:$0xff]  }
 0x48b   :  { %v3669_v32 = vmax.f32 %v3668_v43, %v3069_v7  ;;  %v3743_v28 = vmax.f32 %v3742_v56, %v3071_v13  ;;  %v2358_v42 = vpop.f32.mrb[180].mxu1  ;;  %v2711_v17 = vpop.f32.mrb[228].mxu0  ;;  %v7416_v43 = vld [vmem:[#allocation4 + $0x2c0] ss:$16 sps:$4 sm:$0xff]  }
 0x48c   :  { %v2359_v27 = vadd.f32 %v2358_v42, %v8904_v59  ;;  %v2712_v4 = vadd.f32 %v2711_v17, %v8906_v9  ;;  %v2360_v48 = vpop.f32.mrb[181].mxu1  ;;  %v2713_v26 = vpop.f32.mrb[229].mxu0  ;;  %v7427_v17 = vld [vmem:[#allocation4 + $0x2ec] ss:$16 sps:$4 sm:$0xff]  }
 0x48d   :  { %v2361_v21 = vadd.f32 %v2360_v48, %v8916_v52  ;;  %v2714_v14 = vadd.f32 %v2713_v26, %v8918_v51  ;;  %5687 = vmatpush1.bf16.msra.mxu1 %v7398_v5  ;;  %5851 = vmatpush1.bf16.msra.mxu0 %v7401_v11  ;;  %v2362_v25 = vpop.f32.mrb[182].mxu1  ;;  %v2715_v24 = vpop.f32.mrb[230].mxu0  ;;  %v7419_v11 = vld [vmem:[#allocation4 + $0x2c8] ss:$16 sps:$4 sm:$0xff]  }
 0x48e   :  { %v3076_v45 = vmax.f32 %v2359_v27, 0.0  ;;  %v3078_v18 = vmax.f32 %v2712_v4, 0.0  ;;  %v2363_v6 = vadd.f32 %v2362_v25, %v8904_v59  ;;  %v2716_v10 = vadd.f32 %v2715_v24, %v8906_v9  ;;  %v2364_v33 = vpop.f32.mrb[183].mxu1  ;;  %v2717_v15 = vpop.f32.mrb[231].mxu0  ;;  %5688 = vmatprep.subr.bf16.mxu1 %v7406_v19  ;;  %5852 = vmatprep.subr.bf16.mxu0 %v7409_v20 }
 0x48f   :  { %v3077_v12 = vmax.f32 %v2361_v21, 0.0  ;;  %v3079_v1 = vmax.f32 %v2714_v14, 0.0  ;;  %v2365_v2 = vadd.f32 %v2364_v33, %v8916_v52  ;;  %v2718_v54 = vadd.f32 %v2717_v15, %v8918_v51  ;;  %v7430_v15 = vld [vmem:[#allocation4 + $0x304] ss:$16 sps:$4 sm:$0xff]  }
 0x490   :  { %v3633_v44 = vmax.f32 %v3632_v49, %v3076_v45  ;;  %v3707_v22 = vmax.f32 %v3706_v50, %v3078_v18  ;;  %v3084_v62 = vmax.f32 %v2363_v6, 0.0  ;;  %v3086_v61 = vmax.f32 %v2716_v10, 0.0  ;;  %v7424_v49 = vld [vmem:[#allocation4 + $0x2e4] ss:$16 sps:$4 sm:$0xff]   ;;  %v7422_v18 = vld [vmem:[#allocation4 + $0x2e0] ss:$16 sps:$4 sm:$0xff]  }
 0x491   :  { %v3670_v29 = vmax.f32 %v3669_v32, %v3077_v12  ;;  %v3744_v0 = vmax.f32 %v3743_v28, %v3079_v1  ;;  %v3085_v23 = vmax.f32 %v2365_v2, 0.0  ;;  %v3087_v41 = vmax.f32 %v2718_v54, 0.0  ;;  %5689 = vmatpush1.bf16.msra.mxu1 %v7404_v36  ;;  %5853 = vmatpush1.bf16.msra.mxu0 %v7407_v58  ;;  %v7425_v6 = vld [vmem:[#allocation4 + $0x2e8] ss:$16 sps:$4 sm:$0xff]  }
 0x492   :  { %v3634_v46 = vmax.f32 %v3633_v44, %v3084_v62  ;;  %v3708_v38 = vmax.f32 %v3707_v22, %v3086_v61  ;;  %5690 = vmatprep.subr.bf16.mxu1 %v7412_v39  ;;  %5854 = vmatprep.subr.bf16.mxu0 %v7415_v53  ;;  %v7433_v53 = vld [vmem:[#allocation4 + $0x30c] ss:$16 sps:$4 sm:$0xff]  }
 0x493   :  { %v3671_v57 = vmax.f32 %v3670_v29, %v3085_v23  ;;  %v3745_v34 = vmax.f32 %v3744_v0, %v3087_v41  ;;  %v2368_v35 = vpop.f32.mrb[184].mxu1  ;;  %v2721_v31 = vpop.f32.mrb[232].mxu0  ;;  %v7428_v29 = vld [vmem:[#allocation4 + $0x300] ss:$16 sps:$4 sm:$0xff]  }
 0x494   :  { %v2369_v47 = vadd.f32 %v2368_v35, %v8904_v59  ;;  %v2722_v8 = vadd.f32 %v2721_v31, %v8906_v9  ;;  %v2370_v63 = vpop.f32.mrb[185].mxu1  ;;  %v2723_v30 = vpop.f32.mrb[233].mxu0  ;;  %v7439_v31 = vld [vmem:[#allocation4 + $0x32c] ss:$16 sps:$4 sm:$0xff]  }
 0x495   :  { %v2371_v56 = vadd.f32 %v2370_v63, %v8916_v52  ;;  %v2724_v7 = vadd.f32 %v2723_v30, %v8918_v51  ;;  %5691 = vmatpush1.bf16.msra.mxu1 %v7410_v16  ;;  %5855 = vmatpush1.bf16.msra.mxu0 %v7413_v3  ;;  %v2372_v13 = vpop.f32.mrb[186].mxu1  ;;  %v2725_v5 = vpop.f32.mrb[234].mxu0  ;;  %v7431_v3 = vld [vmem:[#allocation4 + $0x308] ss:$16 sps:$4 sm:$0xff]  }
 0x496   :  { %v3092_v50 = vmax.f32 %v2369_v47, 0.0  ;;  %v3094_v19 = vmax.f32 %v2722_v8, 0.0  ;;  %v2373_v20 = vadd.f32 %v2372_v13, %v8904_v59  ;;  %v2726_v32 = vadd.f32 %v2725_v5, %v8906_v9  ;;  %v2374_v28 = vpop.f32.mrb[187].mxu1  ;;  %v2727_v42 = vpop.f32.mrb[235].mxu0  ;;  %5692 = vmatprep.subr.bf16.mxu1 %v7418_v55  ;;  %5856 = vmatprep.subr.bf16.mxu0 %v7421_v60 }
 0x497   :  { %v3093_v27 = vmax.f32 %v2371_v56, 0.0  ;;  %v3095_v4 = vmax.f32 %v2724_v7, 0.0  ;;  %v2375_v48 = vadd.f32 %v2374_v28, %v8916_v52  ;;  %v2728_v26 = vadd.f32 %v2727_v42, %v8918_v51  ;;  %v7442_v42 = vld [vmem:[#allocation4 + $0x344] ss:$16 sps:$4 sm:$0xff]  }
 0x498   :  { %v3635_v36 = vmax.f32 %v3634_v46, %v3092_v50  ;;  %v3709_v21 = vmax.f32 %v3708_v38, %v3094_v19  ;;  %v3100_v14 = vmax.f32 %v2373_v20, 0.0  ;;  %v3102_v25 = vmax.f32 %v2726_v32, 0.0  ;;  %v7436_v46 = vld [vmem:[#allocation4 + $0x324] ss:$16 sps:$4 sm:$0xff]   ;;  %v7434_v19 = vld [vmem:[#allocation4 + $0x320] ss:$16 sps:$4 sm:$0xff]  }
 0x499   :  { %v3672_v24 = vmax.f32 %v3671_v57, %v3093_v27  ;;  %v3746_v58 = vmax.f32 %v3745_v34, %v3095_v4  ;;  %v3101_v39 = vmax.f32 %v2375_v48, 0.0  ;;  %v3103_v45 = vmax.f32 %v2728_v26, 0.0  ;;  %5693 = vmatpush1.bf16.msra.mxu1 %v7416_v43  ;;  %5857 = vmatpush1.bf16.msra.mxu0 %v7419_v11  ;;  %v7437_v20 = vld [vmem:[#allocation4 + $0x328] ss:$16 sps:$4 sm:$0xff]  }
 0x49a   :  { %v3636_v10 = vmax.f32 %v3635_v36, %v3100_v14  ;;  %v3710_v33 = vmax.f32 %v3709_v21, %v3102_v25  ;;  %5694 = vmatprep.subr.bf16.mxu1 %v7424_v49  ;;  %5858 = vmatprep.subr.bf16.mxu0 %v7427_v17  ;;  %v7445_v17 = vld [vmem:[#allocation4 + $0x34c] ss:$16 sps:$4 sm:$0xff]  }
 0x49b   :  { %v3673_v12 = vmax.f32 %v3672_v24, %v3101_v39  ;;  %v3747_v1 = vmax.f32 %v3746_v58, %v3103_v45  ;;  %v2378_v2 = vpop.f32.mrb[188].mxu1  ;;  %v2731_v54 = vpop.f32.mrb[236].mxu0  ;;  %v7440_v24 = vld [vmem:[#allocation4 + $0x340] ss:$16 sps:$4 sm:$0xff]  }
 0x49c   :  { %v2379_v44 = vadd.f32 %v2378_v2, %v8904_v59  ;;  %v2732_v22 = vadd.f32 %v2731_v54, %v8906_v9  ;;  %v2380_v62 = vpop.f32.mrb[189].mxu1  ;;  %v2733_v61 = vpop.f32.mrb[237].mxu0  ;;  %v7451_v54 = vld [vmem:[#allocation4 + $0x36c] ss:$16 sps:$4 sm:$0xff]  }
 0x49d   :  { %v2381_v0 = vadd.f32 %v2380_v62, %v8916_v52  ;;  %v2734_v23 = vadd.f32 %v2733_v61, %v8918_v51  ;;  %5695 = vmatpush1.bf16.msra.mxu1 %v7422_v18  ;;  %5859 = vmatpush1.bf16.msra.mxu0 %v7425_v6  ;;  %v2382_v41 = vpop.f32.mrb[190].mxu1  ;;  %v2735_v16 = vpop.f32.mrb[238].mxu0  ;;  %v7443_v6 = vld [vmem:[#allocation4 + $0x348] ss:$16 sps:$4 sm:$0xff]  }
 0x49e   :  { %v3108_v38 = vmax.f32 %v2379_v44, 0.0  ;;  %v3110_v55 = vmax.f32 %v2732_v22, 0.0  ;;  %v2383_v60 = vadd.f32 %v2382_v41, %v8904_v59  ;;  %v2736_v57 = vadd.f32 %v2735_v16, %v8906_v9  ;;  %v2384_v34 = vpop.f32.mrb[191].mxu1  ;;  %v2737_v35 = vpop.f32.mrb[239].mxu0  ;;  %5696 = vmatprep.subr.bf16.mxu1 %v7430_v15  ;;  %5860 = vmatprep.subr.bf16.mxu0 %v7433_v53 }
 0x49f   :  { %v3109_v47 = vmax.f32 %v2381_v0, 0.0  ;;  %v3111_v8 = vmax.f32 %v2734_v23, 0.0  ;;  %v2385_v63 = vadd.f32 %v2384_v34, %v8916_v52  ;;  %v2738_v30 = vadd.f32 %v2737_v35, %v8918_v51  ;;  %v7454_v35 = vld [vmem:[#allocation4 + $0x384] ss:$16 sps:$4 sm:$0xff]  }
 0x4a0   :  { %v3637_v43 = vmax.f32 %v3636_v10, %v3108_v38  ;;  %v3711_v56 = vmax.f32 %v3710_v33, %v3110_v55  ;;  %v3116_v7 = vmax.f32 %v2383_v60, 0.0  ;;  %v3118_v13 = vmax.f32 %v2736_v57, 0.0  ;;  %v7448_v10 = vld [vmem:[#allocation4 + $0x364] ss:$16 sps:$4 sm:$0xff]   ;;  %v7446_v55 = vld [vmem:[#allocation4 + $0x360] ss:$16 sps:$4 sm:$0xff]  }
 0x4a1   :  { %v3674_v5 = vmax.f32 %v3673_v12, %v3109_v47  ;;  %v3748_v11 = vmax.f32 %v3747_v1, %v3111_v8  ;;  %v3117_v49 = vmax.f32 %v2385_v63, 0.0  ;;  %v3119_v50 = vmax.f32 %v2738_v30, 0.0  ;;  %5697 = vmatpush1.bf16.msra.mxu1 %v7428_v29  ;;  %5861 = vmatpush1.bf16.msra.mxu0 %v7431_v3  ;;  %v7449_v60 = vld [vmem:[#allocation4 + $0x368] ss:$16 sps:$4 sm:$0xff]  }
 0x4a2   :  { %v3638_v32 = vmax.f32 %v3637_v43, %v3116_v7  ;;  %v3712_v28 = vmax.f32 %v3711_v56, %v3118_v13  ;;  %5698 = vmatprep.subr.bf16.mxu1 %v7436_v46  ;;  %5862 = vmatprep.subr.bf16.mxu0 %v7439_v31  ;;  %v7457_v31 = vld [vmem:[#allocation4 + $0x38c] ss:$16 sps:$4 sm:$0xff]  }
 0x4a3   :  { %v3675_v27 = vmax.f32 %v3674_v5, %v3117_v49  ;;  %v3749_v4 = vmax.f32 %v3748_v11, %v3119_v50  ;;  %v2388_v48 = vpop.f32.mrb[192].mxu1  ;;  %v2741_v26 = vpop.f32.mrb[240].mxu0  ;;  %v7452_v5 = vld [vmem:[#allocation4 + $0x380] ss:$16 sps:$4 sm:$0xff]  }
 0x4a4   :  { %v2389_v36 = vadd.f32 %v2388_v48, %v8904_v59  ;;  %v2742_v21 = vadd.f32 %v2741_v26, %v8906_v9  ;;  %v2390_v14 = vpop.f32.mrb[193].mxu1  ;;  %v2743_v25 = vpop.f32.mrb[241].mxu0  ;;  %v7463_v26 = vld [vmem:[#allocation4 + $0x3ac] ss:$16 sps:$4 sm:$0xff]  }
 0x4a5   :  { %v2391_v58 = vadd.f32 %v2390_v14, %v8916_v52  ;;  %v2744_v39 = vadd.f32 %v2743_v25, %v8918_v51  ;;  %5699 = vmatpush1.bf16.msra.mxu1 %v7434_v19  ;;  %5863 = vmatpush1.bf16.msra.mxu0 %v7437_v20  ;;  %v2392_v45 = vpop.f32.mrb[194].mxu1  ;;  %v2745_v18 = vpop.f32.mrb[242].mxu0  ;;  %v7455_v20 = vld [vmem:[#allocation4 + $0x388] ss:$16 sps:$4 sm:$0xff]  }
 0x4a6   :  { %v3124_v33 = vmax.f32 %v2389_v36, 0.0  ;;  %v3126_v15 = vmax.f32 %v2742_v21, 0.0  ;;  %v2393_v53 = vadd.f32 %v2392_v45, %v8904_v59  ;;  %v2746_v12 = vadd.f32 %v2745_v18, %v8906_v9  ;;  %v2394_v1 = vpop.f32.mrb[195].mxu1  ;;  %v2747_v2 = vpop.f32.mrb[243].mxu0  ;;  %5700 = vmatprep.subr.bf16.mxu1 %v7442_v42  ;;  %5864 = vmatprep.subr.bf16.mxu0 %v7445_v17 }
 0x4a7   :  { %v3125_v44 = vmax.f32 %v2391_v58, 0.0  ;;  %v3127_v22 = vmax.f32 %v2744_v39, 0.0  ;;  %v2395_v62 = vadd.f32 %v2394_v1, %v8916_v52  ;;  %v2748_v61 = vadd.f32 %v2747_v2, %v8918_v51  ;;  %v7466_v2 = vld [vmem:[#allocation4 + $0x3c4] ss:$16 sps:$4 sm:$0xff]  }
 0x4a8   :  { %v3639_v29 = vmax.f32 %v3638_v32, %v3124_v33  ;;  %v3713_v0 = vmax.f32 %v3712_v28, %v3126_v15  ;;  %v3132_v23 = vmax.f32 %v2393_v53, 0.0  ;;  %v3134_v41 = vmax.f32 %v2746_v12, 0.0  ;;  %v7460_v32 = vld [vmem:[#allocation4 + $0x3a4] ss:$16 sps:$4 sm:$0xff]   ;;  %v7458_v15 = vld [vmem:[#allocation4 + $0x3a0] ss:$16 sps:$4 sm:$0xff]  }
 0x4a9   :  { %v3676_v16 = vmax.f32 %v3675_v27, %v3125_v44  ;;  %v3750_v3 = vmax.f32 %v3749_v4, %v3127_v22  ;;  %v3133_v46 = vmax.f32 %v2395_v62, 0.0  ;;  %v3135_v38 = vmax.f32 %v2748_v61, 0.0  ;;  %5701 = vmatpush1.bf16.msra.mxu1 %v7440_v24  ;;  %5865 = vmatpush1.bf16.msra.mxu0 %v7443_v6  ;;  %v7461_v53 = vld [vmem:[#allocation4 + $0x3a8] ss:$16 sps:$4 sm:$0xff]  }
 0x4aa   :  { %v3640_v57 = vmax.f32 %v3639_v29, %v3132_v23  ;;  %v3714_v34 = vmax.f32 %v3713_v0, %v3134_v41  ;;  %5702 = vmatprep.subr.bf16.mxu1 %v7448_v10  ;;  %5866 = vmatprep.subr.bf16.mxu0 %v7451_v54  ;;  %v7469_v54 = vld [vmem:[#allocation4 + $0x3cc] ss:$16 sps:$4 sm:$0xff]  }
 0x4ab   :  { %v3677_v47 = vmax.f32 %v3676_v16, %v3133_v46  ;;  %v3751_v8 = vmax.f32 %v3750_v3, %v3135_v38  ;;  %v2398_v63 = vpop.f32.mrb[196].mxu1  ;;  %v2751_v30 = vpop.f32.mrb[244].mxu0  ;;  %v7464_v16 = vld [vmem:[#allocation4 + $0x3c0] ss:$16 sps:$4 sm:$0xff]  }
 0x4ac   :  { %v2399_v43 = vadd.f32 %v2398_v63, %v8904_v59  ;;  %v2752_v56 = vadd.f32 %v2751_v30, %v8906_v9  ;;  %v2400_v7 = vpop.f32.mrb[197].mxu1  ;;  %v2753_v13 = vpop.f32.mrb[245].mxu0  ;;  %v7475_v30 = vld [vmem:[#allocation4 + $0x3ec] ss:$16 sps:$4 sm:$0xff]  }
 0x4ad   :  { %v2401_v11 = vadd.f32 %v2400_v7, %v8916_v52  ;;  %v2754_v49 = vadd.f32 %v2753_v13, %v8918_v51  ;;  %5703 = vmatpush1.bf16.msra.mxu1 %v7446_v55  ;;  %5867 = vmatpush1.bf16.msra.mxu0 %v7449_v60  ;;  %v2402_v50 = vpop.f32.mrb[198].mxu1  ;;  %v2755_v19 = vpop.f32.mrb[246].mxu0  ;;  %v7467_v60 = vld [vmem:[#allocation4 + $0x3c8] ss:$16 sps:$4 sm:$0xff]  }
 0x4ae   :  { %v3140_v28 = vmax.f32 %v2399_v43, 0.0  ;;  %v3142_v42 = vmax.f32 %v2752_v56, 0.0  ;;  %v2403_v17 = vadd.f32 %v2402_v50, %v8904_v59  ;;  %v2756_v27 = vadd.f32 %v2755_v19, %v8906_v9  ;;  %v2404_v4 = vpop.f32.mrb[199].mxu1  ;;  %v2757_v48 = vpop.f32.mrb[247].mxu0  ;;  %5704 = vmatprep.subr.bf16.mxu1 %v7454_v35  ;;  %5868 = vmatprep.subr.bf16.mxu0 %v7457_v31 }
 0x4af   :  { %v3141_v36 = vmax.f32 %v2401_v11, 0.0  ;;  %v3143_v21 = vmax.f32 %v2754_v49, 0.0  ;;  %v2405_v14 = vadd.f32 %v2404_v4, %v8916_v52  ;;  %v2758_v25 = vadd.f32 %v2757_v48, %v8918_v51  ;;  %v7478_v48 = vld [vmem:[#allocation4 + $0x404] ss:$16 sps:$4 sm:$0xff]  }
 0x4b0   :  { %v3641_v24 = vmax.f32 %v3640_v57, %v3140_v28  ;;  %v3715_v58 = vmax.f32 %v3714_v34, %v3142_v42  ;;  %v3148_v39 = vmax.f32 %v2403_v17, 0.0  ;;  %v3150_v45 = vmax.f32 %v2756_v27, 0.0  ;;  %v7472_v57 = vld [vmem:[#allocation4 + $0x3e4] ss:$16 sps:$4 sm:$0xff]   ;;  %v7470_v42 = vld [vmem:[#allocation4 + $0x3e0] ss:$16 sps:$4 sm:$0xff]  }
 0x4b1   :  { %v3678_v18 = vmax.f32 %v3677_v47, %v3141_v36  ;;  %v3752_v6 = vmax.f32 %v3751_v8, %v3143_v21  ;;  %v3149_v10 = vmax.f32 %v2405_v14, 0.0  ;;  %v3151_v33 = vmax.f32 %v2758_v25, 0.0  ;;  %5705 = vmatpush1.bf16.msra.mxu1 %v7452_v5  ;;  %5869 = vmatpush1.bf16.msra.mxu0 %v7455_v20  ;;  %v7473_v17 = vld [vmem:[#allocation4 + $0x3e8] ss:$16 sps:$4 sm:$0xff]  }
 0x4b2   :  { %v3642_v12 = vmax.f32 %v3641_v24, %v3148_v39  ;;  %v3716_v1 = vmax.f32 %v3715_v58, %v3150_v45  ;;  %5706 = vmatprep.subr.bf16.mxu1 %v7460_v32  ;;  %5870 = vmatprep.subr.bf16.mxu0 %v7463_v26  ;;  %v7481_v26 = vld [vmem:[#allocation4 + $0x40c] ss:$16 sps:$4 sm:$0xff]  }
 0x4b3   :  { %v3679_v44 = vmax.f32 %v3678_v18, %v3149_v10  ;;  %v3753_v22 = vmax.f32 %v3752_v6, %v3151_v33  ;;  %v2408_v62 = vpop.f32.mrb[200].mxu1  ;;  %v2761_v61 = vpop.f32.mrb[248].mxu0  ;;  %v7476_v18 = vld [vmem:[#allocation4 + $0x400] ss:$16 sps:$4 sm:$0xff]   ;;  %v4075_v6 = vpack.c.bf16 %v8960_v40, %v8960_v40  ;;  %v7487_v40 = vld [vmem:[#allocation4 + $0x42c] ss:$16 sps:$4 sm:$0xff]  }
 0x4b4   :  { %v2409_v29 = vadd.f32 %v2408_v62, %v8904_v59  ;;  %v2762_v0 = vadd.f32 %v2761_v61, %v8906_v9  ;;  %v2410_v23 = vpop.f32.mrb[201].mxu1  ;;  %v2763_v41 = vpop.f32.mrb[249].mxu0 }
 0x4b5   :  { %v2411_v3 = vadd.f32 %v2410_v23, %v8916_v52  ;;  %v2764_v46 = vadd.f32 %v2763_v41, %v8918_v51  ;;  %5707 = vmatpush1.bf16.msra.mxu1 %v7458_v15  ;;  %5871 = vmatpush1.bf16.msra.mxu0 %v7461_v53  ;;  %v2412_v38 = vpop.f32.mrb[202].mxu1  ;;  %v2765_v55 = vpop.f32.mrb[250].mxu0 }
 0x4b6   :  { %v3156_v34 = vmax.f32 %v2409_v29, 0.0  ;;  %v3158_v35 = vmax.f32 %v2762_v0, 0.0  ;;  %v2413_v31 = vadd.f32 %v2412_v38, %v8904_v59  ;;  %v2766_v47 = vadd.f32 %v2765_v55, %v8906_v9  ;;  %v2414_v8 = vpop.f32.mrb[203].mxu1  ;;  %v2767_v63 = vpop.f32.mrb[251].mxu0  ;;  %5708 = vmatprep.subr.bf16.mxu1 %v7466_v2  ;;  %5872 = vmatprep.subr.bf16.mxu0 %v7469_v54 }
 0x4b7   :  { %v3157_v43 = vmax.f32 %v2411_v3, 0.0  ;;  %v3159_v56 = vmax.f32 %v2764_v46, 0.0  ;;  %v2415_v7 = vadd.f32 %v2414_v8, %v8916_v52  ;;  %v2768_v13 = vadd.f32 %v2767_v63, %v8918_v51  ;;  %v7490_v63 = vld [vmem:[#allocation4 + $0x444] ss:$16 sps:$4 sm:$0xff]  }
 0x4b8   :  { %v3643_v5 = vmax.f32 %v3642_v12, %v3156_v34  ;;  %v3717_v11 = vmax.f32 %v3716_v1, %v3158_v35  ;;  %v3164_v49 = vmax.f32 %v2413_v31, 0.0  ;;  %v3166_v50 = vmax.f32 %v2766_v47, 0.0  ;;  %v7479_v12 = vld [vmem:[#allocation4 + $0x408] ss:$16 sps:$4 sm:$0xff]   ;;  %v7484_v1 = vld [vmem:[#allocation4 + $0x424] ss:$16 sps:$4 sm:$0xff]  }
 0x4b9   :  { %v3680_v19 = vmax.f32 %v3679_v44, %v3157_v43  ;;  %v3754_v20 = vmax.f32 %v3753_v22, %v3159_v56  ;;  %v3165_v32 = vmax.f32 %v2415_v7, 0.0  ;;  %v3167_v28 = vmax.f32 %v2768_v13, 0.0  ;;  %5709 = vmatpush1.bf16.msra.mxu1 %v7464_v16  ;;  %5873 = vmatpush1.bf16.msra.mxu0 %v7467_v60  ;;  %v7482_v35 = vld [vmem:[#allocation4 + $0x420] ss:$16 sps:$4 sm:$0xff]   ;;  %v7485_v31 = vld [vmem:[#allocation4 + $0x428] ss:$16 sps:$4 sm:$0xff]  }
 0x4ba   :  { %v3644_v27 = vmax.f32 %v3643_v5, %v3164_v49  ;;  %v3718_v4 = vmax.f32 %v3717_v11, %v3166_v50  ;;  %5710 = vmatprep.subr.bf16.mxu1 %v7472_v57  ;;  %5874 = vmatprep.subr.bf16.mxu0 %v7475_v30  ;;  %v7493_v30 = vld [vmem:[#allocation4 + $0x44c] ss:$16 sps:$4 sm:$0xff]  }
 0x4bb   :  { %v3681_v36 = vmax.f32 %v3680_v19, %v3165_v32  ;;  %v3755_v21 = vmax.f32 %v3754_v20, %v3167_v28  ;;  %v2418_v14 = vpop.f32.mrb[204].mxu1  ;;  %v2771_v25 = vpop.f32.mrb[252].mxu0  ;;  %v7488_v19 = vld [vmem:[#allocation4 + $0x440] ss:$16 sps:$4 sm:$0xff]  }
 0x4bc   :  { %v2419_v24 = vadd.f32 %v2418_v14, %v8904_v59  ;;  %v2772_v58 = vadd.f32 %v2771_v25, %v8906_v9  ;;  %v2420_v39 = vpop.f32.mrb[205].mxu1  ;;  %v2773_v45 = vpop.f32.mrb[253].mxu0  ;;  %v7499_v25 = vld [vmem:[#allocation4 + $0x46c] ss:$16 sps:$4 sm:$0xff]  }
 0x4bd   :  { %v2421_v10 = vadd.f32 %v2420_v39, %v8916_v52  ;;  %v2774_v33 = vadd.f32 %v2773_v45, %v8918_v51  ;;  %5711 = vmatpush1.bf16.msra.mxu1 %v7470_v42  ;;  %5875 = vmatpush1.bf16.msra.mxu0 %v7473_v17  ;;  %v2422_v15 = vpop.f32.mrb[206].mxu1  ;;  %v2775_v53 = vpop.f32.mrb[254].mxu0  ;;  %v7491_v17 = vld [vmem:[#allocation4 + $0x448] ss:$16 sps:$4 sm:$0xff]  }
 0x4be   :  { %v3172_v2 = vmax.f32 %v2419_v24, 0.0  ;;  %v3174_v54 = vmax.f32 %v2772_v58, 0.0  ;;  %v2423_v44 = vadd.f32 %v2422_v15, %v8904_v59  ;;  %v2776_v22 = vadd.f32 %v2775_v53, %v8906_v9  ;;  %v2424_v62 = vpop.f32.mrb[207].mxu1  ;;  %v2777_v61 = vpop.f32.mrb[255].mxu0  ;;  %5721 = vmatprep.subr.bf16.mxu1 %v7478_v48  ;;  %5885 = vmatprep.subr.bf16.mxu0 %v7481_v26 }
 0x4bf   :  { %v3173_v29 = vmax.f32 %v2421_v10, 0.0  ;;  %v3175_v0 = vmax.f32 %v2774_v33, 0.0  ;;  %v2425_v23 = vadd.f32 %v2424_v62, %v8916_v52  ;;  %v2778_v41 = vadd.f32 %v2777_v61, %v8918_v51  ;;  %v7502_v62 = vld [vmem:[#allocation4 + $0x484] ss:$16 sps:$4 sm:$0xff]   ;;  %v7505_v61 = vld [vmem:[#allocation4 + $0x48c] ss:$16 sps:$4 sm:$0xff]  }
 0x4c0   :  { %v3645_v16 = vmax.f32 %v3644_v27, %v3172_v2  ;;  %v3719_v3 = vmax.f32 %v3718_v4, %v3174_v54  ;;  %v3180_v46 = vmax.f32 %v2423_v44, 0.0  ;;  %v3182_v38 = vmax.f32 %v2776_v22, 0.0  ;;  %5713 = vmatmul.mubr.bf16.vlgmr.msra.gmra.mrb[24].mxu1 %v4075_v6  ;;  %5877 = vmatmul.mubr.bf16.vlgmr.msra.gmra.mrb[72].mxu0 %v4075_v6  ;;  %v7496_v27 = vld [vmem:[#allocation4 + $0x464] ss:$16 sps:$4 sm:$0xff]   ;;  %v7494_v2 = vld [vmem:[#allocation4 + $0x460] ss:$16 sps:$4 sm:$0xff]  }
 0x4c1   :  { %v3682_v55 = vmax.f32 %v3681_v36, %v3173_v29  ;;  %v3756_v60 = vmax.f32 %v3755_v21, %v3175_v0  ;;  %v3181_v57 = vmax.f32 %v2425_v23, 0.0  ;;  %v3183_v34 = vmax.f32 %v2778_v41, 0.0  ;;  %5722 = vmatpush1.bf16.msra.mxu1 %v7476_v18  ;;  %5886 = vmatpush1.bf16.msra.mxu0 %v7479_v12  ;;  %v7497_v54 = vld [vmem:[#allocation4 + $0x468] ss:$16 sps:$4 sm:$0xff]  }
 0x4c2   :  { %v3646_v47 = vmax.f32 %v3645_v16, %v3180_v46  ;;  %v3720_v8 = vmax.f32 %v3719_v3, %v3182_v38  ;;  %5723 = vmatprep.subr.bf16.mxu1 %v7484_v1  ;;  %5887 = vmatprep.subr.bf16.mxu0 %v7487_v40  ;;  %v7500_v38 = vld [vmem:[#allocation4 + $0x480] ss:$16 sps:$4 sm:$0xff]  }
 0x4c3   :  { %v3683_v43 = vmax.f32 %v3682_v55, %v3181_v57  ;;  %v3757_v56 = vmax.f32 %v3756_v60, %v3183_v34  ;;  %v2428_v7 = vpop.f32.mrb[208].mxu1  ;;  %v2781_v13 = vpop.f32.mrb[0].mxu0 }
 0x4c4   :  { %v2429_v5 = vadd.f32 %v2428_v7, %v8904_v59  ;;  %v2782_v11 = vadd.f32 %v2781_v13, %v8906_v9  ;;  %v2430_v49 = vpop.f32.mrb[209].mxu1  ;;  %v2783_v50 = vpop.f32.mrb[1].mxu0  ;;  %v7511_v7 = vld [vmem:[#allocation4 + $0x4ac] ss:$16 sps:$4 sm:$0xff]  }
 0x4c5   :  { %v2431_v20 = vadd.f32 %v2430_v49, %v8916_v52  ;;  %v2784_v32 = vadd.f32 %v2783_v50, %v8918_v51  ;;  %v2432_v28 = vpop.f32.mrb[210].mxu1  ;;  %v2785_v42 = vpop.f32.mrb[2].mxu0  ;;  %5724 = vmatpush1.bf16.msra.mxu1 %v7482_v35  ;;  %5888 = vmatpush1.bf16.msra.mxu0 %v7485_v31  ;;  %v7503_v35 = vld [vmem:[#allocation4 + $0x488] ss:$16 sps:$4 sm:$0xff]   ;;  %v7508_v31 = vld [vmem:[#allocation4 + $0x4a4] ss:$16 sps:$4 sm:$0xff]  }
 0x4c6   :  { %v3188_v4 = vmax.f32 %v2429_v5, 0.0  ;;  %v3190_v48 = vmax.f32 %v2782_v11, 0.0  ;;  %v2433_v26 = vadd.f32 %v2432_v28, %v8904_v59  ;;  %v2786_v36 = vadd.f32 %v2785_v42, %v8906_v9  ;;  %v2434_v21 = vpop.f32.mrb[211].mxu1  ;;  %v2787_v14 = vpop.f32.mrb[3].mxu0  ;;  %5725 = vmatprep.subr.bf16.mxu1 %v7490_v63  ;;  %5889 = vmatprep.subr.bf16.mxu0 %v7493_v30 }
 0x4c7   :  { %v3189_v24 = vmax.f32 %v2431_v20, 0.0  ;;  %v3191_v58 = vmax.f32 %v2784_v32, 0.0  ;;  %v2435_v39 = vadd.f32 %v2434_v21, %v8916_v52  ;;  %v2788_v45 = vadd.f32 %v2787_v14, %v8918_v51  ;;  %v7514_v21 = vld [vmem:[#allocation4 + $0x4c4] ss:$16 sps:$4 sm:$0xff]   ;;  %v7517_v14 = vld [vmem:[#allocation4 + $0x4cc] ss:$16 sps:$4 sm:$0xff]  }
 0x4c8   :  { %v3647_v18 = vmax.f32 %v3646_v47, %v3188_v4  ;;  %v3721_v6 = vmax.f32 %v3720_v8, %v3190_v48  ;;  %v3196_v10 = vmax.f32 %v2433_v26, 0.0  ;;  %v3198_v33 = vmax.f32 %v2786_v36, 0.0  ;;  %v7506_v4 = vld [vmem:[#allocation4 + $0x4a0] ss:$16 sps:$4 sm:$0xff]   ;;  %v7509_v48 = vld [vmem:[#allocation4 + $0x4a8] ss:$16 sps:$4 sm:$0xff]  }
 0x4c9   :  { %v3684_v15 = vmax.f32 %v3683_v43, %v3189_v24  ;;  %v3758_v53 = vmax.f32 %v3757_v56, %v3191_v58  ;;  %v3197_v12 = vmax.f32 %v2435_v39, 0.0  ;;  %v3199_v1 = vmax.f32 %v2788_v45, 0.0  ;;  %5726 = vmatpush1.bf16.msra.mxu1 %v7488_v19  ;;  %5890 = vmatpush1.bf16.msra.mxu0 %v7491_v17 }
 0x4ca   :  { %v3648_v44 = vmax.f32 %v3647_v18, %v3196_v10  ;;  %v3722_v22 = vmax.f32 %v3721_v6, %v3198_v33  ;;  %5727 = vmatprep.subr.bf16.mxu1 %v7496_v27  ;;  %5891 = vmatprep.subr.bf16.mxu0 %v7499_v25  ;;  %v7512_v33 = vld [vmem:[#allocation4 + $0x4c0] ss:$16 sps:$4 sm:$0xff]  }
 0x4cb   :  { %v3685_v40 = vmax.f32 %v3684_v15, %v3197_v12  ;;  %v3759_v29 = vmax.f32 %v3758_v53, %v3199_v1  ;;  %v2438_v0 = vpop.f32.mrb[212].mxu1  ;;  %v2791_v23 = vpop.f32.mrb[4].mxu0  ;;  %v7515_v15 = vld [vmem:[#allocation4 + $0x4c8] ss:$16 sps:$4 sm:$0xff]  }
 0x4cc   :  { %v2439_v41 = vadd.f32 %v2438_v0, %v8904_v59  ;;  %v2792_v16 = vadd.f32 %v2791_v23, %v8906_v9  ;;  %v2440_v3 = vpop.f32.mrb[213].mxu1  ;;  %v2793_v46 = vpop.f32.mrb[5].mxu0  ;;  %v7518_v23 = vld [vmem:[#allocation4 + $0x4e0] ss:$16 sps:$4 sm:$0xff]  }
 0x4cd   :  { %v2441_v55 = vadd.f32 %v2440_v3, %v8916_v52  ;;  %v2794_v60 = vadd.f32 %v2793_v46, %v8918_v51  ;;  %v2442_v57 = vpop.f32.mrb[214].mxu1  ;;  %v2795_v34 = vpop.f32.mrb[6].mxu0  ;;  %5728 = vmatpush1.bf16.msra.mxu1 %v7494_v2  ;;  %5892 = vmatpush1.bf16.msra.mxu0 %v7497_v54  ;;  %v7520_v54 = vld [vmem:[#allocation4 + $0x4e4] ss:$16 sps:$4 sm:$0xff]  }
 0x4ce   :  { %v3204_v47 = vmax.f32 %v2439_v41, 0.0  ;;  %v3206_v8 = vmax.f32 %v2792_v16, 0.0  ;;  %v2443_v63 = vadd.f32 %v2442_v57, %v8904_v59  ;;  %v2796_v30 = vadd.f32 %v2795_v34, %v8906_v9  ;;  %v2444_v43 = vpop.f32.mrb[215].mxu1  ;;  %v2797_v56 = vpop.f32.mrb[7].mxu0  ;;  %5729 = vmatprep.subr.bf16.mxu1 %v7502_v62  ;;  %5893 = vmatprep.subr.bf16.mxu0 %v7505_v61  ;;  %v7521_v41 = vld [vmem:[#allocation4 + $0x4e8] ss:$16 sps:$4 sm:$0xff]  }
 0x4cf   :  { %v3205_v13 = vmax.f32 %v2441_v55, 0.0  ;;  %v3207_v5 = vmax.f32 %v2794_v60, 0.0  ;;  %v2445_v11 = vadd.f32 %v2444_v43, %v8916_v52  ;;  %v2798_v49 = vadd.f32 %v2797_v56, %v8918_v51  ;;  %v7526_v16 = vld [vmem:[#allocation4 + $0x504] ss:$16 sps:$4 sm:$0xff]   ;;  %v7529_v60 = vld [vmem:[#allocation4 + $0x50c] ss:$16 sps:$4 sm:$0xff]  }
 0x4d0   :  { %v3649_v50 = vmax.f32 %v3648_v44, %v3204_v47  ;;  %v3723_v19 = vmax.f32 %v3722_v22, %v3206_v8  ;;  %v3212_v20 = vmax.f32 %v2443_v63, 0.0  ;;  %v3214_v32 = vmax.f32 %v2796_v30, 0.0  ;;  %v7523_v44 = vld [vmem:[#allocation4 + $0x4ec] ss:$16 sps:$4 sm:$0xff]  }
 0x4d1   :  { %v3686_v28 = vmax.f32 %v3685_v40, %v3205_v13  ;;  %v3760_v42 = vmax.f32 %v3759_v29, %v3207_v5  ;;  %v3213_v17 = vmax.f32 %v2445_v11, 0.0  ;;  %v3215_v27 = vmax.f32 %v2798_v49, 0.0  ;;  %5730 = vmatpush1.bf16.msra.mxu1 %v7500_v38  ;;  %5894 = vmatpush1.bf16.msra.mxu0 %v7503_v35  ;;  %v7524_v49 = vld [vmem:[#allocation4 + $0x500] ss:$16 sps:$4 sm:$0xff]  }
 0x4d2   :  { %v9106_v26 = vmax.f32 %v3649_v50, %v3212_v20  ;;  %v9108_v36 = vmax.f32 %v3723_v19, %v3214_v32  ;;  %5731 = vmatprep.subr.bf16.mxu1 %v7508_v31  ;;  %5895 = vmatprep.subr.bf16.mxu0 %v7511_v7  ;;  %v7527_v50 = vld [vmem:[#allocation4 + $0x508] ss:$16 sps:$4 sm:$0xff]  }
 0x4d3   :  { %v9110_v25 = vmax.f32 %v3686_v28, %v3213_v17  ;;  %v9112_v24 = vmax.f32 %v3760_v42, %v3215_v27  ;;  %v2448_v58 = vpop.f32.mrb[216].mxu1  ;;  %v2801_v39 = vpop.f32.mrb[8].mxu0  ;;  %v7532_v42 = vld [vmem:[#allocation4 + $0x524] ss:$16 sps:$4 sm:$0xff]   ;;  %v7535_v17 = vld [vmem:[#allocation4 + $0x52c] ss:$16 sps:$4 sm:$0xff]  }
 0x4d4   :  { %v2450_v45 = vpop.f32.mrb[217].mxu1  ;;  %v2803_v18 = vpop.f32.mrb[9].mxu0  ;;  %v2449_v53 = vadd.f32 %v2448_v58, %v8904_v59  ;;  %v2802_v12 = vadd.f32 %v2801_v39, %v8906_v9 }
 0x4d5   :  { %v2452_v6 = vpop.f32.mrb[218].mxu1  ;;  %v2805_v10 = vpop.f32.mrb[10].mxu0  ;;  %5732 = vmatpush1.bf16.msra.mxu1 %v7506_v4  ;;  %5896 = vmatpush1.bf16.msra.mxu0 %v7509_v48  ;;  %v2451_v22 = vadd.f32 %v2450_v45, %v8916_v52  ;;  %v2804_v62 = vadd.f32 %v2803_v18, %v8918_v51 }
 0x4d6   :  { %v2454_v1 = vpop.f32.mrb[219].mxu1  ;;  %v2807_v2 = vpop.f32.mrb[11].mxu0  ;;  %5733 = vmatprep.subr.bf16.mxu1 %v7514_v21  ;;  %5897 = vmatprep.subr.bf16.mxu0 %v7517_v14  ;;  %v2453_v61 = vadd.f32 %v2452_v6, %v8904_v59  ;;  %v2806_v40 = vadd.f32 %v2805_v10, %v8906_v9  ;;  %v3220_v3 = vmax.f32 %v2449_v53, 0.0  ;;  %v3222_v46 = vmax.f32 %v2802_v12, 0.0 }
 0x4d7   :  { %v2455_v29 = vadd.f32 %v2454_v1, %v8916_v52  ;;  %v2808_v0 = vadd.f32 %v2807_v2, %v8918_v51  ;;  %v3221_v57 = vmax.f32 %v2451_v22, 0.0  ;;  %v3223_v34 = vmax.f32 %v2804_v62, 0.0 }
 0x4d8   :  { %v3228_v38 = vmax.f32 %v2453_v61, 0.0  ;;  %v3230_v55 = vmax.f32 %v2806_v40, 0.0 }
 0x4d9   :  { %5734 = vmatpush1.bf16.msra.mxu1 %v7512_v33  ;;  %5898 = vmatpush1.bf16.msra.mxu0 %v7515_v15  ;;  %v3229_v35 = vmax.f32 %v2455_v29, 0.0  ;;  %v3231_v31 = vmax.f32 %v2808_v0, 0.0  ;;  %v7530_v15 = vld [vmem:[#allocation4 + $0x520] ss:$16 sps:$4 sm:$0xff]   ;;  %v7541_v29 = vld [vmem:[#allocation4 + $0x54c] ss:$16 sps:$4 sm:$0xff]  }
 0x4da   :  { %5735 = vmatprep.subr.bf16.mxu1 %v7520_v54  ;;  %5899 = vmatprep.subr.bf16.mxu0 %v7523_v44  ;;  %v3916_v63 = vmax.f32 %v3220_v3, %v3228_v38  ;;  %v3990_v30 = vmax.f32 %v3222_v46, %v3230_v55  ;;  %v7533_v54 = vld [vmem:[#allocation4 + $0x528] ss:$16 sps:$4 sm:$0xff]   ;;  %v7538_v44 = vld [vmem:[#allocation4 + $0x544] ss:$16 sps:$4 sm:$0xff]  }
 0x4db   :  { %v2458_v47 = vpop.f32.mrb[220].mxu1  ;;  %v2811_v8 = vpop.f32.mrb[12].mxu0  ;;  %v3953_v7 = vmax.f32 %v3221_v57, %v3229_v35  ;;  %v4027_v13 = vmax.f32 %v3223_v34, %v3231_v31  ;;  %v7536_v31 = vld [vmem:[#allocation4 + $0x540] ss:$16 sps:$4 sm:$0xff]  }
 0x4dc   :  { %v2460_v43 = vpop.f32.mrb[221].mxu1  ;;  %v2813_v56 = vpop.f32.mrb[13].mxu0  ;;  %v2459_v19 = vadd.f32 %v2458_v47, %v8904_v59  ;;  %v2812_v20 = vadd.f32 %v2811_v8, %v8906_v9  ;;  %v7539_v47 = vld [vmem:[#allocation4 + $0x548] ss:$16 sps:$4 sm:$0xff]  }
 0x4dd   :  { %v2462_v5 = vpop.f32.mrb[222].mxu1  ;;  %v2815_v11 = vpop.f32.mrb[14].mxu0  ;;  %5736 = vmatpush1.bf16.msra.mxu1 %v7518_v23  ;;  %5900 = vmatpush1.bf16.msra.mxu0 %v7521_v41  ;;  %v2461_v27 = vadd.f32 %v2460_v43, %v8916_v52  ;;  %v2814_v4 = vadd.f32 %v2813_v56, %v8918_v51 }
 0x4de   :  { %v2464_v32 = vpop.f32.mrb[223].mxu1  ;;  %v2817_v28 = vpop.f32.mrb[15].mxu0  ;;  %5737 = vmatprep.subr.bf16.mxu1 %v7526_v16  ;;  %v2463_v48 = vadd.f32 %v2462_v5, %v8904_v59  ;;  %v2816_v21 = vadd.f32 %v2815_v11, %v8906_v9  ;;  %5901 = vmatprep.subr.bf16.mxu0 %v7529_v60  ;;  %v3236_v14 = vmax.f32 %v2459_v19, 0.0  ;;  %v3238_v58 = vmax.f32 %v2812_v20, 0.0  ;;  %v7547_v19 = vld [vmem:[#allocation4 + $0x56c] ss:$16 sps:$4 sm:$0xff]  }
 0x4df   :  { %v2465_v39 = vadd.f32 %v2464_v32, %v8916_v52  ;;  %v2818_v45 = vadd.f32 %v2817_v28, %v8918_v51  ;;  %v3237_v18 = vmax.f32 %v2461_v27, 0.0  ;;  %v3239_v6 = vmax.f32 %v2814_v4, 0.0 }
 0x4e0   :  { %v3244_v10 = vmax.f32 %v2463_v48, 0.0  ;;  %v3246_v33 = vmax.f32 %v2816_v21, 0.0  ;;  %v3917_v53 = vmax.f32 %v3916_v63, %v3236_v14  ;;  %v3991_v12 = vmax.f32 %v3990_v30, %v3238_v58  ;;  %v7542_v21 = vld [vmem:[#allocation4 + $0x560] ss:$16 sps:$4 sm:$0xff]  }
 0x4e1   :  { %5738 = vmatpush1.bf16.msra.mxu1 %v7524_v49  ;;  %5902 = vmatpush1.bf16.msra.mxu0 %v7527_v50  ;;  %v3245_v1 = vmax.f32 %v2465_v39, 0.0  ;;  %v3247_v2 = vmax.f32 %v2818_v45, 0.0  ;;  %v3954_v22 = vmax.f32 %v3953_v7, %v3237_v18  ;;  %v4028_v62 = vmax.f32 %v4027_v13, %v3239_v6  ;;  %v7544_v13 = vld [vmem:[#allocation4 + $0x564] ss:$16 sps:$4 sm:$0xff]   ;;  %v7545_v39 = vld [vmem:[#allocation4 + $0x568] ss:$16 sps:$4 sm:$0xff]  }
 0x4e2   :  { %5739 = vmatprep.subr.bf16.mxu1 %v7532_v42  ;;  %5903 = vmatprep.subr.bf16.mxu0 %v7535_v17  ;;  %v3918_v0 = vmax.f32 %v3917_v53, %v3244_v10  ;;  %v3992_v23 = vmax.f32 %v3991_v12, %v3246_v33  ;;  %v7550_v45 = vld [vmem:[#allocation4 + $0x584] ss:$16 sps:$4 sm:$0xff]  }
 0x4e3   :  { %v2468_v61 = vpop.f32.mrb[224].mxu1  ;;  %v2821_v40 = vpop.f32.mrb[16].mxu0  ;;  %v3955_v38 = vmax.f32 %v3954_v22, %v3245_v1  ;;  %v4029_v55 = vmax.f32 %v4028_v62, %v3247_v2 }
 0x4e4   :  { %v2469_v41 = vadd.f32 %v2468_v61, %v8904_v59  ;;  %v2822_v16 = vadd.f32 %v2821_v40, %v8906_v9  ;;  %v2470_v3 = vpop.f32.mrb[225].mxu1  ;;  %v2823_v46 = vpop.f32.mrb[17].mxu0  ;;  %v7548_v61 = vld [vmem:[#allocation4 + $0x580] ss:$16 sps:$4 sm:$0xff]   ;;  %v7551_v40 = vld [vmem:[#allocation4 + $0x588] ss:$16 sps:$4 sm:$0xff]  }
 0x4e5   :  { %v2471_v60 = vadd.f32 %v2470_v3, %v8916_v52  ;;  %v2824_v57 = vadd.f32 %v2823_v46, %v8918_v51  ;;  %v2472_v34 = vpop.f32.mrb[226].mxu1  ;;  %v2825_v35 = vpop.f32.mrb[18].mxu0  ;;  %5740 = vmatpush1.bf16.msra.mxu1 %v7530_v15  ;;  %5904 = vmatpush1.bf16.msra.mxu0 %v7533_v54  ;;  %v7553_v15 = vld [vmem:[#allocation4 + $0x58c] ss:$16 sps:$4 sm:$0xff]   ;;  %v7556_v46 = vld [vmem:[#allocation4 + $0x5a4] ss:$16 sps:$4 sm:$0xff]  }
 0x4e6   :  { %v3252_v8 = vmax.f32 %v2469_v41, 0.0  ;;  %v3254_v63 = vmax.f32 %v2822_v16, 0.0  ;;  %v2473_v30 = vadd.f32 %v2472_v34, %v8904_v59  ;;  %v2826_v43 = vadd.f32 %v2825_v35, %v8906_v9  ;;  %v2474_v56 = vpop.f32.mrb[227].mxu1  ;;  %v2827_v7 = vpop.f32.mrb[19].mxu0  ;;  %5741 = vmatprep.subr.bf16.mxu1 %v7538_v44  ;;  %5905 = vmatprep.subr.bf16.mxu0 %v7541_v29  ;;  %v7559_v34 = vld [vmem:[#allocation4 + $0x5ac] ss:$16 sps:$4 sm:$0xff]  }
 0x4e7   :  { %v3253_v5 = vmax.f32 %v2471_v60, 0.0  ;;  %v3255_v11 = vmax.f32 %v2824_v57, 0.0  ;;  %v2475_v49 = vadd.f32 %v2474_v56, %v8916_v52  ;;  %v2828_v50 = vadd.f32 %v2827_v7, %v8918_v51  ;;  %v7554_v7 = vld [vmem:[#allocation4 + $0x5a0] ss:$16 sps:$4 sm:$0xff]  }
 0x4e8   :  { %v3919_v20 = vmax.f32 %v3918_v0, %v3252_v8  ;;  %v3993_v32 = vmax.f32 %v3992_v23, %v3254_v63  ;;  %v3260_v28 = vmax.f32 %v2473_v30, 0.0  ;;  %v3262_v42 = vmax.f32 %v2826_v43, 0.0 }
 0x4e9   :  { %v3956_v17 = vmax.f32 %v3955_v38, %v3253_v5  ;;  %v4030_v27 = vmax.f32 %v4029_v55, %v3255_v11  ;;  %v3261_v4 = vmax.f32 %v2475_v49, 0.0  ;;  %v3263_v48 = vmax.f32 %v2828_v50, 0.0  ;;  %5742 = vmatpush1.bf16.msra.mxu1 %v7536_v31  ;;  %5906 = vmatpush1.bf16.msra.mxu0 %v7539_v47  ;;  %v7557_v11 = vld [vmem:[#allocation4 + $0x5a8] ss:$16 sps:$4 sm:$0xff]   ;;  %v7562_v49 = vld [vmem:[#allocation4 + $0x5c4] ss:$16 sps:$4 sm:$0xff]  }
 0x4ea   :  { %v3920_v14 = vmax.f32 %v3919_v20, %v3260_v28  ;;  %v3994_v58 = vmax.f32 %v3993_v32, %v3262_v42  ;;  %5743 = vmatprep.subr.bf16.mxu1 %v7544_v13  ;;  %5907 = vmatprep.subr.bf16.mxu0 %v7547_v19  ;;  %v7565_v28 = vld [vmem:[#allocation4 + $0x5cc] ss:$16 sps:$4 sm:$0xff]  }
 0x4eb   :  { %v3957_v18 = vmax.f32 %v3956_v17, %v3261_v4  ;;  %v4031_v6 = vmax.f32 %v4030_v27, %v3263_v48  ;;  %v2478_v10 = vpop.f32.mrb[228].mxu1  ;;  %v2831_v33 = vpop.f32.mrb[20].mxu0 }
 0x4ec   :  { %v2479_v53 = vadd.f32 %v2478_v10, %v8904_v59  ;;  %v2832_v12 = vadd.f32 %v2831_v33, %v8906_v9  ;;  %v2480_v1 = vpop.f32.mrb[229].mxu1  ;;  %v2833_v2 = vpop.f32.mrb[21].mxu0 }
 0x4ed   :  { %v2481_v54 = vadd.f32 %v2480_v1, %v8916_v52  ;;  %v2834_v44 = vadd.f32 %v2833_v2, %v8918_v51  ;;  %v2482_v22 = vpop.f32.mrb[230].mxu1  ;;  %v2835_v62 = vpop.f32.mrb[22].mxu0  ;;  %5744 = vmatpush1.bf16.msra.mxu1 %v7542_v21  ;;  %5908 = vmatpush1.bf16.msra.mxu0 %v7545_v39  ;;  %v7560_v39 = vld [vmem:[#allocation4 + $0x5c0] ss:$16 sps:$4 sm:$0xff]  }
 0x4ee   :  { %v3268_v29 = vmax.f32 %v2479_v53, 0.0  ;;  %v3270_v0 = vmax.f32 %v2832_v12, 0.0  ;;  %v2483_v23 = vadd.f32 %v2482_v22, %v8904_v59  ;;  %v2836_v41 = vadd.f32 %v2835_v62, %v8906_v9  ;;  %v2484_v16 = vpop.f32.mrb[231].mxu1  ;;  %v2837_v3 = vpop.f32.mrb[23].mxu0  ;;  %5745 = vmatprep.subr.bf16.mxu1 %v7550_v45  ;;  %5909 = vmatprep.subr.bf16.mxu0 %v7553_v15  ;;  %v7563_v45 = vld [vmem:[#allocation4 + $0x5c8] ss:$16 sps:$4 sm:$0xff]  }
 0x4ef   :  { %v3269_v38 = vmax.f32 %v2481_v54, 0.0  ;;  %v3271_v55 = vmax.f32 %v2834_v44, 0.0  ;;  %v2485_v60 = vadd.f32 %v2484_v16, %v8916_v52  ;;  %v2838_v57 = vadd.f32 %v2837_v3, %v8918_v51  ;;  %v7568_v12 = vld [vmem:[#allocation4 + $0x5e4] ss:$16 sps:$4 sm:$0xff]   ;;  %v7571_v22 = vld [vmem:[#allocation4 + $0x5ec] ss:$16 sps:$4 sm:$0xff]  }
 0x4f0   :  { %v3921_v35 = vmax.f32 %v3920_v14, %v3268_v29  ;;  %v3995_v31 = vmax.f32 %v3994_v58, %v3270_v0  ;;  %v3276_v47 = vmax.f32 %v2483_v23, 0.0  ;;  %v3278_v8 = vmax.f32 %v2836_v41, 0.0  ;;  %v7566_v3 = vld [vmem:[#allocation4 + $0x5e0] ss:$16 sps:$4 sm:$0xff]  }
 0x4f1   :  { %v3958_v63 = vmax.f32 %v3957_v18, %v3269_v38  ;;  %v4032_v30 = vmax.f32 %v4031_v6, %v3271_v55  ;;  %v3277_v43 = vmax.f32 %v2485_v60, 0.0  ;;  %v3279_v56 = vmax.f32 %v2838_v57, 0.0  ;;  %5746 = vmatpush1.bf16.msra.mxu1 %v7548_v61  ;;  %5910 = vmatpush1.bf16.msra.mxu0 %v7551_v40  ;;  %v7569_v55 = vld [vmem:[#allocation4 + $0x5e8] ss:$16 sps:$4 sm:$0xff]   ;;  %v7574_v60 = vld [vmem:[#allocation4 + $0x604] ss:$16 sps:$4 sm:$0xff]  }
 0x4f2   :  { %v3922_v13 = vmax.f32 %v3921_v35, %v3276_v47  ;;  %v3996_v5 = vmax.f32 %v3995_v31, %v3278_v8  ;;  %5747 = vmatprep.subr.bf16.mxu1 %v7556_v46  ;;  %5911 = vmatprep.subr.bf16.mxu0 %v7559_v34  ;;  %v7577_v47 = vld [vmem:[#allocation4 + $0x60c] ss:$16 sps:$4 sm:$0xff]  }
 0x4f3   :  { %v3959_v50 = vmax.f32 %v3958_v63, %v3277_v43  ;;  %v4033_v19 = vmax.f32 %v4032_v30, %v3279_v56  ;;  %v2488_v20 = vpop.f32.mrb[232].mxu1  ;;  %v2841_v32 = vpop.f32.mrb[24].mxu0 }
 0x4f4   :  { %v2489_v42 = vadd.f32 %v2488_v20, %v8904_v59  ;;  %v2842_v17 = vadd.f32 %v2841_v32, %v8906_v9  ;;  %v2490_v27 = vpop.f32.mrb[233].mxu1  ;;  %v2843_v4 = vpop.f32.mrb[25].mxu0 }
 0x4f5   :  { %v2491_v48 = vadd.f32 %v2490_v27, %v8916_v52  ;;  %v2844_v21 = vadd.f32 %v2843_v4, %v8918_v51  ;;  %v2492_v14 = vpop.f32.mrb[234].mxu1  ;;  %v2845_v58 = vpop.f32.mrb[26].mxu0  ;;  %5748 = vmatpush1.bf16.msra.mxu1 %v7554_v7  ;;  %5912 = vmatpush1.bf16.msra.mxu0 %v7557_v11 }
 0x4f6   :  { %v3284_v18 = vmax.f32 %v2489_v42, 0.0  ;;  %v3286_v6 = vmax.f32 %v2842_v17, 0.0  ;;  %v2493_v10 = vadd.f32 %v2492_v14, %v8904_v59  ;;  %v2846_v33 = vadd.f32 %v2845_v58, %v8906_v9  ;;  %v2494_v15 = vpop.f32.mrb[235].mxu1  ;;  %v2847_v53 = vpop.f32.mrb[27].mxu0  ;;  %5749 = vmatprep.subr.bf16.mxu1 %v7562_v49  ;;  %5913 = vmatprep.subr.bf16.mxu0 %v7565_v28 }
 0x4f7   :  { %v3285_v1 = vmax.f32 %v2491_v48, 0.0  ;;  %v3287_v2 = vmax.f32 %v2844_v21, 0.0  ;;  %v2495_v54 = vadd.f32 %v2494_v15, %v8916_v52  ;;  %v2848_v44 = vadd.f32 %v2847_v53, %v8918_v51 }
 0x4f8   :  { %v3923_v62 = vmax.f32 %v3922_v13, %v3284_v18  ;;  %v3997_v61 = vmax.f32 %v3996_v5, %v3286_v6  ;;  %v3292_v40 = vmax.f32 %v2493_v10, 0.0  ;;  %v3294_v29 = vmax.f32 %v2846_v33, 0.0 }
 0x4f9   :  { %v3960_v0 = vmax.f32 %v3959_v50, %v3285_v1  ;;  %v4034_v23 = vmax.f32 %v4033_v19, %v3287_v2  ;;  %v3293_v41 = vmax.f32 %v2495_v54, 0.0  ;;  %v3295_v16 = vmax.f32 %v2848_v44, 0.0  ;;  %5750 = vmatpush1.bf16.msra.mxu1 %v7560_v39  ;;  %5914 = vmatpush1.bf16.msra.mxu0 %v7563_v45 }
 0x4fa   :  { %v3924_v46 = vmax.f32 %v3923_v62, %v3292_v40  ;;  %v3998_v38 = vmax.f32 %v3997_v61, %v3294_v29  ;;  %5751 = vmatprep.subr.bf16.mxu1 %v7568_v12  ;;  %5915 = vmatprep.subr.bf16.mxu0 %v7571_v22 }
 0x4fb   :  { %v3961_v57 = vmax.f32 %v3960_v0, %v3293_v41  ;;  %v4035_v34 = vmax.f32 %v4034_v23, %v3295_v16  ;;  %v2498_v35 = vpop.f32.mrb[236].mxu1  ;;  %v2851_v31 = vpop.f32.mrb[28].mxu0 }
 0x4fc   :  { %v2499_v8 = vadd.f32 %v2498_v35, %v8904_v59  ;;  %v2852_v63 = vadd.f32 %v2851_v31, %v8906_v9  ;;  %v2500_v30 = vpop.f32.mrb[237].mxu1  ;;  %v2853_v43 = vpop.f32.mrb[29].mxu0 }
 0x4fd   :  { %v2501_v56 = vadd.f32 %v2500_v30, %v8916_v52  ;;  %v2854_v7 = vadd.f32 %v2853_v43, %v8918_v51  ;;  %v2502_v13 = vpop.f32.mrb[238].mxu1  ;;  %v2855_v5 = vpop.f32.mrb[30].mxu0  ;;  %5752 = vmatpush1.bf16.msra.mxu1 %v7566_v3  ;;  %5916 = vmatpush1.bf16.msra.mxu0 %v7569_v55 }
 0x4fe   :  { %v3300_v11 = vmax.f32 %v2499_v8, 0.0  ;;  %v3302_v49 = vmax.f32 %v2852_v63, 0.0  ;;  %v2503_v50 = vadd.f32 %v2502_v13, %v8904_v59  ;;  %v2856_v19 = vadd.f32 %v2855_v5, %v8906_v9  ;;  %v2504_v20 = vpop.f32.mrb[239].mxu1  ;;  %v2857_v32 = vpop.f32.mrb[31].mxu0  ;;  %5762 = vmatprep.subr.bf16.mxu1 %v7574_v60  ;;  %5926 = vmatprep.subr.bf16.mxu0 %v7577_v47 }
 0x4ff   :  { %v3301_v28 = vmax.f32 %v2501_v56, 0.0  ;;  %v3303_v42 = vmax.f32 %v2854_v7, 0.0  ;;  %v2505_v17 = vadd.f32 %v2504_v20, %v8916_v52  ;;  %v2858_v27 = vadd.f32 %v2857_v32, %v8918_v51 }
 0x500   :  { %v3925_v4 = vmax.f32 %v3924_v46, %v3300_v11  ;;  %v3999_v48 = vmax.f32 %v3998_v38, %v3302_v49  ;;  %v3308_v21 = vmax.f32 %v2503_v50, 0.0  ;;  %v3310_v14 = vmax.f32 %v2856_v19, 0.0 }
 0x501   :  { %v3962_v58 = vmax.f32 %v3961_v57, %v3301_v28  ;;  %v4036_v39 = vmax.f32 %v4035_v34, %v3303_v42  ;;  %v3309_v45 = vmax.f32 %v2505_v17, 0.0  ;;  %v3311_v18 = vmax.f32 %v2858_v27, 0.0 }
 0x502   :  { %v3926_v6 = vmax.f32 %v3925_v4, %v3308_v21  ;;  %v4000_v10 = vmax.f32 %v3999_v48, %v3310_v14 }
 0x503   :  { %v3963_v33 = vmax.f32 %v3962_v58, %v3309_v45  ;;  %v4037_v15 = vmax.f32 %v4036_v39, %v3311_v18  ;;  %v2508_v53 = vpop.f32.mrb[240].mxu1  ;;  %v2861_v12 = vpop.f32.mrb[32].mxu0 }
 0x504   :  { %v2509_v1 = vadd.f32 %v2508_v53, %v8904_v59  ;;  %v2862_v2 = vadd.f32 %v2861_v12, %v8906_v9  ;;  %v2510_v54 = vpop.f32.mrb[241].mxu1  ;;  %v2863_v44 = vpop.f32.mrb[33].mxu0 }
 0x505   :  { %v2511_v22 = vadd.f32 %v2510_v54, %v8916_v52  ;;  %v2864_v62 = vadd.f32 %v2863_v44, %v8918_v51  ;;  %v2512_v61 = vpop.f32.mrb[242].mxu1  ;;  %v2865_v40 = vpop.f32.mrb[34].mxu0 }
 0x506   :  { %v3316_v29 = vmax.f32 %v2509_v1, 0.0  ;;  %v3318_v0 = vmax.f32 %v2862_v2, 0.0  ;;  %v2513_v23 = vadd.f32 %v2512_v61, %v8904_v59  ;;  %v2866_v41 = vadd.f32 %v2865_v40, %v8906_v9  ;;  %v2514_v16 = vpop.f32.mrb[243].mxu1  ;;  %v2867_v3 = vpop.f32.mrb[35].mxu0 }
 0x507   :  { %v3317_v46 = vmax.f32 %v2511_v22, 0.0  ;;  %v3319_v38 = vmax.f32 %v2864_v62, 0.0  ;;  %v2515_v55 = vadd.f32 %v2514_v16, %v8916_v52  ;;  %v2868_v60 = vadd.f32 %v2867_v3, %v8918_v51 }
 0x508   :  { %v3927_v57 = vmax.f32 %v3926_v6, %v3316_v29  ;;  %v4001_v34 = vmax.f32 %v4000_v10, %v3318_v0  ;;  %v3324_v35 = vmax.f32 %v2513_v23, 0.0  ;;  %v3326_v31 = vmax.f32 %v2866_v41, 0.0 }
 0x509   :  { %v3964_v47 = vmax.f32 %v3963_v33, %v3317_v46  ;;  %v4038_v8 = vmax.f32 %v4037_v15, %v3319_v38  ;;  %v3325_v63 = vmax.f32 %v2515_v55, 0.0  ;;  %v3327_v30 = vmax.f32 %v2868_v60, 0.0 }
 0x50a   :  { %v3928_v43 = vmax.f32 %v3927_v57, %v3324_v35  ;;  %v4002_v56 = vmax.f32 %v4001_v34, %v3326_v31 }
 0x50b   :  { %v3965_v7 = vmax.f32 %v3964_v47, %v3325_v63  ;;  %v4039_v13 = vmax.f32 %v4038_v8, %v3327_v30  ;;  %v2518_v5 = vpop.f32.mrb[244].mxu1  ;;  %v2871_v11 = vpop.f32.mrb[36].mxu0 }
 0x50c   :  { %v2519_v49 = vadd.f32 %v2518_v5, %v8904_v59  ;;  %v2872_v50 = vadd.f32 %v2871_v11, %v8906_v9  ;;  %v2520_v19 = vpop.f32.mrb[245].mxu1  ;;  %v2873_v20 = vpop.f32.mrb[37].mxu0 }
 0x50d   :  { %v2521_v32 = vadd.f32 %v2520_v19, %v8916_v52  ;;  %v2874_v28 = vadd.f32 %v2873_v20, %v8918_v51  ;;  %v2522_v42 = vpop.f32.mrb[246].mxu1  ;;  %v2875_v17 = vpop.f32.mrb[38].mxu0 }
 0x50e   :  { %v3332_v27 = vmax.f32 %v2519_v49, 0.0  ;;  %v3334_v4 = vmax.f32 %v2872_v50, 0.0  ;;  %v2523_v48 = vadd.f32 %v2522_v42, %v8904_v59  ;;  %v2876_v21 = vadd.f32 %v2875_v17, %v8906_v9  ;;  %v2524_v14 = vpop.f32.mrb[247].mxu1  ;;  %v2877_v58 = vpop.f32.mrb[39].mxu0 }
 0x50f   :  { %v3333_v39 = vmax.f32 %v2521_v32, 0.0  ;;  %v3335_v45 = vmax.f32 %v2874_v28, 0.0  ;;  %v2525_v18 = vadd.f32 %v2524_v14, %v8916_v52  ;;  %v2878_v6 = vadd.f32 %v2877_v58, %v8918_v51 }
 0x510   :  { %v3929_v10 = vmax.f32 %v3928_v43, %v3332_v27  ;;  %v4003_v33 = vmax.f32 %v4002_v56, %v3334_v4  ;;  %v3340_v15 = vmax.f32 %v2523_v48, 0.0  ;;  %v3342_v53 = vmax.f32 %v2876_v21, 0.0 }
 0x511   :  { %v3966_v12 = vmax.f32 %v3965_v7, %v3333_v39  ;;  %v4040_v1 = vmax.f32 %v4039_v13, %v3335_v45  ;;  %v3341_v2 = vmax.f32 %v2525_v18, 0.0  ;;  %v3343_v54 = vmax.f32 %v2878_v6, 0.0 }
 0x512   :  { %v3930_v44 = vmax.f32 %v3929_v10, %v3340_v15  ;;  %v4004_v22 = vmax.f32 %v4003_v33, %v3342_v53 }
 0x513   :  { %v3967_v62 = vmax.f32 %v3966_v12, %v3341_v2  ;;  %v4041_v61 = vmax.f32 %v4040_v1, %v3343_v54  ;;  %v2528_v40 = vpop.f32.mrb[248].mxu1  ;;  %v2881_v29 = vpop.f32.mrb[40].mxu0 }
 0x514   :  { %v2529_v0 = vadd.f32 %v2528_v40, %v8904_v59  ;;  %v2882_v23 = vadd.f32 %v2881_v29, %v8906_v9  ;;  %v2530_v41 = vpop.f32.mrb[249].mxu1  ;;  %v2883_v16 = vpop.f32.mrb[41].mxu0 }
 0x515   :  { %v2531_v3 = vadd.f32 %v2530_v41, %v8916_v52  ;;  %v2884_v46 = vadd.f32 %v2883_v16, %v8918_v51  ;;  %v2532_v38 = vpop.f32.mrb[250].mxu1  ;;  %v2885_v55 = vpop.f32.mrb[42].mxu0 }
 0x516   :  { %v3348_v60 = vmax.f32 %v2529_v0, 0.0  ;;  %v3350_v57 = vmax.f32 %v2882_v23, 0.0  ;;  %v2533_v34 = vadd.f32 %v2532_v38, %v8904_v59  ;;  %v2886_v35 = vadd.f32 %v2885_v55, %v8906_v9  ;;  %v2534_v31 = vpop.f32.mrb[251].mxu1  ;;  %v2887_v47 = vpop.f32.mrb[43].mxu0 }
 0x517   :  { %v3349_v8 = vmax.f32 %v2531_v3, 0.0  ;;  %v3351_v63 = vmax.f32 %v2884_v46, 0.0  ;;  %v2535_v30 = vadd.f32 %v2534_v31, %v8916_v52  ;;  %v2888_v43 = vadd.f32 %v2887_v47, %v8918_v51 }
 0x518   :  { %v3931_v56 = vmax.f32 %v3930_v44, %v3348_v60  ;;  %v4005_v7 = vmax.f32 %v4004_v22, %v3350_v57  ;;  %v3356_v13 = vmax.f32 %v2533_v34, 0.0  ;;  %v3358_v5 = vmax.f32 %v2886_v35, 0.0 }
 0x519   :  { %v3968_v11 = vmax.f32 %v3967_v62, %v3349_v8  ;;  %v4042_v49 = vmax.f32 %v4041_v61, %v3351_v63  ;;  %v3357_v50 = vmax.f32 %v2535_v30, 0.0  ;;  %v3359_v19 = vmax.f32 %v2888_v43, 0.0 }
 0x51a   :  { %v3932_v20 = vmax.f32 %v3931_v56, %v3356_v13  ;;  %v4006_v32 = vmax.f32 %v4005_v7, %v3358_v5 }
 0x51b   :  { %v3969_v28 = vmax.f32 %v3968_v11, %v3357_v50  ;;  %v4043_v42 = vmax.f32 %v4042_v49, %v3359_v19  ;;  %v2538_v17 = vpop.f32.mrb[252].mxu1  ;;  %v2891_v27 = vpop.f32.mrb[44].mxu0 }
 0x51c   :  { %v2539_v4 = vadd.f32 %v2538_v17, %v8904_v59  ;;  %v2892_v48 = vadd.f32 %v2891_v27, %v8906_v9  ;;  %v2540_v21 = vpop.f32.mrb[253].mxu1  ;;  %v2893_v14 = vpop.f32.mrb[45].mxu0 }
 0x51d   :  { %v2541_v58 = vadd.f32 %v2540_v21, %v8916_v52  ;;  %v2894_v39 = vadd.f32 %v2893_v14, %v8918_v51  ;;  %v2542_v45 = vpop.f32.mrb[254].mxu1  ;;  %v2895_v18 = vpop.f32.mrb[46].mxu0 }
 0x51e   :  { %v3364_v6 = vmax.f32 %v2539_v4, 0.0  ;;  %v3366_v10 = vmax.f32 %v2892_v48, 0.0  ;;  %v2543_v33 = vadd.f32 %v2542_v45, %v8904_v59  ;;  %v2896_v15 = vadd.f32 %v2895_v18, %v8906_v9  ;;  %v2544_v53 = vpop.f32.mrb[255].mxu1  ;;  %v2897_v12 = vpop.f32.mrb[47].mxu0 }
 0x51f   :  { %v3365_v1 = vmax.f32 %v2541_v58, 0.0  ;;  %v3367_v2 = vmax.f32 %v2894_v39, 0.0  ;;  %v2545_v54 = vadd.f32 %v2544_v53, %v8916_v52  ;;  %v2898_v44 = vadd.f32 %v2897_v12, %v8918_v51 }
 0x520   :  { %v3933_v22 = vmax.f32 %v3932_v20, %v3364_v6  ;;  %v4007_v62 = vmax.f32 %v4006_v32, %v3366_v10  ;;  %v3372_v61 = vmax.f32 %v2543_v33, 0.0  ;;  %v3374_v40 = vmax.f32 %v2896_v15, 0.0 }
 0x521   :  { %v3970_v29 = vmax.f32 %v3969_v28, %v3365_v1  ;;  %v4044_v0 = vmax.f32 %v4043_v42, %v3367_v2  ;;  %v3373_v23 = vmax.f32 %v2545_v54, 0.0  ;;  %v3375_v41 = vmax.f32 %v2898_v44, 0.0 }
 0x522   :  { %v3934_v16 = vmax.f32 %v3933_v22, %v3372_v61  ;;  %v4008_v3 = vmax.f32 %v4007_v62, %v3374_v40 }
 0x523   :  { %v3971_v46 = vmax.f32 %v3970_v29, %v3373_v23  ;;  %v4045_v38 = vmax.f32 %v4044_v0, %v3375_v41  ;;  %v2548_v55 = vpop.f32.mrb[0].mxu1  ;;  %v2901_v60 = vpop.f32.mrb[48].mxu0 }
 0x524   :  { %v2549_v57 = vadd.f32 %v2548_v55, %v8904_v59  ;;  %v2902_v34 = vadd.f32 %v2901_v60, %v8906_v9  ;;  %v2550_v35 = vpop.f32.mrb[1].mxu1  ;;  %v2903_v31 = vpop.f32.mrb[49].mxu0 }
 0x525   :  { %v2551_v47 = vadd.f32 %v2550_v35, %v8916_v52  ;;  %v2904_v8 = vadd.f32 %v2903_v31, %v8918_v51  ;;  %v2552_v63 = vpop.f32.mrb[2].mxu1  ;;  %v2905_v30 = vpop.f32.mrb[50].mxu0 }
 0x526   :  { %v3380_v43 = vmax.f32 %v2549_v57, 0.0  ;;  %v3382_v56 = vmax.f32 %v2902_v34, 0.0  ;;  %v2553_v7 = vadd.f32 %v2552_v63, %v8904_v59  ;;  %v2906_v13 = vadd.f32 %v2905_v30, %v8906_v9  ;;  %v2554_v5 = vpop.f32.mrb[3].mxu1  ;;  %v2907_v11 = vpop.f32.mrb[51].mxu0 }
 0x527   :  { %v3381_v49 = vmax.f32 %v2551_v47, 0.0  ;;  %v3383_v50 = vmax.f32 %v2904_v8, 0.0  ;;  %v2555_v19 = vadd.f32 %v2554_v5, %v8916_v52  ;;  %v2908_v20 = vadd.f32 %v2907_v11, %v8918_v51 }
 0x528   :  { %v3935_v32 = vmax.f32 %v3934_v16, %v3380_v43  ;;  %v4009_v28 = vmax.f32 %v4008_v3, %v3382_v56  ;;  %v3388_v42 = vmax.f32 %v2553_v7, 0.0  ;;  %v3390_v17 = vmax.f32 %v2906_v13, 0.0 }
 0x529   :  { %v3972_v27 = vmax.f32 %v3971_v46, %v3381_v49  ;;  %v4046_v4 = vmax.f32 %v4045_v38, %v3383_v50  ;;  %v3389_v48 = vmax.f32 %v2555_v19, 0.0  ;;  %v3391_v21 = vmax.f32 %v2908_v20, 0.0 }
 0x52a   :  { %v3936_v14 = vmax.f32 %v3935_v32, %v3388_v42  ;;  %v4010_v58 = vmax.f32 %v4009_v28, %v3390_v17 }
 0x52b   :  { %v3973_v39 = vmax.f32 %v3972_v27, %v3389_v48  ;;  %v4047_v45 = vmax.f32 %v4046_v4, %v3391_v21  ;;  %v2558_v18 = vpop.f32.mrb[4].mxu1  ;;  %v2911_v6 = vpop.f32.mrb[52].mxu0 }
 0x52c   :  { %v2559_v10 = vadd.f32 %v2558_v18, %v8904_v59  ;;  %v2912_v33 = vadd.f32 %v2911_v6, %v8906_v9  ;;  %v2560_v15 = vpop.f32.mrb[5].mxu1  ;;  %v2913_v53 = vpop.f32.mrb[53].mxu0 }
 0x52d   :  { %v2561_v12 = vadd.f32 %v2560_v15, %v8916_v52  ;;  %v2914_v1 = vadd.f32 %v2913_v53, %v8918_v51  ;;  %v2562_v2 = vpop.f32.mrb[6].mxu1  ;;  %v2915_v54 = vpop.f32.mrb[54].mxu0 }
 0x52e   :  { %v3396_v44 = vmax.f32 %v2559_v10, 0.0  ;;  %v3398_v22 = vmax.f32 %v2912_v33, 0.0  ;;  %v2563_v62 = vadd.f32 %v2562_v2, %v8904_v59  ;;  %v2916_v61 = vadd.f32 %v2915_v54, %v8906_v9  ;;  %v2564_v40 = vpop.f32.mrb[7].mxu1  ;;  %v2917_v29 = vpop.f32.mrb[55].mxu0 }
 0x52f   :  { %v3397_v0 = vmax.f32 %v2561_v12, 0.0  ;;  %v3399_v23 = vmax.f32 %v2914_v1, 0.0  ;;  %v2565_v41 = vadd.f32 %v2564_v40, %v8916_v52  ;;  %v2918_v16 = vadd.f32 %v2917_v29, %v8918_v51 }
 0x530   :  { %v3937_v3 = vmax.f32 %v3936_v14, %v3396_v44  ;;  %v4011_v46 = vmax.f32 %v4010_v58, %v3398_v22  ;;  %v3404_v38 = vmax.f32 %v2563_v62, 0.0  ;;  %v3406_v55 = vmax.f32 %v2916_v61, 0.0 }
 0x531   :  { %v3974_v60 = vmax.f32 %v3973_v39, %v3397_v0  ;;  %v4048_v57 = vmax.f32 %v4047_v45, %v3399_v23  ;;  %v3405_v34 = vmax.f32 %v2565_v41, 0.0  ;;  %v3407_v35 = vmax.f32 %v2918_v16, 0.0 }
 0x532   :  { %v3938_v31 = vmax.f32 %v3937_v3, %v3404_v38  ;;  %v4012_v47 = vmax.f32 %v4011_v46, %v3406_v55 }
 0x533   :  { %v3975_v8 = vmax.f32 %v3974_v60, %v3405_v34  ;;  %v4049_v63 = vmax.f32 %v4048_v57, %v3407_v35  ;;  %v2568_v30 = vpop.f32.mrb[8].mxu1  ;;  %v2921_v43 = vpop.f32.mrb[56].mxu0 }
 0x534   :  { %v2569_v56 = vadd.f32 %v2568_v30, %v8904_v59  ;;  %v2922_v7 = vadd.f32 %v2921_v43, %v8906_v9  ;;  %v2570_v13 = vpop.f32.mrb[9].mxu1  ;;  %v2923_v5 = vpop.f32.mrb[57].mxu0 }
 0x535   :  { %v2571_v11 = vadd.f32 %v2570_v13, %v8916_v52  ;;  %v2924_v49 = vadd.f32 %v2923_v5, %v8918_v51  ;;  %v2572_v50 = vpop.f32.mrb[10].mxu1  ;;  %v2925_v19 = vpop.f32.mrb[58].mxu0 }
 0x536   :  { %v3412_v20 = vmax.f32 %v2569_v56, 0.0  ;;  %v3414_v32 = vmax.f32 %v2922_v7, 0.0  ;;  %v2573_v28 = vadd.f32 %v2572_v50, %v8904_v59  ;;  %v2926_v42 = vadd.f32 %v2925_v19, %v8906_v9  ;;  %v2574_v17 = vpop.f32.mrb[11].mxu1  ;;  %v2927_v27 = vpop.f32.mrb[59].mxu0 }
 0x537   :  { %v3413_v4 = vmax.f32 %v2571_v11, 0.0  ;;  %v3415_v48 = vmax.f32 %v2924_v49, 0.0  ;;  %v2575_v21 = vadd.f32 %v2574_v17, %v8916_v52  ;;  %v2928_v14 = vadd.f32 %v2927_v27, %v8918_v51 }
 0x538   :  { %v3939_v58 = vmax.f32 %v3938_v31, %v3412_v20  ;;  %v4013_v39 = vmax.f32 %v4012_v47, %v3414_v32  ;;  %v3420_v45 = vmax.f32 %v2573_v28, 0.0  ;;  %v3422_v18 = vmax.f32 %v2926_v42, 0.0 }
 0x539   :  { %v3976_v6 = vmax.f32 %v3975_v8, %v3413_v4  ;;  %v4050_v10 = vmax.f32 %v4049_v63, %v3415_v48  ;;  %v3421_v33 = vmax.f32 %v2575_v21, 0.0  ;;  %v3423_v15 = vmax.f32 %v2928_v14, 0.0 }
 0x53a   :  { %v3940_v53 = vmax.f32 %v3939_v58, %v3420_v45  ;;  %v4014_v12 = vmax.f32 %v4013_v39, %v3422_v18  ;;  %v3651_v32 = vrot.slane %v9106_v26, 4  ;;  %v3725_v28 = vrot.slane %v9108_v36, 4 }
 0x53b   :  { %v3977_v1 = vmax.f32 %v3976_v6, %v3421_v33  ;;  %v4051_v2 = vmax.f32 %v4050_v10, %v3423_v15  ;;  %v2578_v54 = vpop.f32.mrb[12].mxu1  ;;  %v2931_v44 = vpop.f32.mrb[60].mxu0  ;;  %v3688_v48 = vrot.slane %v9110_v25, 4  ;;  %v3762_v21 = vrot.slane %v9112_v24, 4 }
 0x53c   :  { %v2579_v22 = vadd.f32 %v2578_v54, %v8904_v59  ;;  %v2932_v62 = vadd.f32 %v2931_v44, %v8906_v9  ;;  %v2580_v61 = vpop.f32.mrb[13].mxu1  ;;  %v2933_v40 = vpop.f32.mrb[61].mxu0 }
 0x53d   :  { %v2581_v29 = vadd.f32 %v2580_v61, %v8916_v52  ;;  %v2934_v0 = vadd.f32 %v2933_v40, %v8918_v51  ;;  %v2582_v23 = vpop.f32.mrb[14].mxu1  ;;  %v2935_v41 = vpop.f32.mrb[62].mxu0 }
 0x53e   :  { %v3428_v16 = vmax.f32 %v2579_v22, 0.0  ;;  %v3430_v3 = vmax.f32 %v2932_v62, 0.0  ;;  %v2583_v46 = vadd.f32 %v2582_v23, %v8904_v59  ;;  %v2936_v38 = vadd.f32 %v2935_v41, %v8906_v9  ;;  %v2584_v55 = vpop.f32.mrb[15].mxu1  ;;  %v2937_v60 = vpop.f32.mrb[63].mxu0 }
 0x53f   :  { %v3429_v57 = vmax.f32 %v2581_v29, 0.0  ;;  %v3431_v34 = vmax.f32 %v2934_v0, 0.0  ;;  %v2585_v35 = vadd.f32 %v2584_v55, %v8916_v52  ;;  %v2938_v31 = vadd.f32 %v2937_v60, %v8918_v51 }
 0x540   :  { %v3941_v47 = vmax.f32 %v3940_v53, %v3428_v16  ;;  %v4015_v8 = vmax.f32 %v4014_v12, %v3430_v3  ;;  %v3436_v63 = vmax.f32 %v2583_v46, 0.0  ;;  %v3438_v30 = vmax.f32 %v2936_v38, 0.0 }
 0x541   :  { %v3978_v43 = vmax.f32 %v3977_v1, %v3429_v57  ;;  %v4052_v56 = vmax.f32 %v4051_v2, %v3431_v34  ;;  %v3437_v7 = vmax.f32 %v2585_v35, 0.0  ;;  %v3439_v13 = vmax.f32 %v2938_v31, 0.0 }
 0x542   :  { %v3942_v5 = vmax.f32 %v3941_v47, %v3436_v63  ;;  %v4016_v11 = vmax.f32 %v4015_v8, %v3438_v30  ;;  %v3652_v60 = vmax.f32 %v9106_v26, %v3651_v32  ;;  %v3726_v57 = vmax.f32 %v9108_v36, %v3725_v28 }
 0x543   :  { %v3979_v49 = vmax.f32 %v3978_v43, %v3437_v7  ;;  %v4053_v50 = vmax.f32 %v4052_v56, %v3439_v13  ;;  %v2588_v19 = vpop.f32.mrb[16].mxu1  ;;  %v2941_v20 = vpop.f32.mrb[64].mxu0  ;;  %v3689_v8 = vmax.f32 %v9110_v25, %v3688_v48  ;;  %v3763_v63 = vmax.f32 %v9112_v24, %v3762_v21 }
 0x544   :  { %v2589_v42 = vadd.f32 %v2588_v19, %v8904_v59  ;;  %v2942_v17 = vadd.f32 %v2941_v20, %v8906_v9  ;;  %v2590_v27 = vpop.f32.mrb[17].mxu1  ;;  %v2943_v4 = vpop.f32.mrb[65].mxu0  ;;  %v3653_v21 = vrot.slane %v3652_v60, 2 }
 0x545   :  { %v2591_v14 = vadd.f32 %v2590_v27, %v8916_v52  ;;  %v2944_v58 = vadd.f32 %v2943_v4, %v8918_v51  ;;  %v2592_v39 = vpop.f32.mrb[18].mxu1  ;;  %v2945_v45 = vpop.f32.mrb[66].mxu0 }
 0x546   :  { %v3444_v18 = vmax.f32 %v2589_v42, 0.0  ;;  %v3446_v6 = vmax.f32 %v2942_v17, 0.0  ;;  %v2593_v10 = vadd.f32 %v2592_v39, %v8904_v59  ;;  %v2946_v33 = vadd.f32 %v2945_v45, %v8906_v9  ;;  %v2594_v15 = vpop.f32.mrb[19].mxu1  ;;  %v2947_v53 = vpop.f32.mrb[67].mxu0 }
 0x547   :  { %v3445_v12 = vmax.f32 %v2591_v14, 0.0  ;;  %v3447_v1 = vmax.f32 %v2944_v58, 0.0  ;;  %v2595_v2 = vadd.f32 %v2594_v15, %v8916_v52  ;;  %v2948_v54 = vadd.f32 %v2947_v53, %v8918_v51 }
 0x548   :  { %v3943_v44 = vmax.f32 %v3942_v5, %v3444_v18  ;;  %v4017_v22 = vmax.f32 %v4016_v11, %v3446_v6  ;;  %v3452_v62 = vmax.f32 %v2593_v10, 0.0  ;;  %v3454_v61 = vmax.f32 %v2946_v33, 0.0 }
 0x549   :  { %v3980_v40 = vmax.f32 %v3979_v49, %v3445_v12  ;;  %v4054_v29 = vmax.f32 %v4053_v50, %v3447_v1  ;;  %v3453_v0 = vmax.f32 %v2595_v2, 0.0  ;;  %v3455_v23 = vmax.f32 %v2948_v54, 0.0 }
 0x54a   :  { %v3944_v41 = vmax.f32 %v3943_v44, %v3452_v62  ;;  %v4018_v16 = vmax.f32 %v4017_v22, %v3454_v61  ;;  %v3690_v58 = vrot.slane %v3689_v8, 2  ;;  %v3764_v39 = vrot.slane %v3763_v63, 2 }
 0x54b   :  { %v3981_v3 = vmax.f32 %v3980_v40, %v3453_v0  ;;  %v4055_v46 = vmax.f32 %v4054_v29, %v3455_v23  ;;  %v2598_v38 = vpop.f32.mrb[20].mxu1  ;;  %v2951_v55 = vpop.f32.mrb[68].mxu0  ;;  %v3654_v33 = vmax.f32 %v3652_v60, %v3653_v21  ;;  %v7590_v21 = vld [vmem:[#allocation4 + $0x660] ss:$16 sps:$4 sm:$0xff]  }
 0x54c   :  { %v2599_v34 = vadd.f32 %v2598_v38, %v8904_v59  ;;  %v2952_v35 = vadd.f32 %v2951_v55, %v8906_v9  ;;  %v2600_v31 = vpop.f32.mrb[21].mxu1  ;;  %v2953_v47 = vpop.f32.mrb[69].mxu0  ;;  %v3691_v1 = vmax.f32 %v3689_v8, %v3690_v58  ;;  %v3765_v2 = vmax.f32 %v3763_v63, %v3764_v39  ;;  %v7596_v58 = vld [vmem:[#allocation4 + $0x680] ss:$16 sps:$4 sm:$0xff]   ;;  %v7599_v39 = vld [vmem:[#allocation4 + $0x688] ss:$16 sps:$4 sm:$0xff]  }
 0x54d   :  { %v2601_v30 = vadd.f32 %v2600_v31, %v8916_v52  ;;  %v2954_v43 = vadd.f32 %v2953_v47, %v8918_v51  ;;  %v2602_v56 = vpop.f32.mrb[22].mxu1  ;;  %v2955_v7 = vpop.f32.mrb[70].mxu0  ;;  %v3655_v29 = vrot.slane %v3654_v33, 1 }
 0x54e   :  { %v3460_v13 = vmax.f32 %v2599_v34, 0.0  ;;  %v3462_v26 = vmax.f32 %v2952_v35, 0.0  ;;  %v2603_v36 = vadd.f32 %v2602_v56, %v8904_v59  ;;  %v2956_v5 = vadd.f32 %v2955_v7, %v8906_v9  ;;  %v2604_v11 = vpop.f32.mrb[23].mxu1  ;;  %v2957_v49 = vpop.f32.mrb[71].mxu0 }
 0x54f   :  { %v3461_v50 = vmax.f32 %v2601_v30, 0.0  ;;  %v3463_v19 = vmax.f32 %v2954_v43, 0.0  ;;  %v2605_v25 = vadd.f32 %v2604_v11, %v8916_v52  ;;  %v2958_v24 = vadd.f32 %v2957_v49, %v8918_v51  ;;  %v7572_v11 = vld [vmem:[#allocation4 + $0x600] ss:$16 sps:$4 sm:$0xff]   ;;  %v7575_v49 = vld [vmem:[#allocation4 + $0x608] ss:$16 sps:$4 sm:$0xff]  }
 0x550   :  { %v3945_v20 = vmax.f32 %v3944_v41, %v3460_v13  ;;  %v4019_v32 = vmax.f32 %v4018_v16, %v3462_v26  ;;  %v3468_v28 = vmax.f32 %v2603_v36, 0.0  ;;  %v3470_v42 = vmax.f32 %v2956_v5, 0.0 }
 0x551   :  { %v3982_v17 = vmax.f32 %v3981_v3, %v3461_v50  ;;  %v4056_v27 = vmax.f32 %v4055_v46, %v3463_v19  ;;  %v3469_v4 = vmax.f32 %v2605_v25, 0.0  ;;  %v3471_v48 = vmax.f32 %v2958_v24, 0.0  ;;  %v7580_v19 = vld [vmem:[#allocation4 + $0x624] ss:$16 sps:$4 sm:$0xff]   ;;  %v7583_v25 = vld [vmem:[#allocation4 + $0x62c] ss:$16 sps:$4 sm:$0xff]  }
 0x552   :  { %v3727_v59 = vrot.slane %v3726_v57, 2  ;;  %v3946_v14 = vmax.f32 %v3945_v20, %v3468_v28  ;;  %v4020_v9 = vmax.f32 %v4019_v32, %v3470_v42  ;;  %v3692_v16 = vrot.slane %v3691_v1, 1  ;;  %v7578_v20 = vld [vmem:[#allocation4 + $0x620] ss:$16 sps:$4 sm:$0xff]   ;;  %v7581_v32 = vld [vmem:[#allocation4 + $0x628] ss:$16 sps:$4 sm:$0xff]  }
 0x553   :  { %v3983_v45 = vmax.f32 %v3982_v17, %v3469_v4  ;;  %v4057_v18 = vmax.f32 %v4056_v27, %v3471_v48  ;;  %v3766_v3 = vrot.slane %v3765_v2, 1  ;;  %v3656_v35 = vmax.f32 %v3654_v33, %v3655_v29  ;;  %v7586_v28 = vld [vmem:[#allocation4 + $0x644] ss:$16 sps:$4 sm:$0xff]   ;;  %v7589_v42 = vld [vmem:[#allocation4 + $0x64c] ss:$16 sps:$4 sm:$0xff]  }
 0x554   :  { %v3947_v6 = vrot.slane %v3946_v14, 4  ;;  %v4021_v52 = vrot.slane %v4020_v9, 4  ;;  %v3728_v15 = vmax.f32 %v3726_v57, %v3727_v59  ;;  %v3693_v63 = vmax.f32 %v3691_v1, %v3692_v16  ;;  %v7584_v17 = vld [vmem:[#allocation4 + $0x640] ss:$16 sps:$4 sm:$0xff]   ;;  %v7587_v27 = vld [vmem:[#allocation4 + $0x648] ss:$16 sps:$4 sm:$0xff]  }
 0x555   :  { %v3984_v10 = vrot.slane %v3983_v45, 4  ;;  %v4058_v51 = vrot.slane %v4057_v18, 4  ;;  %v3767_v43 = vmax.f32 %v3765_v2, %v3766_v3  ;;  %v7592_v4 = vld [vmem:[#allocation4 + $0x664] ss:$16 sps:$4 sm:$0xff]   ;;  %v7595_v48 = vld [vmem:[#allocation4 + $0x66c] ss:$16 sps:$4 sm:$0xff]  }
 0x556   :  { %v3948_v53 = vmax.f32 %v3946_v14, %v3947_v6  ;;  %v4022_v12 = vmax.f32 %v4020_v9, %v4021_v52  ;;  %v3729_v0 = vrot.slane %v3728_v15, 1  ;;  %v7593_v59 = vld [vmem:[#allocation4 + $0x668] ss:$16 sps:$4 sm:$0xff]   ;;  %v7598_v14 = vld [vmem:[#allocation4 + $0x684] ss:$16 sps:$4 sm:$0xff]  }
 0x557   :  { %v3985_v54 = vmax.f32 %v3983_v45, %v3984_v10  ;;  %v4059_v44 = vmax.f32 %v4057_v18, %v4058_v51  ;;  %v7601_v9 = vld [vmem:[#allocation4 + $0x68c] ss:$16 sps:$4 sm:$0xff]   ;;  %v7604_v45 = vld [vmem:[#allocation4 + $0x6a4] ss:$16 sps:$4 sm:$0xff]   ;;  %v7602_v6 = vld [vmem:[#allocation4 + $0x6a0] ss:$16 sps:$4 sm:$0xff]  }
 0x558   :  { %v3949_v22 = vrot.slane %v3948_v53, 2  ;;  %v4023_v62 = vrot.slane %v4022_v12, 2  ;;  %v3730_v31 = vmax.f32 %v3728_v15, %v3729_v0  ;;  %v7607_v18 = vld [vmem:[#allocation4 + $0x6ac] ss:$16 sps:$4 sm:$0xff]   ;;  %v7605_v52 = vld [vmem:[#allocation4 + $0x6a8] ss:$16 sps:$4 sm:$0xff]  }
 0x559   :  { %v3986_v61 = vrot.slane %v3985_v54, 2  ;;  %v4060_v40 = vrot.slane %v4059_v44, 2  ;;  %v7610_v10 = vld [vmem:[#allocation4 + $0x6c4] ss:$16 sps:$4 sm:$0xff]   ;;  %v7613_v51 = vld [vmem:[#allocation4 + $0x6cc] ss:$16 sps:$4 sm:$0xff]  }
 0x55a   :  { %v3950_v23 = vmax.f32 %v3948_v53, %v3949_v22  ;;  %v4024_v41 = vmax.f32 %v4022_v12, %v4023_v62  ;;  %v7608_v33 = vld [vmem:[#allocation4 + $0x6c0] ss:$16 sps:$4 sm:$0xff]   ;;  %v7611_v15 = vld [vmem:[#allocation4 + $0x6c8] ss:$16 sps:$4 sm:$0xff]   ;;  %v7616_v53 = vld [vmem:[#allocation4 + $0x6e4] ss:$16 sps:$4 sm:$0xff]  }
 0x55b   :  { %v3987_v46 = vmax.f32 %v3985_v54, %v3986_v61  ;;  %v4061_v38 = vmax.f32 %v4059_v44, %v4060_v40  ;;  %v7619_v12 = vld [vmem:[#allocation4 + $0x6ec] ss:$16 sps:$4 sm:$0xff]   ;;  %v7614_v1 = vld [vmem:[#allocation4 + $0x6e0] ss:$16 sps:$4 sm:$0xff]   ;;  %v7617_v2 = vld [vmem:[#allocation4 + $0x6e8] ss:$16 sps:$4 sm:$0xff]  }
 0x55c   :  { %v3951_v55 = vrot.slane %v3950_v23, 1  ;;  %v4025_v60 = vrot.slane %v4024_v41, 1  ;;  %v7622_v54 = vld [vmem:[#allocation4 + $0x704] ss:$16 sps:$4 sm:$0xff]   ;;  %v7625_v44 = vld [vmem:[#allocation4 + $0x70c] ss:$16 sps:$4 sm:$0xff]  }
 0x55d   :  { %v3988_v57 = vrot.slane %v3987_v46, 1  ;;  %v4062_v34 = vrot.slane %v4061_v38, 1  ;;  %v7620_v22 = vld [vmem:[#allocation4 + $0x700] ss:$16 sps:$4 sm:$0xff]   ;;  %v7623_v62 = vld [vmem:[#allocation4 + $0x708] ss:$16 sps:$4 sm:$0xff]  }
 0x55e   :  { %v3952_v47 = vmax.f32 %v3950_v23, %v3951_v55  ;;  %v4026_v8 = vmax.f32 %v4024_v41, %v4025_v60  ;;  %v7628_v61 = vld [vmem:[#allocation4 + $0x724] ss:$16 sps:$4 sm:$0xff]   ;;  %v7631_v40 = vld [vmem:[#allocation4 + $0x72c] ss:$16 sps:$4 sm:$0xff]   ;;  %v7626_v29 = vld [vmem:[#allocation4 + $0x720] ss:$16 sps:$4 sm:$0xff]  }
 0x55f   :  { %v3989_v30 = vmax.f32 %v3987_v46, %v3988_v57  ;;  %v4063_v56 = vmax.f32 %v4061_v38, %v4062_v34  ;;  %v7629_v0 = vld [vmem:[#allocation4 + $0x728] ss:$16 sps:$4 sm:$0xff]   ;;  %v7634_v23 = vld [vmem:[#allocation4 + $0x744] ss:$16 sps:$4 sm:$0xff]   ;;  %v7637_v41 = vld [vmem:[#allocation4 + $0x74c] ss:$16 sps:$4 sm:$0xff]  }
 0x560   :  { %v4069_v7 = vsel %vm4064_vm3, %v3656_v35, %v3952_v47  ;;  %v9252_v13 = vsel %vm4064_vm3, %v3730_v31, %v4026_v8  ;;  %v7632_v16 = vld [vmem:[#allocation4 + $0x740] ss:$16 sps:$4 sm:$0xff]   ;;  %v7635_v3 = vld [vmem:[#allocation4 + $0x748] ss:$16 sps:$4 sm:$0xff]   ;;  %v7640_v46 = vld [vmem:[#allocation4 + $0x764] ss:$16 sps:$4 sm:$0xff]  }
 0x561   :  { %v4070_v26 = vsel %vm4064_vm3, %v3693_v63, %v3989_v30  ;;  %v4072_v36 = vsel %vm4064_vm3, %v3767_v43, %v4063_v56  ;;  %v4077_v50 = vpack.c.bf16 %v4069_v7, %v4069_v7  ;;  %v7643_v38 = vld [vmem:[#allocation4 + $0x76c] ss:$16 sps:$4 sm:$0xff]   ;;  %v7638_v55 = vld [vmem:[#allocation4 + $0x760] ss:$16 sps:$4 sm:$0xff]   ;;  %v7641_v60 = vld [vmem:[#allocation4 + $0x768] ss:$16 sps:$4 sm:$0xff]  }
 0x562   :  { %v4078_v5 = vpack.c.bf16 %v4070_v26, %v4070_v26  ;;  %v4080_v24 = vpack.c.bf16 %v4072_v36, %v4072_v36  ;;  %v7646_v57 = vld [vmem:[#allocation4 + $0x784] ss:$16 sps:$4 sm:$0xff]   ;;  %v7649_v34 = vld [vmem:[#allocation4 + $0x78c] ss:$16 sps:$4 sm:$0xff]   ;;  %v7644_v35 = vld [vmem:[#allocation4 + $0x780] ss:$16 sps:$4 sm:$0xff]  }
 0x563   :  { %v7647_v31 = vld [vmem:[#allocation4 + $0x788] ss:$16 sps:$4 sm:$0xff]   ;;  %v7652_v47 = vld [vmem:[#allocation4 + $0x7a4] ss:$16 sps:$4 sm:$0xff]   ;;  %v7655_v8 = vld [vmem:[#allocation4 + $0x7ac] ss:$16 sps:$4 sm:$0xff]  }
 0x564   :  { %5753 = vmatprep.mubr.bf16.mxu1 %v4078_v5  ;;  %5917 = vmatprep.mubr.bf16.mxu0 %v4078_v5  ;;  %v7650_v63 = vld [vmem:[#allocation4 + $0x7a0] ss:$16 sps:$4 sm:$0xff]   ;;  %v7653_v30 = vld [vmem:[#allocation4 + $0x7a8] ss:$16 sps:$4 sm:$0xff]   ;;  %v7658_v43 = vld [vmem:[#allocation4 + $0x7c4] ss:$16 sps:$4 sm:$0xff]  }
 0x565   :  { %5754 = vmatmul.mubr.bf16.vlgmr.msra.gmra.mrb[24].mxu1 %v4077_v50  ;;  %5918 = vmatmul.mubr.bf16.vlgmr.msra.gmra.mrb[72].mxu0 %v4077_v50  ;;  %v7661_v56 = vld [vmem:[#allocation4 + $0x7cc] ss:$16 sps:$4 sm:$0xff]   ;;  %v7656_v7 = vld [vmem:[#allocation4 + $0x7c0] ss:$16 sps:$4 sm:$0xff]   ;;  %v7659_v26 = vld [vmem:[#allocation4 + $0x7c8] ss:$16 sps:$4 sm:$0xff]  }
 0x566   :  { %5763 = vmatpush1.bf16.msra.mxu1 %v7572_v11  ;;  %5927 = vmatpush1.bf16.msra.mxu0 %v7575_v49  ;;  %v7664_v36 = vld [vmem:[#allocation4 + $0x7e4] ss:$16 sps:$4 sm:$0xff]   ;;  %v7667_v5 = vld [vmem:[#allocation4 + $0x7ec] ss:$16 sps:$4 sm:$0xff]   ;;  %v7662_v11 = vld [vmem:[#allocation4 + $0x7e0] ss:$16 sps:$4 sm:$0xff]  }
 0x567   :  { %5794 = vmatprep.mubr.bf16.mxu1 %v4080_v24  ;;  %5958 = vmatprep.mubr.bf16.mxu0 %v4080_v24  ;;  %v7665_v49 = vld [vmem:[#allocation4 + $0x7e8] ss:$16 sps:$4 sm:$0xff]   ;;  %v7670_v50 = vld [vmem:[#allocation6 + $0x4] ss:$8 sps:$4 sm:$0xff]   ;;  %v7673_v24 = vld [vmem:[#allocation6 + $0x14] ss:$8 sps:$4 sm:$0xff]  }
 0x568   :  { %5764 = vmatprep.subr.bf16.mxu1 %v7580_v19  ;;  %5928 = vmatprep.subr.bf16.mxu0 %v7583_v25  ;;  %v7668_v19 = vld [vmem:[#allocation6] ss:$8 sps:$4 sm:$0xff]   ;;  %v4079_v25 = vpack.c.bf16 %v9252_v13, %v9252_v13  ;;  %v7685_v13 = vld [vmem:[#allocation6 + $0x54] ss:$8 sps:$4 sm:$0xff]  }
 0x56a   :  { %5765 = vmatpush1.bf16.msra.mxu1 %v7578_v20  ;;  %5929 = vmatpush1.bf16.msra.mxu0 %v7581_v32  ;;  %v7671_v20 = vld [vmem:[#allocation6 + $0x10] ss:$8 sps:$4 sm:$0xff]   ;;  %v7676_v32 = vld [vmem:[#allocation6 + $0x24] ss:$8 sps:$4 sm:$0xff]  }
 0x56b   :  { %5766 = vmatprep.subr.bf16.mxu1 %v7586_v28  ;;  %5930 = vmatprep.subr.bf16.mxu0 %v7589_v42  ;;  %v7674_v28 = vld [vmem:[#allocation6 + $0x20] ss:$8 sps:$4 sm:$0xff]   ;;  %v7679_v42 = vld [vmem:[#allocation6 + $0x34] ss:$8 sps:$4 sm:$0xff]  }
 0x56e   :  { %5767 = vmatpush1.bf16.msra.mxu1 %v7584_v17  ;;  %5931 = vmatpush1.bf16.msra.mxu0 %v7587_v27  ;;  %v7677_v17 = vld [vmem:[#allocation6 + $0x30] ss:$8 sps:$4 sm:$0xff]   ;;  %v7682_v27 = vld [vmem:[#allocation6 + $0x44] ss:$8 sps:$4 sm:$0xff]  }
 0x56f   :  { %5768 = vmatprep.subr.bf16.mxu1 %v7592_v4  ;;  %5932 = vmatprep.subr.bf16.mxu0 %v7595_v48  ;;  %v7680_v4 = vld [vmem:[#allocation6 + $0x40] ss:$8 sps:$4 sm:$0xff]   ;;  %v7683_v48 = vld [vmem:[#allocation6 + $0x50] ss:$8 sps:$4 sm:$0xff]  }
 0x572   :  { %5769 = vmatpush1.bf16.msra.mxu1 %v7590_v21  ;;  %5933 = vmatpush1.bf16.msra.mxu0 %v7593_v59  ;;  %v7688_v21 = vld [vmem:[#allocation6 + $0x64] ss:$8 sps:$4 sm:$0xff]   ;;  %v7686_v59 = vld [vmem:[#allocation6 + $0x60] ss:$8 sps:$4 sm:$0xff]  }
 0x573   :  { %5770 = vmatprep.subr.bf16.mxu1 %v7598_v14  ;;  %5934 = vmatprep.subr.bf16.mxu0 %v7601_v9  ;;  %v7691_v14 = vld [vmem:[#allocation6 + $0x74] ss:$8 sps:$4 sm:$0xff]   ;;  %v7689_v9 = vld [vmem:[#allocation6 + $0x70] ss:$8 sps:$4 sm:$0xff]  }
 0x576   :  { %5771 = vmatpush1.bf16.msra.mxu1 %v7596_v58  ;;  %5935 = vmatpush1.bf16.msra.mxu0 %v7599_v39  ;;  %v7694_v58 = vld [vmem:[#allocation6 + $0x84] ss:$8 sps:$4 sm:$0xff]   ;;  %v7692_v39 = vld [vmem:[#allocation6 + $0x80] ss:$8 sps:$4 sm:$0xff]  }
 0x577   :  { %5772 = vmatprep.subr.bf16.mxu1 %v7604_v45  ;;  %5936 = vmatprep.subr.bf16.mxu0 %v7607_v18  ;;  %v7697_v45 = vld [vmem:[#allocation6 + $0x94] ss:$8 sps:$4 sm:$0xff]   ;;  %v7695_v18 = vld [vmem:[#allocation6 + $0x90] ss:$8 sps:$4 sm:$0xff]  }
 0x57a   :  { %5773 = vmatpush1.bf16.msra.mxu1 %v7602_v6  ;;  %5937 = vmatpush1.bf16.msra.mxu0 %v7605_v52  ;;  %v7700_v6 = vld [vmem:[#allocation6 + $0xa4] ss:$8 sps:$4 sm:$0xff]   ;;  %v7698_v52 = vld [vmem:[#allocation6 + $0xa0] ss:$8 sps:$4 sm:$0xff]  }
 0x57b   :  { %5774 = vmatprep.subr.bf16.mxu1 %v7610_v10  ;;  %5938 = vmatprep.subr.bf16.mxu0 %v7613_v51  ;;  %v7703_v10 = vld [vmem:[#allocation6 + $0xb4] ss:$8 sps:$4 sm:$0xff]   ;;  %v7701_v51 = vld [vmem:[#allocation6 + $0xb0] ss:$8 sps:$4 sm:$0xff]  }
 0x57e   :  { %5775 = vmatpush1.bf16.msra.mxu1 %v7608_v33  ;;  %5939 = vmatpush1.bf16.msra.mxu0 %v7611_v15  ;;  %v7706_v33 = vld [vmem:[#allocation6 + $0xc4] ss:$8 sps:$4 sm:$0xff]   ;;  %v7704_v15 = vld [vmem:[#allocation6 + $0xc0] ss:$8 sps:$4 sm:$0xff]  }
 0x57f   :  { %5776 = vmatprep.subr.bf16.mxu1 %v7616_v53  ;;  %5940 = vmatprep.subr.bf16.mxu0 %v7619_v12  ;;  %v7709_v53 = vld [vmem:[#allocation6 + $0xd4] ss:$8 sps:$4 sm:$0xff]   ;;  %v7707_v12 = vld [vmem:[#allocation6 + $0xd0] ss:$8 sps:$4 sm:$0xff]  }
 0x582   :  { %5777 = vmatpush1.bf16.msra.mxu1 %v7614_v1  ;;  %5941 = vmatpush1.bf16.msra.mxu0 %v7617_v2  ;;  %v7710_v1 = vld [vmem:[#allocation6 + $0xe0] ss:$8 sps:$4 sm:$0xff]   ;;  %v7712_v2 = vld [vmem:[#allocation6 + $0xe4] ss:$8 sps:$4 sm:$0xff]  }
 0x583   :  { %5778 = vmatprep.subr.bf16.mxu1 %v7622_v54  ;;  %5942 = vmatprep.subr.bf16.mxu0 %v7625_v44  ;;  %v7715_v54 = vld [vmem:[#allocation6 + $0xf4] ss:$8 sps:$4 sm:$0xff]   ;;  %v7713_v44 = vld [vmem:[#allocation6 + $0xf0] ss:$8 sps:$4 sm:$0xff]  }
 0x586   :  { %5779 = vmatpush1.bf16.msra.mxu1 %v7620_v22  ;;  %5943 = vmatpush1.bf16.msra.mxu0 %v7623_v62  ;;  %v7718_v22 = vld [vmem:[#allocation6 + $0x104] ss:$8 sps:$4 sm:$0xff]  }
 0x587   :  { %5780 = vmatprep.subr.bf16.mxu1 %v7628_v61  ;;  %5944 = vmatprep.subr.bf16.mxu0 %v7631_v40  ;;  %v7764_v62 = vld [vmem:[%s9346_s11 + $0x40] sm:$0xff]   ;;  %v7766_v40 = vld [vmem:[%s9346_s11 + $0x48] sm:$0xff]  }
 0x588   :  { %v7765_v61 = vld [vmem:[%s9346_s11] sm:$0xff]  }
 0x58a   :  { %5781 = vmatpush1.bf16.msra.mxu1 %v7626_v29  ;;  %5945 = vmatpush1.bf16.msra.mxu0 %v7629_v0  ;;  %v7767_v29 = vld [vmem:[%s9346_s11 + $0x8] sm:$0xff]   ;;  %v7768_v0 = vld [vmem:[%s9346_s11 + $0x50] sm:$0xff]  }
 0x58b   :  { %5782 = vmatprep.subr.bf16.mxu1 %v7634_v23  ;;  %5946 = vmatprep.subr.bf16.mxu0 %v7637_v41  ;;  %v7769_v23 = vld [vmem:[%s9346_s11 + $0x10] sm:$0xff]   ;;  %v7770_v41 = vld [vmem:[%s9346_s11 + $0x58] sm:$0xff]  }
 0x58e   :  { %5783 = vmatpush1.bf16.msra.mxu1 %v7632_v16  ;;  %5947 = vmatpush1.bf16.msra.mxu0 %v7635_v3  ;;  %v7771_v16 = vld [vmem:[%s9346_s11 + $0x18] sm:$0xff]   ;;  %v7772_v3 = vld [vmem:[%s9346_s11 + $0x60] sm:$0xff]  }
 0x58f   :  { %5784 = vmatprep.subr.bf16.mxu1 %v7640_v46  ;;  %5948 = vmatprep.subr.bf16.mxu0 %v7643_v38  ;;  %v7773_v46 = vld [vmem:[%s9346_s11 + $0x20] sm:$0xff]   ;;  %v7774_v38 = vld [vmem:[%s9346_s11 + $0x68] sm:$0xff]  }
 0x592   :  { %5785 = vmatpush1.bf16.msra.mxu1 %v7638_v55  ;;  %5949 = vmatpush1.bf16.msra.mxu0 %v7641_v60  ;;  %v7775_v55 = vld [vmem:[%s9346_s11 + $0x28] sm:$0xff]   ;;  %v9297_v60 = vld [vmem:[%s9343_s8] sm:$0xf] }
 0x593   :  { %5786 = vmatprep.subr.bf16.mxu1 %v7646_v57  ;;  %5950 = vmatprep.subr.bf16.mxu0 %v7649_v34  ;;  %v9360_v57 = vld [vmem:[#allocation9_spill] sm:$0xff] }
 0x594   :  { %v4342_v34 = vrot.slane %v9297_v60, %v9360_v57 }
 0x596   :  { %5787 = vmatpush1.bf16.msra.mxu1 %v7644_v35  ;;  %5951 = vmatpush1.bf16.msra.mxu0 %v7647_v31  ;;  %v9361_v35 = vld [vmem:[#allocation10_spill] sm:$0xff] }
 0x597   :  { %5788 = vmatprep.subr.bf16.mxu1 %v7652_v47  ;;  %5952 = vmatprep.subr.bf16.mxu0 %v7655_v8  ;;  %v4346_v31 = vrot.slane %v9297_v60, %v9361_v35  ;;  %v9362_v47 = vsub.s32 3, %v8444_v37 }
 0x599   :  { %v4354_v8 = vrot.slane %v9297_v60, %v9362_v47 }
 0x59a   :  { %5789 = vmatpush1.bf16.msra.mxu1 %v7650_v63  ;;  %5953 = vmatpush1.bf16.msra.mxu0 %v7653_v30 }
 0x59b   :  { %5790 = vmatprep.subr.bf16.mxu1 %v7658_v43  ;;  %5954 = vmatprep.subr.bf16.mxu0 %v7661_v56 }
 0x59e   :  { %5791 = vmatpush1.bf16.msra.mxu1 %v7656_v7  ;;  %5955 = vmatpush1.bf16.msra.mxu0 %v7659_v26 }
 0x59f   :  { %5792 = vmatprep.subr.bf16.mxu1 %v7664_v36  ;;  %5956 = vmatprep.subr.bf16.mxu0 %v7667_v5 }
 0x5a2   :  { %5793 = vmatpush1.bf16.msra.mxu1 %v7662_v11  ;;  %5957 = vmatpush1.bf16.msra.mxu0 %v7665_v49 }
 0x5a3   :  { %6371 = vmatprep.subr.bf16.mxu1 %v7670_v50  ;;  %7135 = vmatprep.subr.bf16.mxu0 %v7764_v62  ;;  %v9363_v62 = vsub.s32 2, %v8444_v37  ;;  %v7776_v37 = vld [vmem:[%s9346_s11 + $0x70] sm:$0xff]  }
 0x5a5   :  { %5795 = vmatmul.mubr.bf16.vlgmr.msra.gmra.mrb[24].mxu1 %v4079_v25  ;;  %5959 = vmatmul.mubr.bf16.vlgmr.msra.gmra.mrb[72].mxu0 %v4079_v25 }
 0x5a6   :  { %6372 = vmatpush1.bf16.msra.mxu1 %v7668_v19  ;;  %7136 = vmatpush3.bf16.msra.mxu0 %v7765_v61  ;;  %v4350_v61 = vrot.slane %v9297_v60, %v9363_v62  ;;  %v6039_v60 = vld [vmem:[%s9345_s10] sm:$0x3] }
 0x5a7   :  { %6373 = vmatprep.subr.bf16.mxu1 %v7673_v24  ;;  %7137 = vmatprep.subr.bf16.mxu0 %v7766_v40  ;;  %v7760_v40 = vld [vmem:[#allocation6 + $0x1e4] ss:$8 sps:$4 sm:$0xff]  }
 0x5aa   :  { %6374 = vmatpush1.bf16.msra.mxu1 %v7671_v20  ;;  %7138 = vmatpush3.bf16.msra.mxu0 %v7767_v29  ;;  %v7758_v29 = vld [vmem:[#allocation6 + $0x1e0] ss:$8 sps:$4 sm:$0xff]  }
 0x5ab   :  { %6375 = vmatprep.subr.bf16.mxu1 %v7676_v32  ;;  %7139 = vmatprep.subr.bf16.mxu0 %v7768_v0  ;;  %v7716_v32 = vld [vmem:[#allocation6 + $0x100] ss:$8 sps:$4 sm:$0xff]  }
 0x5ae   :  { %6376 = vmatpush1.bf16.msra.mxu1 %v7674_v28  ;;  %7140 = vmatpush3.bf16.msra.mxu0 %v7769_v23  ;;  %v7763_v23 = vld [vmem:[#allocation6 + $0x1f4] ss:$8 sps:$4 sm:$0xff]  }
 0x5af   :  { %6377 = vmatprep.subr.bf16.mxu1 %v7679_v42  ;;  %7141 = vmatprep.subr.bf16.mxu0 %v7770_v41  ;;  %v7721_v42 = vld [vmem:[#allocation6 + $0x114] ss:$8 sps:$4 sm:$0xff]   ;;  %v7761_v41 = vld [vmem:[#allocation6 + $0x1f0] ss:$8 sps:$4 sm:$0xff]  }
 0x5b2   :  { %6378 = vmatpush1.bf16.msra.mxu1 %v7677_v17  ;;  %7142 = vmatpush3.bf16.msra.mxu0 %v7771_v16 }
 0x5b3   :  { %6379 = vmatprep.subr.bf16.mxu1 %v7682_v27  ;;  %7143 = vmatprep.subr.bf16.mxu0 %v7772_v3  ;;  %v7719_v27 = vld [vmem:[#allocation6 + $0x110] ss:$8 sps:$4 sm:$0xff]  }
 0x5b6   :  { %6380 = vmatpush1.bf16.msra.mxu1 %v7680_v4  ;;  %7144 = vmatpush3.bf16.msra.mxu0 %v7773_v46  ;;  %v7724_v4 = vld [vmem:[#allocation6 + $0x124] ss:$8 sps:$4 sm:$0xff]   ;;  %v7777_v46 = vld [vmem:[%s9346_s11 + $0x30] sm:$0xff]  }
 0x5b7   :  { %6381 = vmatprep.subr.bf16.mxu1 %v7685_v13  ;;  %7145 = vmatprep.subr.bf16.mxu0 %v7774_v38  ;;  %v7722_v13 = vld [vmem:[#allocation6 + $0x120] ss:$8 sps:$4 sm:$0xff]   ;;  %v7778_v38 = vld [vmem:[%s9346_s11 + $0x78] sm:$0xff]  }
 0x5ba   :  { %6382 = vmatpush1.bf16.msra.mxu1 %v7683_v48  ;;  %7146 = vmatpush3.bf16.msra.mxu0 %v7775_v55  ;;  %v7727_v48 = vld [vmem:[#allocation6 + $0x134] ss:$8 sps:$4 sm:$0xff]  }
 0x5bb   :  { %6383 = vmatprep.subr.bf16.mxu1 %v7688_v21  ;;  %v7725_v21 = vld [vmem:[#allocation6 + $0x130] ss:$8 sps:$4 sm:$0xff]   ;;  %7147 = vmatprep.subr.bf16.mxu0 %v7776_v37 }
 0x5bc   :  { %v7779_v55 = vld [vmem:[%s9346_s11 + $0x38] sm:$0xff]  }
 0x5be   :  { %6384 = vmatpush1.bf16.msra.mxu1 %v7686_v59  ;;  %v7730_v59 = vld [vmem:[#allocation6 + $0x144] ss:$8 sps:$4 sm:$0xff]   ;;  %7148 = vmatpush3.bf16.msra.mxu0 %v7777_v46 }
 0x5bf   :  { %6385 = vmatprep.subr.bf16.mxu1 %v7691_v14  ;;  %v7728_v14 = vld [vmem:[#allocation6 + $0x140] ss:$8 sps:$4 sm:$0xff]   ;;  %7149 = vmatprep.subr.bf16.mxu0 %v7778_v38 }
 0x5c2   :  { %6386 = vmatpush1.bf16.msra.mxu1 %v7689_v9  ;;  %v7733_v9 = vld [vmem:[#allocation6 + $0x154] ss:$8 sps:$4 sm:$0xff]   ;;  %7150 = vmatpush3.bf16.msra.mxu0 %v7779_v55 }
 0x5c3   :  { %6387 = vmatprep.subr.bf16.mxu1 %v7694_v58  ;;  %v7731_v58 = vld [vmem:[#allocation6 + $0x150] ss:$8 sps:$4 sm:$0xff]  }
 0x5c6   :  { %6388 = vmatpush1.bf16.msra.mxu1 %v7692_v39  ;;  %v7736_v39 = vld [vmem:[#allocation6 + $0x164] ss:$8 sps:$4 sm:$0xff]  }
 0x5c7   :  { %6389 = vmatprep.subr.bf16.mxu1 %v7697_v45  ;;  %v7734_v45 = vld [vmem:[#allocation6 + $0x160] ss:$8 sps:$4 sm:$0xff]  }
 0x5ca   :  { %6390 = vmatpush1.bf16.msra.mxu1 %v7695_v18  ;;  %v7739_v18 = vld [vmem:[#allocation6 + $0x174] ss:$8 sps:$4 sm:$0xff]  }
 0x5cb   :  { %6391 = vmatprep.subr.bf16.mxu1 %v7700_v6  ;;  %v7737_v6 = vld [vmem:[#allocation6 + $0x170] ss:$8 sps:$4 sm:$0xff]  }
 0x5ce   :  { %6392 = vmatpush1.bf16.msra.mxu1 %v7698_v52  ;;  %v7742_v52 = vld [vmem:[#allocation6 + $0x184] ss:$8 sps:$4 sm:$0xff]  }
 0x5cf   :  { %6393 = vmatprep.subr.bf16.mxu1 %v7703_v10  ;;  %v7740_v10 = vld [vmem:[#allocation6 + $0x180] ss:$8 sps:$4 sm:$0xff]  }
 0x5d2   :  { %6394 = vmatpush1.bf16.msra.mxu1 %v7701_v51  ;;  %v7745_v51 = vld [vmem:[#allocation6 + $0x194] ss:$8 sps:$4 sm:$0xff]  }
 0x5d3   :  { %6395 = vmatprep.subr.bf16.mxu1 %v7706_v33  ;;  %v7743_v33 = vld [vmem:[#allocation6 + $0x190] ss:$8 sps:$4 sm:$0xff]  }
 0x5d6   :  { %6396 = vmatpush1.bf16.msra.mxu1 %v7704_v15  ;;  %v7748_v15 = vld [vmem:[#allocation6 + $0x1a4] ss:$8 sps:$4 sm:$0xff]  }
 0x5d7   :  { %6397 = vmatprep.subr.bf16.mxu1 %v7709_v53  ;;  %v7746_v53 = vld [vmem:[#allocation6 + $0x1a0] ss:$8 sps:$4 sm:$0xff]  }
 0x5da   :  { %6398 = vmatpush1.bf16.msra.mxu1 %v7707_v12  ;;  %v7751_v12 = vld [vmem:[#allocation6 + $0x1b4] ss:$8 sps:$4 sm:$0xff]  }
 0x5db   :  { %6399 = vmatprep.subr.bf16.mxu1 %v7712_v2  ;;  %v7754_v2 = vld [vmem:[#allocation6 + $0x1c4] ss:$8 sps:$4 sm:$0xff]  }
 0x5de   :  { %6400 = vmatpush1.bf16.msra.mxu1 %v7710_v1  ;;  %v7749_v1 = vld [vmem:[#allocation6 + $0x1b0] ss:$8 sps:$4 sm:$0xff]  }
 0x5df   :  { %6401 = vmatprep.subr.bf16.mxu1 %v7715_v54  ;;  %v7752_v54 = vld [vmem:[#allocation6 + $0x1c0] ss:$8 sps:$4 sm:$0xff]  }
 0x5e2   :  { %6402 = vmatpush1.bf16.msra.mxu1 %v7713_v44  ;;  %v7757_v44 = vld [vmem:[#allocation6 + $0x1d4] ss:$8 sps:$4 sm:$0xff]  }
 0x5e3   :  { %6412 = vmatprep.subr.bf16.mxu1 %v7718_v22  ;;  %v7755_v22 = vld [vmem:[#allocation6 + $0x1d0] ss:$8 sps:$4 sm:$0xff]  }
 0x678   :  { %v5796_v63 = vpop.f32.mrb[24].mxu1  ;;  %v9306_v30 = vpop.f32.mrb[72].mxu0 }
 0x679   :  { %v7231_v43 = vadd.f32 %v5796_v63, %v4342_v34  ;;  %v5798_v56 = vpop.f32.mrb[25].mxu1  ;;  %v5962_v7 = vpop.f32.mrb[73].mxu0  ;;  %v7233_v0 = vadd.f32 %v9306_v30, %v4350_v61  ;;  %v6044_v34 = vrot.slane %v6039_v60, %v9360_v57 }
 0x67a   :  { %v7232_v26 = vadd.f32 %v5798_v56, %v4346_v31  ;;  %v7234_v36 = vadd.f32 %v5962_v7, %v4354_v8  ;;  %v5800_v5 = vpop.f32.mrb[26].mxu1  ;;  %v5964_v11 = vpop.f32.mrb[74].mxu0  ;;  %v6048_v31 = vrot.slane %v6039_v60, %v9361_v35 }
 0x67b   :  { %v5967_v49 = vmax.f32 %v7231_v43, 0.0  ;;  %v5801_v50 = vpop.f32.mrb[27].mxu1  ;;  %v5965_v19 = vpop.f32.mrb[75].mxu0  ;;  %v5969_v16 = vmax.f32 %v7233_v0, 0.0 }
 0x67c   :  { %v5968_v25 = vmax.f32 %v7232_v26, 0.0  ;;  %v5970_v24 = vmax.f32 %v7234_v36, 0.0 }
 0x67d   :  { %v5971_v28 = vpack.c.bf16 %v5967_v49, %v5967_v49  ;;  %v5973_v3 = vpack.c.bf16 %v5969_v16, %v5969_v16  ;;  %v7082_v49 = vld [vmem:[%s9347_s12] ss:$0 sm:$0xff] }
 0x67e   :  { %v5972_v20 = vpack.c.bf16 %v5968_v25, %v5968_v25  ;;  %v5974_v17 = vpack.c.bf16 %v5970_v24, %v5970_v24 }
 0x680   :  { %6403 = vmatprep.mubr.bf16.mxu1 %v5972_v20 }
 0x681   :  { %6404 = vmatmul.mubr.bf16.vlgmr.msra.gmra.mrb[28].mxu1 %v5971_v28 }
 0x682   :  { %6413 = vmatpush1.bf16.msra.mxu1 %v7716_v32  ;;  %6444 = vmatprep.mubr.bf16.mxu1 %v5974_v17 }
 0x683   :  { %6414 = vmatprep.subr.bf16.mxu1 %v7721_v42 }
 0x686   :  { %6415 = vmatpush1.bf16.msra.mxu1 %v7719_v27 }
 0x687   :  { %6416 = vmatprep.subr.bf16.mxu1 %v7724_v4 }
 0x68a   :  { %6417 = vmatpush1.bf16.msra.mxu1 %v7722_v13 }
 0x68b   :  { %6418 = vmatprep.subr.bf16.mxu1 %v7727_v48 }
 0x68e   :  { %6419 = vmatpush1.bf16.msra.mxu1 %v7725_v21 }
 0x68f   :  { %6420 = vmatprep.subr.bf16.mxu1 %v7730_v59 }
 0x692   :  { %6421 = vmatpush1.bf16.msra.mxu1 %v7728_v14 }
 0x693   :  { %6422 = vmatprep.subr.bf16.mxu1 %v7733_v9 }
 0x696   :  { %6423 = vmatpush1.bf16.msra.mxu1 %v7731_v58 }
 0x697   :  { %6424 = vmatprep.subr.bf16.mxu1 %v7736_v39 }
 0x69a   :  { %6425 = vmatpush1.bf16.msra.mxu1 %v7734_v45 }
 0x69b   :  { %6426 = vmatprep.subr.bf16.mxu1 %v7739_v18 }
 0x69e   :  { %6427 = vmatpush1.bf16.msra.mxu1 %v7737_v6 }
 0x69f   :  { %6428 = vmatprep.subr.bf16.mxu1 %v7742_v52 }
 0x6a2   :  { %6429 = vmatpush1.bf16.msra.mxu1 %v7740_v10 }
 0x6a3   :  { %6430 = vmatprep.subr.bf16.mxu1 %v7745_v51 }
 0x6a6   :  { %6431 = vmatpush1.bf16.msra.mxu1 %v7743_v33 }
 0x6a7   :  { %6432 = vmatprep.subr.bf16.mxu1 %v7748_v15 }
 0x6aa   :  { %6433 = vmatpush1.bf16.msra.mxu1 %v7746_v53 }
 0x6ab   :  { %6434 = vmatprep.subr.bf16.mxu1 %v7751_v12 }
 0x6ae   :  { %6435 = vmatpush1.bf16.msra.mxu1 %v7749_v1 }
 0x6af   :  { %6436 = vmatprep.subr.bf16.mxu1 %v7754_v2 }
 0x6b2   :  { %6437 = vmatpush1.bf16.msra.mxu1 %v7752_v54 }
 0x6b3   :  { %6438 = vmatprep.subr.bf16.mxu1 %v7757_v44 }
 0x6b6   :  { %6439 = vmatpush1.bf16.msra.mxu1 %v7755_v22 }
 0x6b7   :  { %6440 = vmatprep.subr.bf16.mxu1 %v7760_v40 }
 0x6ba   :  { %6441 = vmatpush1.bf16.msra.mxu1 %v7758_v29 }
 0x6bb   :  { %6442 = vmatprep.subr.bf16.mxu1 %v7763_v23 }
 0x6be   :  { %6443 = vmatpush1.bf16.msra.mxu1 %v7761_v41 }
 0x6c1   :  { %6445 = vmatmul.mubr.bf16.vlgmr.msra.gmra.mrb[28].mxu1 %v5973_v3 }
 0x794   :  { %v6446_v47 = vpop.f32.mrb[28].mxu1 }
 0x795   :  { %v7235_v8 = vadd.f32 %v6446_v47, %v6044_v34  ;;  %v6448_v63 = vpop.f32.mrb[29].mxu1 }
 0x796   :  { %v7236_v30 = vadd.f32 %v6448_v63, %v6048_v31  ;;  %v6450_v43 = vpop.f32.mrb[30].mxu1 }
 0x797   :  { %v6453_v56 = vmax.f32 %v7235_v8, 0.0  ;;  %v6451_v7 = vpop.f32.mrb[31].mxu1 }
 0x798   :  { %v6454_v26 = vmax.f32 %v7236_v30, 0.0 }
 0x799   :  { %v6455_v5 = vpack.c.bf16 %v6453_v56, %v6453_v56 }
 0x79a   :  { %v6456_v36 = vpack.c.bf16 %v6454_v26, %v6454_v26 }
 0x79c   :  { %6624 = vmatprep.mubr.bf16.mxu0 %v6456_v36 }
 0x79d   :  { %6625 = vmatmul.mubr.bf16.vlgmr.msra.gmra.mrb[76].mxu0 %v6455_v5 }
 0x870   :  { %v7151_v11 = vpop.f32.mrb[76].mxu0 }
 0x871   :  { %v7152_v57 = vpop.f32.mrb[77].mxu0 }
 0x872   :  { %v7153_v50 = vadd.f32 %v7152_v57, %v7151_v11  ;;  %v7154_v35 = vpop.f32.mrb[78].mxu0 }
 0x873   :  { %v7155_v19 = vpop.f32.mrb[79].mxu0 }
 0x874   :  { %v6627_v25 = vadd.f32 %v7153_v50, %v7082_v49 }
 0x876   :  { %6633 = vst.msk [vmem:[%s9348_s13] sm:$0x3] %vm6632_vm4, %v6627_v25 }
 0x877   :  { %6638 = vsyncpa [#allocation3], 1 }
 0x878   :  { %6639 = vsyncpa [#allocation5], 1 }

</bundles_post_ra>
